<compile_context>
chip_gen: v7x
topology: tpu7x:2x2x1
jax: 0.10.0
libtpu: 0.0.40
codegen_flags: <defaults>
</compile_context>

<pallas_src>
import functools
import math

import numpy as np

import jax
import jax.numpy as jnp
from jax.experimental import pallas as pl
from jax.experimental.pallas import tpu as pltpu

D_MODEL = 32
NHEAD = 4
DIM_FF = 64
NUM_LAYERS = 2
EPS = 1e-5


def _vmem():
    return pl.BlockSpec(memory_space=pltpu.MemorySpace.VMEM)


# ---------------------------------------------------------------------------
# Fused decoder kernel: 2 layers (self-attn, cross-attn, FFN, 3x LayerNorm) +
# final LayerNorm, entirely resident in VMEM.
# ---------------------------------------------------------------------------
def _decoder_kernel(
    tgt_ref, mem_ref, qpos_ref, pos_ref, smask_ref, xmask_ref,
    sa_wqkv_ref, sa_bqkv_ref, sa_wo_ref, sa_bo_ref, sa_qpos_w_ref,
    ca_wq_ref, ca_bq_ref, ca_qpos_w_ref,
    ca_wk_ref, ca_bk_ref, ca_wv_ref, ca_bv_ref, ca_wo_ref, ca_bo_ref,
    ff_w1_ref, ff_b1_ref, ff_w2_ref, ff_b2_ref,
    ln_g_ref, ln_b_ref, fn_g_ref, fn_b_ref,
    out_ref,
    *, num_layers,
):
    f32 = jnp.float32
    x = tgt_ref[...].astype(f32)             # (Rq, E), rows interleaved r = l*B + b
    mem = mem_ref[...].astype(f32)            # (Rk, E)
    qpos = qpos_ref[...].astype(f32)          # (Rq, E)
    mem_pos = mem + pos_ref[...].astype(f32)  # memory + pos, reused by every layer
    self_mask = smask_ref[...]                # (Rq, Rq) additive 0 / -1e30
    cross_mask = xmask_ref[...]               # (Rq, Rk)

    Rq, E = x.shape
    H = NHEAD
    Dh = E // H
    scale = 1.0 / math.sqrt(Dh)

    def layernorm(y, g, b):
        mean = jnp.mean(y, axis=-1, keepdims=True)
        c = y - mean
        var = jnp.mean(c * c, axis=-1, keepdims=True)
        return c * jax.lax.rsqrt(var + EPS) * g + b

    def mdot(a, b):
        return jnp.dot(a, b, preferred_element_type=f32)

    def attention(q, k, v, wo, bo, mask):
        # q: (Rq, E); k, v: (Rn, E).  Batched over B via the block-diagonal mask
        # (no per-batch loop); head outputs are accumulated straight into the Wo
        # projection (no lane-wise head concat).
        q = q * scale                         # fold 1/sqrt(Dh) into Q (small operand)
        acc = None
        for h in range(H):
            hs = slice(h * Dh, (h + 1) * Dh)
            s = jax.lax.dot_general(
                q[:, hs], k[:, hs],
                dimension_numbers=(((1,), (1,)), ((), ())),
                preferred_element_type=f32) + mask          # (Rq, Rn)
            m = jnp.max(s, axis=-1, keepdims=True)
            p = jnp.exp(s - m)                               # masked entries -> 0
            inv = pl.reciprocal(jnp.sum(p, axis=-1, keepdims=True), approx=True)
            p = p * inv
            contrib = mdot(mdot(p, v[:, hs]), wo[hs, :])     # (Rq, E)
            acc = contrib if acc is None else acc + contrib
        return acc + bo

    # ------ x-independent work, hoisted off the layer-serial chain ------------
    qpos_sa = mdot(qpos, sa_qpos_w_ref[...])                    # (Rq, NL*2E): saQ|saK per layer
    qpos_ca = mdot(qpos, ca_qpos_w_ref[...])                    # (Rq, NL*E) : caQ per layer
    ca_k_all = mdot(mem_pos, ca_wk_ref[...]) + ca_bk_ref[...]   # (Rk, NL*E)
    ca_v_all = mdot(mem, ca_wv_ref[...]) + ca_bv_ref[...]       # (Rk, NL*E)

    for l in range(num_layers):
        # ---------------- self-attention: q = k = x + qpos, v = x ------------
        qkv = mdot(x, sa_wqkv_ref[l]) + sa_bqkv_ref[l]          # (Rq, 4E) lane-dense (128)
        q = qkv[:, 0:E] + qpos_sa[:, 2 * l * E:(2 * l + 1) * E]
        k = qkv[:, E:2 * E] + qpos_sa[:, (2 * l + 1) * E:(2 * l + 2) * E]
        v = qkv[:, 2 * E:3 * E]
        sa_out = attention(q, k, v, sa_wo_ref[l], sa_bo_ref[l], self_mask)
        x = layernorm(x + sa_out, ln_g_ref[3 * l + 0], ln_b_ref[3 * l + 0])

        # ---------------- cross-attention: q = x+qpos, k = mem+pos, v = mem ---
        q = mdot(x, ca_wq_ref[l]) + ca_bq_ref[l] + qpos_ca[:, l * E:(l + 1) * E]
        k = ca_k_all[:, l * E:(l + 1) * E]
        v = ca_v_all[:, l * E:(l + 1) * E]
        ca_out = attention(q, k, v, ca_wo_ref[l], ca_bo_ref[l], cross_mask)
        x = layernorm(x + ca_out, ln_g_ref[3 * l + 1], ln_b_ref[3 * l + 1])

        # ---------------- feed-forward ----------------------------------------
        hdn = jnp.maximum(mdot(x, ff_w1_ref[l]) + ff_b1_ref[l], 0.0)
        ff_out = mdot(hdn, ff_w2_ref[l]) + ff_b2_ref[l]
        x = layernorm(x + ff_out, ln_g_ref[3 * l + 2], ln_b_ref[3 * l + 2])

    # final decoder norm
    out_ref[...] = layernorm(x, fn_g_ref[...], fn_b_ref[...]).astype(out_ref.dtype)


# ---------------------------------------------------------------------------
# Wrapper: free reshapes only (interleaved (L*B, E) row layout, no transposes)
# ---------------------------------------------------------------------------
def transformer_decoder_forward(params, tgt, memory, query_pos, pos):
    Lq, B, E = tgt.shape
    Lk = memory.shape[0]
    Rq, Rk = Lq * B, Lk * B

    tgt2d = tgt.reshape(Rq, E)          # row r = l*B + b  (free reshape)
    mem2d = memory.reshape(Rk, E)
    qpos2d = query_pos.reshape(Rq, E)
    pos2d = pos.reshape(Rk, E)

    # Cross-batch block-diagonal additive masks (compile-time constants).
    rq_b = np.arange(Rq) % B
    rk_b = np.arange(Rk) % B
    self_mask = jnp.asarray(
        np.where(rq_b[:, None] == rq_b[None, :], 0.0, -1e30), dtype=jnp.float32)
    cross_mask = jnp.asarray(
        np.where(rq_b[:, None] == rk_b[None, :], 0.0, -1e30), dtype=jnp.float32)

    kernel = functools.partial(_decoder_kernel, num_layers=NUM_LAYERS)

    out2d = pl.pallas_call(
        kernel,
        out_shape=jax.ShapeDtypeStruct((Rq, E), jnp.float32),
        in_specs=[_vmem()] * 28,
        out_specs=_vmem(),
    )(
        tgt2d, mem2d, qpos2d, pos2d, self_mask, cross_mask,
        params["sa_wqkv"], params["sa_bqkv"], params["sa_wo"], params["sa_bo"],
        params["sa_qpos_w"],
        params["ca_wq"], params["ca_bq"], params["ca_qpos_w"],
        params["ca_wk_pk"], params["ca_bk_pk"], params["ca_wv_pk"], params["ca_bv_pk"],
        params["ca_wo"], params["ca_bo"],
        params["ff_w1"], params["ff_b1"], params["ff_w2"], params["ff_b2"],
        params["ln_g"], params["ln_b"], params["norm_g"], params["norm_b"],
    )

    return out2d.reshape(Lq, B, E)[None]    # output.unsqueeze(0) -> (1, Lq, B, E)


# ---------------------------------------------------------------------------
# Deterministic parameter init (packed / stacked layout consumed by the kernel)
# ---------------------------------------------------------------------------
def init_params(key):
    NL, E, F = NUM_LAYERS, D_MODEL, DIM_FF

    def dense(k, shape):
        fan_in, fan_out = shape[-2], shape[-1]
        lim = math.sqrt(6.0 / (fan_in + fan_out))
        return jax.random.uniform(k, shape, jnp.float32, -lim, lim)

    ks = jax.random.split(key, 10)
    sa_wq = dense(ks[0], (NL, E, E))
    sa_wk = dense(ks[1], (NL, E, E))
    sa_wv = dense(ks[2], (NL, E, E))
    sa_wo = dense(ks[3], (NL, E, E))
    ca_wq = dense(ks[4], (NL, E, E))
    ca_wk = dense(ks[5], (NL, E, E))
    ca_wv = dense(ks[6], (NL, E, E))
    ca_wo = dense(ks[7], (NL, E, E))
    ff_w1 = dense(ks[8], (NL, E, F))
    ff_w2 = dense(ks[9], (NL, F, E))

    # --- packed layouts consumed by the kernel ---
    pad = jnp.zeros((NL, E, E), jnp.float32)
    sa_wqkv = jnp.concatenate([sa_wq, sa_wk, sa_wv, pad], axis=-1)      # (NL, E, 4E) = 128 lanes
    sa_qpos_w = jnp.concatenate(                                        # (E, NL*2E) = 128 lanes
        [jnp.concatenate([sa_wq[l], sa_wk[l]], axis=-1) for l in range(NL)], axis=-1)
    ca_qpos_w = jnp.concatenate([ca_wq[l] for l in range(NL)], axis=-1)  # (E, NL*E)
    ca_wk_pk = jnp.concatenate([ca_wk[l] for l in range(NL)], axis=-1)   # (E, NL*E)
    ca_wv_pk = jnp.concatenate([ca_wv[l] for l in range(NL)], axis=-1)   # (E, NL*E)

    return {
        # self-attention: packed x-path [Wq|Wk|Wv|0] + hoisted qpos-path [Wq|Wk] per layer
        "sa_wqkv": sa_wqkv, "sa_bqkv": jnp.zeros((NL, 1, 4 * E), jnp.float32),
        "sa_wo": sa_wo,     "sa_bo": jnp.zeros((NL, 1, E), jnp.float32),
        "sa_qpos_w": sa_qpos_w,
        # cross-attention: per-layer Q (x-path) + hoisted qpos / mem_pos / mem paths
        "ca_wq": ca_wq,     "ca_bq": jnp.zeros((NL, 1, E), jnp.float32),
        "ca_qpos_w": ca_qpos_w,
        "ca_wk_pk": ca_wk_pk, "ca_bk_pk": jnp.zeros((1, NL * E), jnp.float32),
        "ca_wv_pk": ca_wv_pk, "ca_bv_pk": jnp.zeros((1, NL * E), jnp.float32),
        "ca_wo": ca_wo,     "ca_bo": jnp.zeros((NL, 1, E), jnp.float32),
        # FFN
        "ff_w1": ff_w1, "ff_b1": jnp.zeros((NL, 1, F), jnp.float32),
        "ff_w2": ff_w2, "ff_b2": jnp.zeros((NL, 1, E), jnp.float32),
        # per-layer LayerNorms (3 per layer: after self-attn / cross-attn / FFN)
        "ln_g": jnp.ones((NL * 3, 1, E), jnp.float32),
        "ln_b": jnp.zeros((NL * 3, 1, E), jnp.float32),
        # final decoder LayerNorm
        "norm_g": jnp.ones((1, E), jnp.float32),
        "norm_b": jnp.zeros((1, E), jnp.float32),
    }


if __name__ == "__main__":
    key = jax.random.PRNGKey(0)
    k_param, k_tgt, k_mem, k_qpos, k_pos = jax.random.split(key, 5)

    num_queries = 8   # tgt sequence length
    mem_len = 16      # flattened memory (e.g. 4x4 feature map)
    batch = 2

    params = init_params(k_param)
    tgt = jax.random.normal(k_tgt, (num_queries, batch, D_MODEL), jnp.float32)
    memory = jax.random.normal(k_mem, (mem_len, batch, D_MODEL), jnp.float32)
    query_pos = jax.random.normal(k_qpos, (num_queries, batch, D_MODEL), jnp.float32)
    pos = jax.random.normal(k_pos, (mem_len, batch, D_MODEL), jnp.float32)

    fwd = jax.jit(transformer_decoder_forward)
    out = fwd(params, tgt, memory, query_pos, pos)
    jax.block_until_ready(out)

    assert out.shape == (1, num_queries, batch, D_MODEL), out.shape
    assert bool(jnp.all(jnp.isfinite(out)))
    print("KERNEL_OK")
</pallas_src>

<mosaic_0001>
module attributes {stable_mosaic.version = 11 : i64} {
  func.func @_decoder_kernel(%arg0: memref<16x32xf32, #tpu.memory_space<vmem>>, %arg1: memref<32x32xf32, #tpu.memory_space<vmem>>, %arg2: memref<16x32xf32, #tpu.memory_space<vmem>>, %arg3: memref<32x32xf32, #tpu.memory_space<vmem>>, %arg4: memref<16x16xf32, #tpu.memory_space<vmem>>, %arg5: memref<16x32xf32, #tpu.memory_space<vmem>>, %arg6: memref<2x32x128xf32, #tpu.memory_space<vmem>>, %arg7: memref<2x1x128xf32, #tpu.memory_space<vmem>>, %arg8: memref<2x32x32xf32, #tpu.memory_space<vmem>>, %arg9: memref<2x1x32xf32, #tpu.memory_space<vmem>>, %arg10: memref<32x128xf32, #tpu.memory_space<vmem>>, %arg11: memref<2x32x32xf32, #tpu.memory_space<vmem>>, %arg12: memref<2x1x32xf32, #tpu.memory_space<vmem>>, %arg13: memref<32x64xf32, #tpu.memory_space<vmem>>, %arg14: memref<32x64xf32, #tpu.memory_space<vmem>>, %arg15: memref<1x64xf32, #tpu.memory_space<vmem>>, %arg16: memref<32x64xf32, #tpu.memory_space<vmem>>, %arg17: memref<1x64xf32, #tpu.memory_space<vmem>>, %arg18: memref<2x32x32xf32, #tpu.memory_space<vmem>>, %arg19: memref<2x1x32xf32, #tpu.memory_space<vmem>>, %arg20: memref<2x32x64xf32, #tpu.memory_space<vmem>>, %arg21: memref<2x1x64xf32, #tpu.memory_space<vmem>>, %arg22: memref<2x64x32xf32, #tpu.memory_space<vmem>>, %arg23: memref<2x1x32xf32, #tpu.memory_space<vmem>>, %arg24: memref<6x1x32xf32, #tpu.memory_space<vmem>>, %arg25: memref<6x1x32xf32, #tpu.memory_space<vmem>>, %arg26: memref<1x32xf32, #tpu.memory_space<vmem>>, %arg27: memref<1x32xf32, #tpu.memory_space<vmem>>, %arg28: memref<16x32xf32, #tpu.memory_space<vmem>>) attributes {dimension_semantics = [], scalar_prefetch = 0 : i64, scratch_operands = 0 : i64, tpu.core_type = #tpu.core_type<tc>} {
    %c0 = arith.constant 0 : index
    %c0_0 = arith.constant 0 : index
    %0 = vector.load %arg0[%c0, %c0_0] : memref<16x32xf32, #tpu.memory_space<vmem>>, vector<16x32xf32>
    %c0_1 = arith.constant 0 : index
    %c0_2 = arith.constant 0 : index
    %1 = vector.load %arg1[%c0_1, %c0_2] : memref<32x32xf32, #tpu.memory_space<vmem>>, vector<32x32xf32>
    %c0_3 = arith.constant 0 : index
    %c0_4 = arith.constant 0 : index
    %2 = vector.load %arg2[%c0_3, %c0_4] : memref<16x32xf32, #tpu.memory_space<vmem>>, vector<16x32xf32>
    %c0_5 = arith.constant 0 : index
    %c0_6 = arith.constant 0 : index
    %3 = vector.load %arg3[%c0_5, %c0_6] : memref<32x32xf32, #tpu.memory_space<vmem>>, vector<32x32xf32>
    %4 = arith.addf %1, %3 : vector<32x32xf32>
    %c0_7 = arith.constant 0 : index
    %c0_8 = arith.constant 0 : index
    %5 = vector.load %arg4[%c0_7, %c0_8] : memref<16x16xf32, #tpu.memory_space<vmem>>, vector<16x16xf32>
    %c0_9 = arith.constant 0 : index
    %c0_10 = arith.constant 0 : index
    %6 = vector.load %arg5[%c0_9, %c0_10] : memref<16x32xf32, #tpu.memory_space<vmem>>, vector<16x32xf32>
    %c0_11 = arith.constant 0 : index
    %c0_12 = arith.constant 0 : index
    %7 = vector.load %arg10[%c0_11, %c0_12] : memref<32x128xf32, #tpu.memory_space<vmem>>, vector<32x128xf32>
    %cst = arith.constant dense<0.000000e+00> : vector<16x128xf32>
    %8 = tpu.matmul %2, %7, %cst {dimension_numbers = #tpu.dot_dimension_numbers<[1], [0], [0], [1], [0, 0, 1, 1], [], []>} : vector<16x32xf32>, vector<32x128xf32>, vector<16x128xf32> -> vector<16x128xf32>
    %c0_13 = arith.constant 0 : index
    %c0_14 = arith.constant 0 : index
    %9 = vector.load %arg13[%c0_13, %c0_14] : memref<32x64xf32, #tpu.memory_space<vmem>>, vector<32x64xf32>
    %cst_15 = arith.constant dense<0.000000e+00> : vector<16x64xf32>
    %10 = tpu.matmul %2, %9, %cst_15 {dimension_numbers = #tpu.dot_dimension_numbers<[1], [0], [0], [1], [0, 0, 1, 1], [], []>} : vector<16x32xf32>, vector<32x64xf32>, vector<16x64xf32> -> vector<16x64xf32>
    %c0_16 = arith.constant 0 : index
    %c0_17 = arith.constant 0 : index
    %11 = vector.load %arg14[%c0_16, %c0_17] : memref<32x64xf32, #tpu.memory_space<vmem>>, vector<32x64xf32>
    %cst_18 = arith.constant dense<0.000000e+00> : vector<32x64xf32>
    %12 = tpu.matmul %4, %11, %cst_18 {dimension_numbers = #tpu.dot_dimension_numbers<[1], [0], [0], [1], [0, 0, 1, 1], [], []>} : vector<32x32xf32>, vector<32x64xf32>, vector<32x64xf32> -> vector<32x64xf32>
    %c0_19 = arith.constant 0 : index
    %c0_20 = arith.constant 0 : index
    %13 = vector.load %arg15[%c0_19, %c0_20] : memref<1x64xf32, #tpu.memory_space<vmem>>, vector<1x64xf32>
    %14 = vector.broadcast %13 : vector<1x64xf32> to vector<32x64xf32>
    %15 = arith.addf %12, %14 : vector<32x64xf32>
    %c0_21 = arith.constant 0 : index
    %c0_22 = arith.constant 0 : index
    %16 = vector.load %arg16[%c0_21, %c0_22] : memref<32x64xf32, #tpu.memory_space<vmem>>, vector<32x64xf32>
    %cst_23 = arith.constant dense<0.000000e+00> : vector<32x64xf32>
    %17 = tpu.matmul %1, %16, %cst_23 {dimension_numbers = #tpu.dot_dimension_numbers<[1], [0], [0], [1], [0, 0, 1, 1], [], []>} : vector<32x32xf32>, vector<32x64xf32>, vector<32x64xf32> -> vector<32x64xf32>
    %c0_24 = arith.constant 0 : index
    %c0_25 = arith.constant 0 : index
    %18 = vector.load %arg17[%c0_24, %c0_25] : memref<1x64xf32, #tpu.memory_space<vmem>>, vector<1x64xf32>
    %19 = vector.broadcast %18 : vector<1x64xf32> to vector<32x64xf32>
    %20 = arith.addf %17, %19 : vector<32x64xf32>
    %c0_26 = arith.constant 0 : index
    %c0_27 = arith.constant 0 : index
    %c0_28 = arith.constant 0 : index
    %21 = vector.load %arg6[%c0_26, %c0_27, %c0_28] : memref<2x32x128xf32, #tpu.memory_space<vmem>>, vector<1x32x128xf32>
    %22 = vector.shape_cast %21 : vector<1x32x128xf32> to vector<32x128xf32>
    %cst_29 = arith.constant dense<0.000000e+00> : vector<16x128xf32>
    %23 = tpu.matmul %0, %22, %cst_29 {dimension_numbers = #tpu.dot_dimension_numbers<[1], [0], [0], [1], [0, 0, 1, 1], [], []>} : vector<16x32xf32>, vector<32x128xf32>, vector<16x128xf32> -> vector<16x128xf32>
    %c0_30 = arith.constant 0 : index
    %c0_31 = arith.constant 0 : index
    %c0_32 = arith.constant 0 : index
    %24 = vector.load %arg7[%c0_30, %c0_31, %c0_32] : memref<2x1x128xf32, #tpu.memory_space<vmem>>, vector<1x1x128xf32>
    %25 = vector.shape_cast %24 : vector<1x1x128xf32> to vector<1x128xf32>
    %26 = vector.broadcast %25 : vector<1x128xf32> to vector<16x128xf32>
    %27 = arith.addf %23, %26 : vector<16x128xf32>
    %28 = vector.extract_strided_slice %27 {offsets = [0, 0], sizes = [16, 32], strides = [1, 1]} : vector<16x128xf32> to vector<16x32xf32>
    %29 = vector.extract_strided_slice %8 {offsets = [0, 0], sizes = [16, 32], strides = [1, 1]} : vector<16x128xf32> to vector<16x32xf32>
    %30 = arith.addf %28, %29 : vector<16x32xf32>
    %31 = vector.extract_strided_slice %27 {offsets = [0, 32], sizes = [16, 32], strides = [1, 1]} : vector<16x128xf32> to vector<16x32xf32>
    %32 = vector.extract_strided_slice %8 {offsets = [0, 32], sizes = [16, 32], strides = [1, 1]} : vector<16x128xf32> to vector<16x32xf32>
    %33 = arith.addf %31, %32 : vector<16x32xf32>
    %34 = vector.extract_strided_slice %27 {offsets = [0, 64], sizes = [16, 32], strides = [1, 1]} : vector<16x128xf32> to vector<16x32xf32>
    %c0_33 = arith.constant 0 : index
    %c0_34 = arith.constant 0 : index
    %c0_35 = arith.constant 0 : index
    %35 = vector.load %arg8[%c0_33, %c0_34, %c0_35] : memref<2x32x32xf32, #tpu.memory_space<vmem>>, vector<1x32x32xf32>
    %36 = vector.shape_cast %35 : vector<1x32x32xf32> to vector<32x32xf32>
    %c0_36 = arith.constant 0 : index
    %c0_37 = arith.constant 0 : index
    %c0_38 = arith.constant 0 : index
    %37 = vector.load %arg9[%c0_36, %c0_37, %c0_38] : memref<2x1x32xf32, #tpu.memory_space<vmem>>, vector<1x1x32xf32>
    %38 = vector.shape_cast %37 : vector<1x1x32xf32> to vector<1x32xf32>
    %cst_39 = arith.constant 0.353553385 : f32
    %39 = vector.broadcast %cst_39 : f32 to vector<16x32xf32>
    %40 = arith.mulf %30, %39 : vector<16x32xf32>
    %41 = vector.extract_strided_slice %40 {offsets = [0, 0], sizes = [16, 8], strides = [1, 1]} : vector<16x32xf32> to vector<16x8xf32>
    %42 = vector.extract_strided_slice %33 {offsets = [0, 0], sizes = [16, 8], strides = [1, 1]} : vector<16x32xf32> to vector<16x8xf32>
    %cst_40 = arith.constant dense<0.000000e+00> : vector<16x16xf32>
    %43 = tpu.matmul %41, %42, %cst_40 {dimension_numbers = #tpu.dot_dimension_numbers<[1], [1], [0], [0], [0, 0, 1, 0], [], []>} : vector<16x8xf32>, vector<16x8xf32>, vector<16x16xf32> -> vector<16x16xf32>
    %44 = arith.addf %43, %5 : vector<16x16xf32>
    %cst_41 = arith.constant dense<0xFF800000> : vector<16xf32>
    %45 = vector.multi_reduction <maximumf>, %44, %cst_41 [1] : vector<16x16xf32> to vector<16xf32>
    %46 = vector.shape_cast %45 : vector<16xf32> to vector<16x1xf32>
    %47 = vector.broadcast %46 : vector<16x1xf32> to vector<16x16xf32>
    %48 = arith.subf %44, %47 : vector<16x16xf32>
    %49 = math.exp %48 : vector<16x16xf32>
    %cst_42 = arith.constant dense<0.000000e+00> : vector<16xf32>
    %50 = vector.multi_reduction <add>, %49, %cst_42 [1] : vector<16x16xf32> to vector<16xf32>
    %51 = vector.shape_cast %50 : vector<16xf32> to vector<16x1xf32>
    %52 = tpu.reciprocal %51 {approx = true} : vector<16x1xf32> -> vector<16x1xf32>
    %53 = vector.broadcast %52 : vector<16x1xf32> to vector<16x16xf32>
    %54 = arith.mulf %49, %53 : vector<16x16xf32>
    %55 = vector.extract_strided_slice %34 {offsets = [0, 0], sizes = [16, 8], strides = [1, 1]} : vector<16x32xf32> to vector<16x8xf32>
    %cst_43 = arith.constant dense<0.000000e+00> : vector<16x8xf32>
    %56 = tpu.matmul %54, %55, %cst_43 {dimension_numbers = #tpu.dot_dimension_numbers<[1], [0], [0], [1], [0, 0, 1, 1], [], []>} : vector<16x16xf32>, vector<16x8xf32>, vector<16x8xf32> -> vector<16x8xf32>
    %57 = vector.extract_strided_slice %36 {offsets = [0, 0], sizes = [8, 32], strides = [1, 1]} : vector<32x32xf32> to vector<8x32xf32>
    %cst_44 = arith.constant dense<0.000000e+00> : vector<16x32xf32>
    %58 = tpu.matmul %56, %57, %cst_44 {dimension_numbers = #tpu.dot_dimension_numbers<[1], [0], [0], [1], [0, 0, 1, 1], [], []>} : vector<16x8xf32>, vector<8x32xf32>, vector<16x32xf32> -> vector<16x32xf32>
    %59 = vector.extract_strided_slice %40 {offsets = [0, 8], sizes = [16, 8], strides = [1, 1]} : vector<16x32xf32> to vector<16x8xf32>
    %60 = vector.extract_strided_slice %33 {offsets = [0, 8], sizes = [16, 8], strides = [1, 1]} : vector<16x32xf32> to vector<16x8xf32>
    %cst_45 = arith.constant dense<0.000000e+00> : vector<16x16xf32>
    %61 = tpu.matmul %59, %60, %cst_45 {dimension_numbers = #tpu.dot_dimension_numbers<[1], [1], [0], [0], [0, 0, 1, 0], [], []>} : vector<16x8xf32>, vector<16x8xf32>, vector<16x16xf32> -> vector<16x16xf32>
    %62 = arith.addf %61, %5 : vector<16x16xf32>
    %cst_46 = arith.constant dense<0xFF800000> : vector<16xf32>
    %63 = vector.multi_reduction <maximumf>, %62, %cst_46 [1] : vector<16x16xf32> to vector<16xf32>
    %64 = vector.shape_cast %63 : vector<16xf32> to vector<16x1xf32>
    %65 = vector.broadcast %64 : vector<16x1xf32> to vector<16x16xf32>
    %66 = arith.subf %62, %65 : vector<16x16xf32>
    %67 = math.exp %66 : vector<16x16xf32>
    %cst_47 = arith.constant dense<0.000000e+00> : vector<16xf32>
    %68 = vector.multi_reduction <add>, %67, %cst_47 [1] : vector<16x16xf32> to vector<16xf32>
    %69 = vector.shape_cast %68 : vector<16xf32> to vector<16x1xf32>
    %70 = tpu.reciprocal %69 {approx = true} : vector<16x1xf32> -> vector<16x1xf32>
    %71 = vector.broadcast %70 : vector<16x1xf32> to vector<16x16xf32>
    %72 = arith.mulf %67, %71 : vector<16x16xf32>
    %73 = vector.extract_strided_slice %34 {offsets = [0, 8], sizes = [16, 8], strides = [1, 1]} : vector<16x32xf32> to vector<16x8xf32>
    %cst_48 = arith.constant dense<0.000000e+00> : vector<16x8xf32>
    %74 = tpu.matmul %72, %73, %cst_48 {dimension_numbers = #tpu.dot_dimension_numbers<[1], [0], [0], [1], [0, 0, 1, 1], [], []>} : vector<16x16xf32>, vector<16x8xf32>, vector<16x8xf32> -> vector<16x8xf32>
    %75 = vector.extract_strided_slice %36 {offsets = [8, 0], sizes = [8, 32], strides = [1, 1]} : vector<32x32xf32> to vector<8x32xf32>
    %cst_49 = arith.constant dense<0.000000e+00> : vector<16x32xf32>
    %76 = tpu.matmul %74, %75, %cst_49 {dimension_numbers = #tpu.dot_dimension_numbers<[1], [0], [0], [1], [0, 0, 1, 1], [], []>} : vector<16x8xf32>, vector<8x32xf32>, vector<16x32xf32> -> vector<16x32xf32>
    %77 = arith.addf %58, %76 : vector<16x32xf32>
    %78 = vector.extract_strided_slice %40 {offsets = [0, 16], sizes = [16, 8], strides = [1, 1]} : vector<16x32xf32> to vector<16x8xf32>
    %79 = vector.extract_strided_slice %33 {offsets = [0, 16], sizes = [16, 8], strides = [1, 1]} : vector<16x32xf32> to vector<16x8xf32>
    %cst_50 = arith.constant dense<0.000000e+00> : vector<16x16xf32>
    %80 = tpu.matmul %78, %79, %cst_50 {dimension_numbers = #tpu.dot_dimension_numbers<[1], [1], [0], [0], [0, 0, 1, 0], [], []>} : vector<16x8xf32>, vector<16x8xf32>, vector<16x16xf32> -> vector<16x16xf32>
    %81 = arith.addf %80, %5 : vector<16x16xf32>
    %cst_51 = arith.constant dense<0xFF800000> : vector<16xf32>
    %82 = vector.multi_reduction <maximumf>, %81, %cst_51 [1] : vector<16x16xf32> to vector<16xf32>
    %83 = vector.shape_cast %82 : vector<16xf32> to vector<16x1xf32>
    %84 = vector.broadcast %83 : vector<16x1xf32> to vector<16x16xf32>
    %85 = arith.subf %81, %84 : vector<16x16xf32>
    %86 = math.exp %85 : vector<16x16xf32>
    %cst_52 = arith.constant dense<0.000000e+00> : vector<16xf32>
    %87 = vector.multi_reduction <add>, %86, %cst_52 [1] : vector<16x16xf32> to vector<16xf32>
    %88 = vector.shape_cast %87 : vector<16xf32> to vector<16x1xf32>
    %89 = tpu.reciprocal %88 {approx = true} : vector<16x1xf32> -> vector<16x1xf32>
    %90 = vector.broadcast %89 : vector<16x1xf32> to vector<16x16xf32>
    %91 = arith.mulf %86, %90 : vector<16x16xf32>
    %92 = vector.extract_strided_slice %34 {offsets = [0, 16], sizes = [16, 8], strides = [1, 1]} : vector<16x32xf32> to vector<16x8xf32>
    %cst_53 = arith.constant dense<0.000000e+00> : vector<16x8xf32>
    %93 = tpu.matmul %91, %92, %cst_53 {dimension_numbers = #tpu.dot_dimension_numbers<[1], [0], [0], [1], [0, 0, 1, 1], [], []>} : vector<16x16xf32>, vector<16x8xf32>, vector<16x8xf32> -> vector<16x8xf32>
    %94 = vector.extract_strided_slice %36 {offsets = [16, 0], sizes = [8, 32], strides = [1, 1]} : vector<32x32xf32> to vector<8x32xf32>
    %cst_54 = arith.constant dense<0.000000e+00> : vector<16x32xf32>
    %95 = tpu.matmul %93, %94, %cst_54 {dimension_numbers = #tpu.dot_dimension_numbers<[1], [0], [0], [1], [0, 0, 1, 1], [], []>} : vector<16x8xf32>, vector<8x32xf32>, vector<16x32xf32> -> vector<16x32xf32>
    %96 = arith.addf %77, %95 : vector<16x32xf32>
    %97 = vector.extract_strided_slice %40 {offsets = [0, 24], sizes = [16, 8], strides = [1, 1]} : vector<16x32xf32> to vector<16x8xf32>
    %98 = vector.extract_strided_slice %33 {offsets = [0, 24], sizes = [16, 8], strides = [1, 1]} : vector<16x32xf32> to vector<16x8xf32>
    %cst_55 = arith.constant dense<0.000000e+00> : vector<16x16xf32>
    %99 = tpu.matmul %97, %98, %cst_55 {dimension_numbers = #tpu.dot_dimension_numbers<[1], [1], [0], [0], [0, 0, 1, 0], [], []>} : vector<16x8xf32>, vector<16x8xf32>, vector<16x16xf32> -> vector<16x16xf32>
    %100 = arith.addf %99, %5 : vector<16x16xf32>
    %cst_56 = arith.constant dense<0xFF800000> : vector<16xf32>
    %101 = vector.multi_reduction <maximumf>, %100, %cst_56 [1] : vector<16x16xf32> to vector<16xf32>
    %102 = vector.shape_cast %101 : vector<16xf32> to vector<16x1xf32>
    %103 = vector.broadcast %102 : vector<16x1xf32> to vector<16x16xf32>
    %104 = arith.subf %100, %103 : vector<16x16xf32>
    %105 = math.exp %104 : vector<16x16xf32>
    %cst_57 = arith.constant dense<0.000000e+00> : vector<16xf32>
    %106 = vector.multi_reduction <add>, %105, %cst_57 [1] : vector<16x16xf32> to vector<16xf32>
    %107 = vector.shape_cast %106 : vector<16xf32> to vector<16x1xf32>
    %108 = tpu.reciprocal %107 {approx = true} : vector<16x1xf32> -> vector<16x1xf32>
    %109 = vector.broadcast %108 : vector<16x1xf32> to vector<16x16xf32>
    %110 = arith.mulf %105, %109 : vector<16x16xf32>
    %111 = vector.extract_strided_slice %34 {offsets = [0, 24], sizes = [16, 8], strides = [1, 1]} : vector<16x32xf32> to vector<16x8xf32>
    %cst_58 = arith.constant dense<0.000000e+00> : vector<16x8xf32>
    %112 = tpu.matmul %110, %111, %cst_58 {dimension_numbers = #tpu.dot_dimension_numbers<[1], [0], [0], [1], [0, 0, 1, 1], [], []>} : vector<16x16xf32>, vector<16x8xf32>, vector<16x8xf32> -> vector<16x8xf32>
    %113 = vector.extract_strided_slice %36 {offsets = [24, 0], sizes = [8, 32], strides = [1, 1]} : vector<32x32xf32> to vector<8x32xf32>
    %cst_59 = arith.constant dense<0.000000e+00> : vector<16x32xf32>
    %114 = tpu.matmul %112, %113, %cst_59 {dimension_numbers = #tpu.dot_dimension_numbers<[1], [0], [0], [1], [0, 0, 1, 1], [], []>} : vector<16x8xf32>, vector<8x32xf32>, vector<16x32xf32> -> vector<16x32xf32>
    %115 = arith.addf %96, %114 : vector<16x32xf32>
    %116 = vector.broadcast %38 : vector<1x32xf32> to vector<16x32xf32>
    %117 = arith.addf %115, %116 : vector<16x32xf32>
    %118 = arith.addf %0, %117 : vector<16x32xf32>
    %c0_60 = arith.constant 0 : index
    %c0_61 = arith.constant 0 : index
    %c0_62 = arith.constant 0 : index
    %119 = vector.load %arg24[%c0_60, %c0_61, %c0_62] : memref<6x1x32xf32, #tpu.memory_space<vmem>>, vector<1x1x32xf32>
    %120 = vector.shape_cast %119 : vector<1x1x32xf32> to vector<1x32xf32>
    %c0_63 = arith.constant 0 : index
    %c0_64 = arith.constant 0 : index
    %c0_65 = arith.constant 0 : index
    %121 = vector.load %arg25[%c0_63, %c0_64, %c0_65] : memref<6x1x32xf32, #tpu.memory_space<vmem>>, vector<1x1x32xf32>
    %122 = vector.shape_cast %121 : vector<1x1x32xf32> to vector<1x32xf32>
    %cst_66 = arith.constant dense<0.000000e+00> : vector<16xf32>
    %123 = vector.multi_reduction <add>, %118, %cst_66 [1] : vector<16x32xf32> to vector<16xf32>
    %124 = vector.shape_cast %123 : vector<16xf32> to vector<16x1xf32>
    %cst_67 = arith.constant 3.200000e+01 : f32
    %125 = vector.broadcast %cst_67 : f32 to vector<16x1xf32>
    %126 = arith.divf %124, %125 : vector<16x1xf32>
    %127 = vector.broadcast %126 : vector<16x1xf32> to vector<16x32xf32>
    %128 = arith.subf %118, %127 : vector<16x32xf32>
    %129 = arith.mulf %128, %128 : vector<16x32xf32>
    %cst_68 = arith.constant dense<0.000000e+00> : vector<16xf32>
    %130 = vector.multi_reduction <add>, %129, %cst_68 [1] : vector<16x32xf32> to vector<16xf32>
    %131 = vector.shape_cast %130 : vector<16xf32> to vector<16x1xf32>
    %cst_69 = arith.constant 3.200000e+01 : f32
    %132 = vector.broadcast %cst_69 : f32 to vector<16x1xf32>
    %133 = arith.divf %131, %132 : vector<16x1xf32>
    %cst_70 = arith.constant 9.99999974E-6 : f32
    %134 = vector.broadcast %cst_70 : f32 to vector<16x1xf32>
    %135 = arith.addf %133, %134 : vector<16x1xf32>
    %136 = math.rsqrt %135 : vector<16x1xf32>
    %137 = vector.broadcast %136 : vector<16x1xf32> to vector<16x32xf32>
    %138 = arith.mulf %128, %137 : vector<16x32xf32>
    %139 = vector.broadcast %120 : vector<1x32xf32> to vector<16x32xf32>
    %140 = arith.mulf %138, %139 : vector<16x32xf32>
    %141 = vector.broadcast %122 : vector<1x32xf32> to vector<16x32xf32>
    %142 = arith.addf %140, %141 : vector<16x32xf32>
    %c0_71 = arith.constant 0 : index
    %c0_72 = arith.constant 0 : index
    %c0_73 = arith.constant 0 : index
    %143 = vector.load %arg11[%c0_71, %c0_72, %c0_73] : memref<2x32x32xf32, #tpu.memory_space<vmem>>, vector<1x32x32xf32>
    %144 = vector.shape_cast %143 : vector<1x32x32xf32> to vector<32x32xf32>
    %cst_74 = arith.constant dense<0.000000e+00> : vector<16x32xf32>
    %145 = tpu.matmul %142, %144, %cst_74 {dimension_numbers = #tpu.dot_dimension_numbers<[1], [0], [0], [1], [0, 0, 1, 1], [], []>} : vector<16x32xf32>, vector<32x32xf32>, vector<16x32xf32> -> vector<16x32xf32>
    %c0_75 = arith.constant 0 : index
    %c0_76 = arith.constant 0 : index
    %c0_77 = arith.constant 0 : index
    %146 = vector.load %arg12[%c0_75, %c0_76, %c0_77] : memref<2x1x32xf32, #tpu.memory_space<vmem>>, vector<1x1x32xf32>
    %147 = vector.shape_cast %146 : vector<1x1x32xf32> to vector<1x32xf32>
    %148 = vector.broadcast %147 : vector<1x32xf32> to vector<16x32xf32>
    %149 = arith.addf %145, %148 : vector<16x32xf32>
    %150 = vector.extract_strided_slice %10 {offsets = [0, 0], sizes = [16, 32], strides = [1, 1]} : vector<16x64xf32> to vector<16x32xf32>
    %151 = arith.addf %149, %150 : vector<16x32xf32>
    %152 = vector.extract_strided_slice %15 {offsets = [0, 0], sizes = [32, 32], strides = [1, 1]} : vector<32x64xf32> to vector<32x32xf32>
    %153 = vector.extract_strided_slice %20 {offsets = [0, 0], sizes = [32, 32], strides = [1, 1]} : vector<32x64xf32> to vector<32x32xf32>
    %c0_78 = arith.constant 0 : index
    %c0_79 = arith.constant 0 : index
    %c0_80 = arith.constant 0 : index
    %154 = vector.load %arg18[%c0_78, %c0_79, %c0_80] : memref<2x32x32xf32, #tpu.memory_space<vmem>>, vector<1x32x32xf32>
    %155 = vector.shape_cast %154 : vector<1x32x32xf32> to vector<32x32xf32>
    %c0_81 = arith.constant 0 : index
    %c0_82 = arith.constant 0 : index
    %c0_83 = arith.constant 0 : index
    %156 = vector.load %arg19[%c0_81, %c0_82, %c0_83] : memref<2x1x32xf32, #tpu.memory_space<vmem>>, vector<1x1x32xf32>
    %157 = vector.shape_cast %156 : vector<1x1x32xf32> to vector<1x32xf32>
    %cst_84 = arith.constant 0.353553385 : f32
    %158 = vector.broadcast %cst_84 : f32 to vector<16x32xf32>
    %159 = arith.mulf %151, %158 : vector<16x32xf32>
    %160 = vector.extract_strided_slice %159 {offsets = [0, 0], sizes = [16, 8], strides = [1, 1]} : vector<16x32xf32> to vector<16x8xf32>
    %161 = vector.extract_strided_slice %152 {offsets = [0, 0], sizes = [32, 8], strides = [1, 1]} : vector<32x32xf32> to vector<32x8xf32>
    %cst_85 = arith.constant dense<0.000000e+00> : vector<16x32xf32>
    %162 = tpu.matmul %160, %161, %cst_85 {dimension_numbers = #tpu.dot_dimension_numbers<[1], [1], [0], [0], [0, 0, 1, 0], [], []>} : vector<16x8xf32>, vector<32x8xf32>, vector<16x32xf32> -> vector<16x32xf32>
    %163 = arith.addf %162, %6 : vector<16x32xf32>
    %cst_86 = arith.constant dense<0xFF800000> : vector<16xf32>
    %164 = vector.multi_reduction <maximumf>, %163, %cst_86 [1] : vector<16x32xf32> to vector<16xf32>
    %165 = vector.shape_cast %164 : vector<16xf32> to vector<16x1xf32>
    %166 = vector.broadcast %165 : vector<16x1xf32> to vector<16x32xf32>
    %167 = arith.subf %163, %166 : vector<16x32xf32>
    %168 = math.exp %167 : vector<16x32xf32>
    %cst_87 = arith.constant dense<0.000000e+00> : vector<16xf32>
    %169 = vector.multi_reduction <add>, %168, %cst_87 [1] : vector<16x32xf32> to vector<16xf32>
    %170 = vector.shape_cast %169 : vector<16xf32> to vector<16x1xf32>
    %171 = tpu.reciprocal %170 {approx = true} : vector<16x1xf32> -> vector<16x1xf32>
    %172 = vector.broadcast %171 : vector<16x1xf32> to vector<16x32xf32>
    %173 = arith.mulf %168, %172 : vector<16x32xf32>
    %174 = vector.extract_strided_slice %153 {offsets = [0, 0], sizes = [32, 8], strides = [1, 1]} : vector<32x32xf32> to vector<32x8xf32>
    %cst_88 = arith.constant dense<0.000000e+00> : vector<16x8xf32>
    %175 = tpu.matmul %173, %174, %cst_88 {dimension_numbers = #tpu.dot_dimension_numbers<[1], [0], [0], [1], [0, 0, 1, 1], [], []>} : vector<16x32xf32>, vector<32x8xf32>, vector<16x8xf32> -> vector<16x8xf32>
    %176 = vector.extract_strided_slice %155 {offsets = [0, 0], sizes = [8, 32], strides = [1, 1]} : vector<32x32xf32> to vector<8x32xf32>
    %cst_89 = arith.constant dense<0.000000e+00> : vector<16x32xf32>
    %177 = tpu.matmul %175, %176, %cst_89 {dimension_numbers = #tpu.dot_dimension_numbers<[1], [0], [0], [1], [0, 0, 1, 1], [], []>} : vector<16x8xf32>, vector<8x32xf32>, vector<16x32xf32> -> vector<16x32xf32>
    %178 = vector.extract_strided_slice %159 {offsets = [0, 8], sizes = [16, 8], strides = [1, 1]} : vector<16x32xf32> to vector<16x8xf32>
    %179 = vector.extract_strided_slice %152 {offsets = [0, 8], sizes = [32, 8], strides = [1, 1]} : vector<32x32xf32> to vector<32x8xf32>
    %cst_90 = arith.constant dense<0.000000e+00> : vector<16x32xf32>
    %180 = tpu.matmul %178, %179, %cst_90 {dimension_numbers = #tpu.dot_dimension_numbers<[1], [1], [0], [0], [0, 0, 1, 0], [], []>} : vector<16x8xf32>, vector<32x8xf32>, vector<16x32xf32> -> vector<16x32xf32>
    %181 = arith.addf %180, %6 : vector<16x32xf32>
    %cst_91 = arith.constant dense<0xFF800000> : vector<16xf32>
    %182 = vector.multi_reduction <maximumf>, %181, %cst_91 [1] : vector<16x32xf32> to vector<16xf32>
    %183 = vector.shape_cast %182 : vector<16xf32> to vector<16x1xf32>
    %184 = vector.broadcast %183 : vector<16x1xf32> to vector<16x32xf32>
    %185 = arith.subf %181, %184 : vector<16x32xf32>
    %186 = math.exp %185 : vector<16x32xf32>
    %cst_92 = arith.constant dense<0.000000e+00> : vector<16xf32>
    %187 = vector.multi_reduction <add>, %186, %cst_92 [1] : vector<16x32xf32> to vector<16xf32>
    %188 = vector.shape_cast %187 : vector<16xf32> to vector<16x1xf32>
    %189 = tpu.reciprocal %188 {approx = true} : vector<16x1xf32> -> vector<16x1xf32>
    %190 = vector.broadcast %189 : vector<16x1xf32> to vector<16x32xf32>
    %191 = arith.mulf %186, %190 : vector<16x32xf32>
    %192 = vector.extract_strided_slice %153 {offsets = [0, 8], sizes = [32, 8], strides = [1, 1]} : vector<32x32xf32> to vector<32x8xf32>
    %cst_93 = arith.constant dense<0.000000e+00> : vector<16x8xf32>
    %193 = tpu.matmul %191, %192, %cst_93 {dimension_numbers = #tpu.dot_dimension_numbers<[1], [0], [0], [1], [0, 0, 1, 1], [], []>} : vector<16x32xf32>, vector<32x8xf32>, vector<16x8xf32> -> vector<16x8xf32>
    %194 = vector.extract_strided_slice %155 {offsets = [8, 0], sizes = [8, 32], strides = [1, 1]} : vector<32x32xf32> to vector<8x32xf32>
    %cst_94 = arith.constant dense<0.000000e+00> : vector<16x32xf32>
    %195 = tpu.matmul %193, %194, %cst_94 {dimension_numbers = #tpu.dot_dimension_numbers<[1], [0], [0], [1], [0, 0, 1, 1], [], []>} : vector<16x8xf32>, vector<8x32xf32>, vector<16x32xf32> -> vector<16x32xf32>
    %196 = arith.addf %177, %195 : vector<16x32xf32>
    %197 = vector.extract_strided_slice %159 {offsets = [0, 16], sizes = [16, 8], strides = [1, 1]} : vector<16x32xf32> to vector<16x8xf32>
    %198 = vector.extract_strided_slice %152 {offsets = [0, 16], sizes = [32, 8], strides = [1, 1]} : vector<32x32xf32> to vector<32x8xf32>
    %cst_95 = arith.constant dense<0.000000e+00> : vector<16x32xf32>
    %199 = tpu.matmul %197, %198, %cst_95 {dimension_numbers = #tpu.dot_dimension_numbers<[1], [1], [0], [0], [0, 0, 1, 0], [], []>} : vector<16x8xf32>, vector<32x8xf32>, vector<16x32xf32> -> vector<16x32xf32>
    %200 = arith.addf %199, %6 : vector<16x32xf32>
    %cst_96 = arith.constant dense<0xFF800000> : vector<16xf32>
    %201 = vector.multi_reduction <maximumf>, %200, %cst_96 [1] : vector<16x32xf32> to vector<16xf32>
    %202 = vector.shape_cast %201 : vector<16xf32> to vector<16x1xf32>
    %203 = vector.broadcast %202 : vector<16x1xf32> to vector<16x32xf32>
    %204 = arith.subf %200, %203 : vector<16x32xf32>
    %205 = math.exp %204 : vector<16x32xf32>
    %cst_97 = arith.constant dense<0.000000e+00> : vector<16xf32>
    %206 = vector.multi_reduction <add>, %205, %cst_97 [1] : vector<16x32xf32> to vector<16xf32>
    %207 = vector.shape_cast %206 : vector<16xf32> to vector<16x1xf32>
    %208 = tpu.reciprocal %207 {approx = true} : vector<16x1xf32> -> vector<16x1xf32>
    %209 = vector.broadcast %208 : vector<16x1xf32> to vector<16x32xf32>
    %210 = arith.mulf %205, %209 : vector<16x32xf32>
    %211 = vector.extract_strided_slice %153 {offsets = [0, 16], sizes = [32, 8], strides = [1, 1]} : vector<32x32xf32> to vector<32x8xf32>
    %cst_98 = arith.constant dense<0.000000e+00> : vector<16x8xf32>
    %212 = tpu.matmul %210, %211, %cst_98 {dimension_numbers = #tpu.dot_dimension_numbers<[1], [0], [0], [1], [0, 0, 1, 1], [], []>} : vector<16x32xf32>, vector<32x8xf32>, vector<16x8xf32> -> vector<16x8xf32>
    %213 = vector.extract_strided_slice %155 {offsets = [16, 0], sizes = [8, 32], strides = [1, 1]} : vector<32x32xf32> to vector<8x32xf32>
    %cst_99 = arith.constant dense<0.000000e+00> : vector<16x32xf32>
    %214 = tpu.matmul %212, %213, %cst_99 {dimension_numbers = #tpu.dot_dimension_numbers<[1], [0], [0], [1], [0, 0, 1, 1], [], []>} : vector<16x8xf32>, vector<8x32xf32>, vector<16x32xf32> -> vector<16x32xf32>
    %215 = arith.addf %196, %214 : vector<16x32xf32>
    %216 = vector.extract_strided_slice %159 {offsets = [0, 24], sizes = [16, 8], strides = [1, 1]} : vector<16x32xf32> to vector<16x8xf32>
    %217 = vector.extract_strided_slice %152 {offsets = [0, 24], sizes = [32, 8], strides = [1, 1]} : vector<32x32xf32> to vector<32x8xf32>
    %cst_100 = arith.constant dense<0.000000e+00> : vector<16x32xf32>
    %218 = tpu.matmul %216, %217, %cst_100 {dimension_numbers = #tpu.dot_dimension_numbers<[1], [1], [0], [0], [0, 0, 1, 0], [], []>} : vector<16x8xf32>, vector<32x8xf32>, vector<16x32xf32> -> vector<16x32xf32>
    %219 = arith.addf %218, %6 : vector<16x32xf32>
    %cst_101 = arith.constant dense<0xFF800000> : vector<16xf32>
    %220 = vector.multi_reduction <maximumf>, %219, %cst_101 [1] : vector<16x32xf32> to vector<16xf32>
    %221 = vector.shape_cast %220 : vector<16xf32> to vector<16x1xf32>
    %222 = vector.broadcast %221 : vector<16x1xf32> to vector<16x32xf32>
    %223 = arith.subf %219, %222 : vector<16x32xf32>
    %224 = math.exp %223 : vector<16x32xf32>
    %cst_102 = arith.constant dense<0.000000e+00> : vector<16xf32>
    %225 = vector.multi_reduction <add>, %224, %cst_102 [1] : vector<16x32xf32> to vector<16xf32>
    %226 = vector.shape_cast %225 : vector<16xf32> to vector<16x1xf32>
    %227 = tpu.reciprocal %226 {approx = true} : vector<16x1xf32> -> vector<16x1xf32>
    %228 = vector.broadcast %227 : vector<16x1xf32> to vector<16x32xf32>
    %229 = arith.mulf %224, %228 : vector<16x32xf32>
    %230 = vector.extract_strided_slice %153 {offsets = [0, 24], sizes = [32, 8], strides = [1, 1]} : vector<32x32xf32> to vector<32x8xf32>
    %cst_103 = arith.constant dense<0.000000e+00> : vector<16x8xf32>
    %231 = tpu.matmul %229, %230, %cst_103 {dimension_numbers = #tpu.dot_dimension_numbers<[1], [0], [0], [1], [0, 0, 1, 1], [], []>} : vector<16x32xf32>, vector<32x8xf32>, vector<16x8xf32> -> vector<16x8xf32>
    %232 = vector.extract_strided_slice %155 {offsets = [24, 0], sizes = [8, 32], strides = [1, 1]} : vector<32x32xf32> to vector<8x32xf32>
    %cst_104 = arith.constant dense<0.000000e+00> : vector<16x32xf32>
    %233 = tpu.matmul %231, %232, %cst_104 {dimension_numbers = #tpu.dot_dimension_numbers<[1], [0], [0], [1], [0, 0, 1, 1], [], []>} : vector<16x8xf32>, vector<8x32xf32>, vector<16x32xf32> -> vector<16x32xf32>
    %234 = arith.addf %215, %233 : vector<16x32xf32>
    %235 = vector.broadcast %157 : vector<1x32xf32> to vector<16x32xf32>
    %236 = arith.addf %234, %235 : vector<16x32xf32>
    %237 = arith.addf %142, %236 : vector<16x32xf32>
    %c1 = arith.constant 1 : index
    %c0_105 = arith.constant 0 : index
    %c0_106 = arith.constant 0 : index
    %238 = vector.load %arg24[%c1, %c0_105, %c0_106] : memref<6x1x32xf32, #tpu.memory_space<vmem>>, vector<1x1x32xf32>
    %239 = vector.shape_cast %238 : vector<1x1x32xf32> to vector<1x32xf32>
    %c1_107 = arith.constant 1 : index
    %c0_108 = arith.constant 0 : index
    %c0_109 = arith.constant 0 : index
    %240 = vector.load %arg25[%c1_107, %c0_108, %c0_109] : memref<6x1x32xf32, #tpu.memory_space<vmem>>, vector<1x1x32xf32>
    %241 = vector.shape_cast %240 : vector<1x1x32xf32> to vector<1x32xf32>
    %cst_110 = arith.constant dense<0.000000e+00> : vector<16xf32>
    %242 = vector.multi_reduction <add>, %237, %cst_110 [1] : vector<16x32xf32> to vector<16xf32>
    %243 = vector.shape_cast %242 : vector<16xf32> to vector<16x1xf32>
    %cst_111 = arith.constant 3.200000e+01 : f32
    %244 = vector.broadcast %cst_111 : f32 to vector<16x1xf32>
    %245 = arith.divf %243, %244 : vector<16x1xf32>
    %246 = vector.broadcast %245 : vector<16x1xf32> to vector<16x32xf32>
    %247 = arith.subf %237, %246 : vector<16x32xf32>
    %248 = arith.mulf %247, %247 : vector<16x32xf32>
    %cst_112 = arith.constant dense<0.000000e+00> : vector<16xf32>
    %249 = vector.multi_reduction <add>, %248, %cst_112 [1] : vector<16x32xf32> to vector<16xf32>
    %250 = vector.shape_cast %249 : vector<16xf32> to vector<16x1xf32>
    %cst_113 = arith.constant 3.200000e+01 : f32
    %251 = vector.broadcast %cst_113 : f32 to vector<16x1xf32>
    %252 = arith.divf %250, %251 : vector<16x1xf32>
    %cst_114 = arith.constant 9.99999974E-6 : f32
    %253 = vector.broadcast %cst_114 : f32 to vector<16x1xf32>
    %254 = arith.addf %252, %253 : vector<16x1xf32>
    %255 = math.rsqrt %254 : vector<16x1xf32>
    %256 = vector.broadcast %255 : vector<16x1xf32> to vector<16x32xf32>
    %257 = arith.mulf %247, %256 : vector<16x32xf32>
    %258 = vector.broadcast %239 : vector<1x32xf32> to vector<16x32xf32>
    %259 = arith.mulf %257, %258 : vector<16x32xf32>
    %260 = vector.broadcast %241 : vector<1x32xf32> to vector<16x32xf32>
    %261 = arith.addf %259, %260 : vector<16x32xf32>
    %c0_115 = arith.constant 0 : index
    %c0_116 = arith.constant 0 : index
    %c0_117 = arith.constant 0 : index
    %262 = vector.load %arg20[%c0_115, %c0_116, %c0_117] : memref<2x32x64xf32, #tpu.memory_space<vmem>>, vector<1x32x64xf32>
    %263 = vector.shape_cast %262 : vector<1x32x64xf32> to vector<32x64xf32>
    %cst_118 = arith.constant dense<0.000000e+00> : vector<16x64xf32>
    %264 = tpu.matmul %261, %263, %cst_118 {dimension_numbers = #tpu.dot_dimension_numbers<[1], [0], [0], [1], [0, 0, 1, 1], [], []>} : vector<16x32xf32>, vector<32x64xf32>, vector<16x64xf32> -> vector<16x64xf32>
    %c0_119 = arith.constant 0 : index
    %c0_120 = arith.constant 0 : index
    %c0_121 = arith.constant 0 : index
    %265 = vector.load %arg21[%c0_119, %c0_120, %c0_121] : memref<2x1x64xf32, #tpu.memory_space<vmem>>, vector<1x1x64xf32>
    %266 = vector.shape_cast %265 : vector<1x1x64xf32> to vector<1x64xf32>
    %267 = vector.broadcast %266 : vector<1x64xf32> to vector<16x64xf32>
    %268 = arith.addf %264, %267 : vector<16x64xf32>
    %cst_122 = arith.constant 0.000000e+00 : f32
    %269 = vector.broadcast %cst_122 : f32 to vector<16x64xf32>
    %270 = arith.maximumf %268, %269 : vector<16x64xf32>
    %c0_123 = arith.constant 0 : index
    %c0_124 = arith.constant 0 : index
    %c0_125 = arith.constant 0 : index
    %271 = vector.load %arg22[%c0_123, %c0_124, %c0_125] : memref<2x64x32xf32, #tpu.memory_space<vmem>>, vector<1x64x32xf32>
    %272 = vector.shape_cast %271 : vector<1x64x32xf32> to vector<64x32xf32>
    %cst_126 = arith.constant dense<0.000000e+00> : vector<16x32xf32>
    %273 = tpu.matmul %270, %272, %cst_126 {dimension_numbers = #tpu.dot_dimension_numbers<[1], [0], [0], [1], [0, 0, 1, 1], [], []>} : vector<16x64xf32>, vector<64x32xf32>, vector<16x32xf32> -> vector<16x32xf32>
    %c0_127 = arith.constant 0 : index
    %c0_128 = arith.constant 0 : index
    %c0_129 = arith.constant 0 : index
    %274 = vector.load %arg23[%c0_127, %c0_128, %c0_129] : memref<2x1x32xf32, #tpu.memory_space<vmem>>, vector<1x1x32xf32>
    %275 = vector.shape_cast %274 : vector<1x1x32xf32> to vector<1x32xf32>
    %276 = vector.broadcast %275 : vector<1x32xf32> to vector<16x32xf32>
    %277 = arith.addf %273, %276 : vector<16x32xf32>
    %278 = arith.addf %261, %277 : vector<16x32xf32>
    %c2 = arith.constant 2 : index
    %c0_130 = arith.constant 0 : index
    %c0_131 = arith.constant 0 : index
    %279 = vector.load %arg24[%c2, %c0_130, %c0_131] : memref<6x1x32xf32, #tpu.memory_space<vmem>>, vector<1x1x32xf32>
    %280 = vector.shape_cast %279 : vector<1x1x32xf32> to vector<1x32xf32>
    %c2_132 = arith.constant 2 : index
    %c0_133 = arith.constant 0 : index
    %c0_134 = arith.constant 0 : index
    %281 = vector.load %arg25[%c2_132, %c0_133, %c0_134] : memref<6x1x32xf32, #tpu.memory_space<vmem>>, vector<1x1x32xf32>
    %282 = vector.shape_cast %281 : vector<1x1x32xf32> to vector<1x32xf32>
    %cst_135 = arith.constant dense<0.000000e+00> : vector<16xf32>
    %283 = vector.multi_reduction <add>, %278, %cst_135 [1] : vector<16x32xf32> to vector<16xf32>
    %284 = vector.shape_cast %283 : vector<16xf32> to vector<16x1xf32>
    %cst_136 = arith.constant 3.200000e+01 : f32
    %285 = vector.broadcast %cst_136 : f32 to vector<16x1xf32>
    %286 = arith.divf %284, %285 : vector<16x1xf32>
    %287 = vector.broadcast %286 : vector<16x1xf32> to vector<16x32xf32>
    %288 = arith.subf %278, %287 : vector<16x32xf32>
    %289 = arith.mulf %288, %288 : vector<16x32xf32>
    %cst_137 = arith.constant dense<0.000000e+00> : vector<16xf32>
    %290 = vector.multi_reduction <add>, %289, %cst_137 [1] : vector<16x32xf32> to vector<16xf32>
    %291 = vector.shape_cast %290 : vector<16xf32> to vector<16x1xf32>
    %cst_138 = arith.constant 3.200000e+01 : f32
    %292 = vector.broadcast %cst_138 : f32 to vector<16x1xf32>
    %293 = arith.divf %291, %292 : vector<16x1xf32>
    %cst_139 = arith.constant 9.99999974E-6 : f32
    %294 = vector.broadcast %cst_139 : f32 to vector<16x1xf32>
    %295 = arith.addf %293, %294 : vector<16x1xf32>
    %296 = math.rsqrt %295 : vector<16x1xf32>
    %297 = vector.broadcast %296 : vector<16x1xf32> to vector<16x32xf32>
    %298 = arith.mulf %288, %297 : vector<16x32xf32>
    %299 = vector.broadcast %280 : vector<1x32xf32> to vector<16x32xf32>
    %300 = arith.mulf %298, %299 : vector<16x32xf32>
    %301 = vector.broadcast %282 : vector<1x32xf32> to vector<16x32xf32>
    %302 = arith.addf %300, %301 : vector<16x32xf32>
    %c1_140 = arith.constant 1 : index
    %c0_141 = arith.constant 0 : index
    %c0_142 = arith.constant 0 : index
    %303 = vector.load %arg6[%c1_140, %c0_141, %c0_142] : memref<2x32x128xf32, #tpu.memory_space<vmem>>, vector<1x32x128xf32>
    %304 = vector.shape_cast %303 : vector<1x32x128xf32> to vector<32x128xf32>
    %cst_143 = arith.constant dense<0.000000e+00> : vector<16x128xf32>
    %305 = tpu.matmul %302, %304, %cst_143 {dimension_numbers = #tpu.dot_dimension_numbers<[1], [0], [0], [1], [0, 0, 1, 1], [], []>} : vector<16x32xf32>, vector<32x128xf32>, vector<16x128xf32> -> vector<16x128xf32>
    %c1_144 = arith.constant 1 : index
    %c0_145 = arith.constant 0 : index
    %c0_146 = arith.constant 0 : index
    %306 = vector.load %arg7[%c1_144, %c0_145, %c0_146] : memref<2x1x128xf32, #tpu.memory_space<vmem>>, vector<1x1x128xf32>
    %307 = vector.shape_cast %306 : vector<1x1x128xf32> to vector<1x128xf32>
    %308 = vector.broadcast %307 : vector<1x128xf32> to vector<16x128xf32>
    %309 = arith.addf %305, %308 : vector<16x128xf32>
    %310 = vector.extract_strided_slice %309 {offsets = [0, 0], sizes = [16, 32], strides = [1, 1]} : vector<16x128xf32> to vector<16x32xf32>
    %311 = vector.extract_strided_slice %8 {offsets = [0, 64], sizes = [16, 32], strides = [1, 1]} : vector<16x128xf32> to vector<16x32xf32>
    %312 = arith.addf %310, %311 : vector<16x32xf32>
    %313 = vector.extract_strided_slice %309 {offsets = [0, 32], sizes = [16, 32], strides = [1, 1]} : vector<16x128xf32> to vector<16x32xf32>
    %314 = vector.extract_strided_slice %8 {offsets = [0, 96], sizes = [16, 32], strides = [1, 1]} : vector<16x128xf32> to vector<16x32xf32>
    %315 = arith.addf %313, %314 : vector<16x32xf32>
    %316 = vector.extract_strided_slice %309 {offsets = [0, 64], sizes = [16, 32], strides = [1, 1]} : vector<16x128xf32> to vector<16x32xf32>
    %c1_147 = arith.constant 1 : index
    %c0_148 = arith.constant 0 : index
    %c0_149 = arith.constant 0 : index
    %317 = vector.load %arg8[%c1_147, %c0_148, %c0_149] : memref<2x32x32xf32, #tpu.memory_space<vmem>>, vector<1x32x32xf32>
    %318 = vector.shape_cast %317 : vector<1x32x32xf32> to vector<32x32xf32>
    %c1_150 = arith.constant 1 : index
    %c0_151 = arith.constant 0 : index
    %c0_152 = arith.constant 0 : index
    %319 = vector.load %arg9[%c1_150, %c0_151, %c0_152] : memref<2x1x32xf32, #tpu.memory_space<vmem>>, vector<1x1x32xf32>
    %320 = vector.shape_cast %319 : vector<1x1x32xf32> to vector<1x32xf32>
    %cst_153 = arith.constant 0.353553385 : f32
    %321 = vector.broadcast %cst_153 : f32 to vector<16x32xf32>
    %322 = arith.mulf %312, %321 : vector<16x32xf32>
    %323 = vector.extract_strided_slice %322 {offsets = [0, 0], sizes = [16, 8], strides = [1, 1]} : vector<16x32xf32> to vector<16x8xf32>
    %324 = vector.extract_strided_slice %315 {offsets = [0, 0], sizes = [16, 8], strides = [1, 1]} : vector<16x32xf32> to vector<16x8xf32>
    %cst_154 = arith.constant dense<0.000000e+00> : vector<16x16xf32>
    %325 = tpu.matmul %323, %324, %cst_154 {dimension_numbers = #tpu.dot_dimension_numbers<[1], [1], [0], [0], [0, 0, 1, 0], [], []>} : vector<16x8xf32>, vector<16x8xf32>, vector<16x16xf32> -> vector<16x16xf32>
    %326 = arith.addf %325, %5 : vector<16x16xf32>
    %cst_155 = arith.constant dense<0xFF800000> : vector<16xf32>
    %327 = vector.multi_reduction <maximumf>, %326, %cst_155 [1] : vector<16x16xf32> to vector<16xf32>
    %328 = vector.shape_cast %327 : vector<16xf32> to vector<16x1xf32>
    %329 = vector.broadcast %328 : vector<16x1xf32> to vector<16x16xf32>
    %330 = arith.subf %326, %329 : vector<16x16xf32>
    %331 = math.exp %330 : vector<16x16xf32>
    %cst_156 = arith.constant dense<0.000000e+00> : vector<16xf32>
    %332 = vector.multi_reduction <add>, %331, %cst_156 [1] : vector<16x16xf32> to vector<16xf32>
    %333 = vector.shape_cast %332 : vector<16xf32> to vector<16x1xf32>
    %334 = tpu.reciprocal %333 {approx = true} : vector<16x1xf32> -> vector<16x1xf32>
    %335 = vector.broadcast %334 : vector<16x1xf32> to vector<16x16xf32>
    %336 = arith.mulf %331, %335 : vector<16x16xf32>
    %337 = vector.extract_strided_slice %316 {offsets = [0, 0], sizes = [16, 8], strides = [1, 1]} : vector<16x32xf32> to vector<16x8xf32>
    %cst_157 = arith.constant dense<0.000000e+00> : vector<16x8xf32>
    %338 = tpu.matmul %336, %337, %cst_157 {dimension_numbers = #tpu.dot_dimension_numbers<[1], [0], [0], [1], [0, 0, 1, 1], [], []>} : vector<16x16xf32>, vector<16x8xf32>, vector<16x8xf32> -> vector<16x8xf32>
    %339 = vector.extract_strided_slice %318 {offsets = [0, 0], sizes = [8, 32], strides = [1, 1]} : vector<32x32xf32> to vector<8x32xf32>
    %cst_158 = arith.constant dense<0.000000e+00> : vector<16x32xf32>
    %340 = tpu.matmul %338, %339, %cst_158 {dimension_numbers = #tpu.dot_dimension_numbers<[1], [0], [0], [1], [0, 0, 1, 1], [], []>} : vector<16x8xf32>, vector<8x32xf32>, vector<16x32xf32> -> vector<16x32xf32>
    %341 = vector.extract_strided_slice %322 {offsets = [0, 8], sizes = [16, 8], strides = [1, 1]} : vector<16x32xf32> to vector<16x8xf32>
    %342 = vector.extract_strided_slice %315 {offsets = [0, 8], sizes = [16, 8], strides = [1, 1]} : vector<16x32xf32> to vector<16x8xf32>
    %cst_159 = arith.constant dense<0.000000e+00> : vector<16x16xf32>
    %343 = tpu.matmul %341, %342, %cst_159 {dimension_numbers = #tpu.dot_dimension_numbers<[1], [1], [0], [0], [0, 0, 1, 0], [], []>} : vector<16x8xf32>, vector<16x8xf32>, vector<16x16xf32> -> vector<16x16xf32>
    %344 = arith.addf %343, %5 : vector<16x16xf32>
    %cst_160 = arith.constant dense<0xFF800000> : vector<16xf32>
    %345 = vector.multi_reduction <maximumf>, %344, %cst_160 [1] : vector<16x16xf32> to vector<16xf32>
    %346 = vector.shape_cast %345 : vector<16xf32> to vector<16x1xf32>
    %347 = vector.broadcast %346 : vector<16x1xf32> to vector<16x16xf32>
    %348 = arith.subf %344, %347 : vector<16x16xf32>
    %349 = math.exp %348 : vector<16x16xf32>
    %cst_161 = arith.constant dense<0.000000e+00> : vector<16xf32>
    %350 = vector.multi_reduction <add>, %349, %cst_161 [1] : vector<16x16xf32> to vector<16xf32>
    %351 = vector.shape_cast %350 : vector<16xf32> to vector<16x1xf32>
    %352 = tpu.reciprocal %351 {approx = true} : vector<16x1xf32> -> vector<16x1xf32>
    %353 = vector.broadcast %352 : vector<16x1xf32> to vector<16x16xf32>
    %354 = arith.mulf %349, %353 : vector<16x16xf32>
    %355 = vector.extract_strided_slice %316 {offsets = [0, 8], sizes = [16, 8], strides = [1, 1]} : vector<16x32xf32> to vector<16x8xf32>
    %cst_162 = arith.constant dense<0.000000e+00> : vector<16x8xf32>
    %356 = tpu.matmul %354, %355, %cst_162 {dimension_numbers = #tpu.dot_dimension_numbers<[1], [0], [0], [1], [0, 0, 1, 1], [], []>} : vector<16x16xf32>, vector<16x8xf32>, vector<16x8xf32> -> vector<16x8xf32>
    %357 = vector.extract_strided_slice %318 {offsets = [8, 0], sizes = [8, 32], strides = [1, 1]} : vector<32x32xf32> to vector<8x32xf32>
    %cst_163 = arith.constant dense<0.000000e+00> : vector<16x32xf32>
    %358 = tpu.matmul %356, %357, %cst_163 {dimension_numbers = #tpu.dot_dimension_numbers<[1], [0], [0], [1], [0, 0, 1, 1], [], []>} : vector<16x8xf32>, vector<8x32xf32>, vector<16x32xf32> -> vector<16x32xf32>
    %359 = arith.addf %340, %358 : vector<16x32xf32>
    %360 = vector.extract_strided_slice %322 {offsets = [0, 16], sizes = [16, 8], strides = [1, 1]} : vector<16x32xf32> to vector<16x8xf32>
    %361 = vector.extract_strided_slice %315 {offsets = [0, 16], sizes = [16, 8], strides = [1, 1]} : vector<16x32xf32> to vector<16x8xf32>
    %cst_164 = arith.constant dense<0.000000e+00> : vector<16x16xf32>
    %362 = tpu.matmul %360, %361, %cst_164 {dimension_numbers = #tpu.dot_dimension_numbers<[1], [1], [0], [0], [0, 0, 1, 0], [], []>} : vector<16x8xf32>, vector<16x8xf32>, vector<16x16xf32> -> vector<16x16xf32>
    %363 = arith.addf %362, %5 : vector<16x16xf32>
    %cst_165 = arith.constant dense<0xFF800000> : vector<16xf32>
    %364 = vector.multi_reduction <maximumf>, %363, %cst_165 [1] : vector<16x16xf32> to vector<16xf32>
    %365 = vector.shape_cast %364 : vector<16xf32> to vector<16x1xf32>
    %366 = vector.broadcast %365 : vector<16x1xf32> to vector<16x16xf32>
    %367 = arith.subf %363, %366 : vector<16x16xf32>
    %368 = math.exp %367 : vector<16x16xf32>
    %cst_166 = arith.constant dense<0.000000e+00> : vector<16xf32>
    %369 = vector.multi_reduction <add>, %368, %cst_166 [1] : vector<16x16xf32> to vector<16xf32>
    %370 = vector.shape_cast %369 : vector<16xf32> to vector<16x1xf32>
    %371 = tpu.reciprocal %370 {approx = true} : vector<16x1xf32> -> vector<16x1xf32>
    %372 = vector.broadcast %371 : vector<16x1xf32> to vector<16x16xf32>
    %373 = arith.mulf %368, %372 : vector<16x16xf32>
    %374 = vector.extract_strided_slice %316 {offsets = [0, 16], sizes = [16, 8], strides = [1, 1]} : vector<16x32xf32> to vector<16x8xf32>
    %cst_167 = arith.constant dense<0.000000e+00> : vector<16x8xf32>
    %375 = tpu.matmul %373, %374, %cst_167 {dimension_numbers = #tpu.dot_dimension_numbers<[1], [0], [0], [1], [0, 0, 1, 1], [], []>} : vector<16x16xf32>, vector<16x8xf32>, vector<16x8xf32> -> vector<16x8xf32>
    %376 = vector.extract_strided_slice %318 {offsets = [16, 0], sizes = [8, 32], strides = [1, 1]} : vector<32x32xf32> to vector<8x32xf32>
    %cst_168 = arith.constant dense<0.000000e+00> : vector<16x32xf32>
    %377 = tpu.matmul %375, %376, %cst_168 {dimension_numbers = #tpu.dot_dimension_numbers<[1], [0], [0], [1], [0, 0, 1, 1], [], []>} : vector<16x8xf32>, vector<8x32xf32>, vector<16x32xf32> -> vector<16x32xf32>
    %378 = arith.addf %359, %377 : vector<16x32xf32>
    %379 = vector.extract_strided_slice %322 {offsets = [0, 24], sizes = [16, 8], strides = [1, 1]} : vector<16x32xf32> to vector<16x8xf32>
    %380 = vector.extract_strided_slice %315 {offsets = [0, 24], sizes = [16, 8], strides = [1, 1]} : vector<16x32xf32> to vector<16x8xf32>
    %cst_169 = arith.constant dense<0.000000e+00> : vector<16x16xf32>
    %381 = tpu.matmul %379, %380, %cst_169 {dimension_numbers = #tpu.dot_dimension_numbers<[1], [1], [0], [0], [0, 0, 1, 0], [], []>} : vector<16x8xf32>, vector<16x8xf32>, vector<16x16xf32> -> vector<16x16xf32>
    %382 = arith.addf %381, %5 : vector<16x16xf32>
    %cst_170 = arith.constant dense<0xFF800000> : vector<16xf32>
    %383 = vector.multi_reduction <maximumf>, %382, %cst_170 [1] : vector<16x16xf32> to vector<16xf32>
    %384 = vector.shape_cast %383 : vector<16xf32> to vector<16x1xf32>
    %385 = vector.broadcast %384 : vector<16x1xf32> to vector<16x16xf32>
    %386 = arith.subf %382, %385 : vector<16x16xf32>
    %387 = math.exp %386 : vector<16x16xf32>
    %cst_171 = arith.constant dense<0.000000e+00> : vector<16xf32>
    %388 = vector.multi_reduction <add>, %387, %cst_171 [1] : vector<16x16xf32> to vector<16xf32>
    %389 = vector.shape_cast %388 : vector<16xf32> to vector<16x1xf32>
    %390 = tpu.reciprocal %389 {approx = true} : vector<16x1xf32> -> vector<16x1xf32>
    %391 = vector.broadcast %390 : vector<16x1xf32> to vector<16x16xf32>
    %392 = arith.mulf %387, %391 : vector<16x16xf32>
    %393 = vector.extract_strided_slice %316 {offsets = [0, 24], sizes = [16, 8], strides = [1, 1]} : vector<16x32xf32> to vector<16x8xf32>
    %cst_172 = arith.constant dense<0.000000e+00> : vector<16x8xf32>
    %394 = tpu.matmul %392, %393, %cst_172 {dimension_numbers = #tpu.dot_dimension_numbers<[1], [0], [0], [1], [0, 0, 1, 1], [], []>} : vector<16x16xf32>, vector<16x8xf32>, vector<16x8xf32> -> vector<16x8xf32>
    %395 = vector.extract_strided_slice %318 {offsets = [24, 0], sizes = [8, 32], strides = [1, 1]} : vector<32x32xf32> to vector<8x32xf32>
    %cst_173 = arith.constant dense<0.000000e+00> : vector<16x32xf32>
    %396 = tpu.matmul %394, %395, %cst_173 {dimension_numbers = #tpu.dot_dimension_numbers<[1], [0], [0], [1], [0, 0, 1, 1], [], []>} : vector<16x8xf32>, vector<8x32xf32>, vector<16x32xf32> -> vector<16x32xf32>
    %397 = arith.addf %378, %396 : vector<16x32xf32>
    %398 = vector.broadcast %320 : vector<1x32xf32> to vector<16x32xf32>
    %399 = arith.addf %397, %398 : vector<16x32xf32>
    %400 = arith.addf %302, %399 : vector<16x32xf32>
    %c3 = arith.constant 3 : index
    %c0_174 = arith.constant 0 : index
    %c0_175 = arith.constant 0 : index
    %401 = vector.load %arg24[%c3, %c0_174, %c0_175] : memref<6x1x32xf32, #tpu.memory_space<vmem>>, vector<1x1x32xf32>
    %402 = vector.shape_cast %401 : vector<1x1x32xf32> to vector<1x32xf32>
    %c3_176 = arith.constant 3 : index
    %c0_177 = arith.constant 0 : index
    %c0_178 = arith.constant 0 : index
    %403 = vector.load %arg25[%c3_176, %c0_177, %c0_178] : memref<6x1x32xf32, #tpu.memory_space<vmem>>, vector<1x1x32xf32>
    %404 = vector.shape_cast %403 : vector<1x1x32xf32> to vector<1x32xf32>
    %cst_179 = arith.constant dense<0.000000e+00> : vector<16xf32>
    %405 = vector.multi_reduction <add>, %400, %cst_179 [1] : vector<16x32xf32> to vector<16xf32>
    %406 = vector.shape_cast %405 : vector<16xf32> to vector<16x1xf32>
    %cst_180 = arith.constant 3.200000e+01 : f32
    %407 = vector.broadcast %cst_180 : f32 to vector<16x1xf32>
    %408 = arith.divf %406, %407 : vector<16x1xf32>
    %409 = vector.broadcast %408 : vector<16x1xf32> to vector<16x32xf32>
    %410 = arith.subf %400, %409 : vector<16x32xf32>
    %411 = arith.mulf %410, %410 : vector<16x32xf32>
    %cst_181 = arith.constant dense<0.000000e+00> : vector<16xf32>
    %412 = vector.multi_reduction <add>, %411, %cst_181 [1] : vector<16x32xf32> to vector<16xf32>
    %413 = vector.shape_cast %412 : vector<16xf32> to vector<16x1xf32>
    %cst_182 = arith.constant 3.200000e+01 : f32
    %414 = vector.broadcast %cst_182 : f32 to vector<16x1xf32>
    %415 = arith.divf %413, %414 : vector<16x1xf32>
    %cst_183 = arith.constant 9.99999974E-6 : f32
    %416 = vector.broadcast %cst_183 : f32 to vector<16x1xf32>
    %417 = arith.addf %415, %416 : vector<16x1xf32>
    %418 = math.rsqrt %417 : vector<16x1xf32>
    %419 = vector.broadcast %418 : vector<16x1xf32> to vector<16x32xf32>
    %420 = arith.mulf %410, %419 : vector<16x32xf32>
    %421 = vector.broadcast %402 : vector<1x32xf32> to vector<16x32xf32>
    %422 = arith.mulf %420, %421 : vector<16x32xf32>
    %423 = vector.broadcast %404 : vector<1x32xf32> to vector<16x32xf32>
    %424 = arith.addf %422, %423 : vector<16x32xf32>
    %c1_184 = arith.constant 1 : index
    %c0_185 = arith.constant 0 : index
    %c0_186 = arith.constant 0 : index
    %425 = vector.load %arg11[%c1_184, %c0_185, %c0_186] : memref<2x32x32xf32, #tpu.memory_space<vmem>>, vector<1x32x32xf32>
    %426 = vector.shape_cast %425 : vector<1x32x32xf32> to vector<32x32xf32>
    %cst_187 = arith.constant dense<0.000000e+00> : vector<16x32xf32>
    %427 = tpu.matmul %424, %426, %cst_187 {dimension_numbers = #tpu.dot_dimension_numbers<[1], [0], [0], [1], [0, 0, 1, 1], [], []>} : vector<16x32xf32>, vector<32x32xf32>, vector<16x32xf32> -> vector<16x32xf32>
    %c1_188 = arith.constant 1 : index
    %c0_189 = arith.constant 0 : index
    %c0_190 = arith.constant 0 : index
    %428 = vector.load %arg12[%c1_188, %c0_189, %c0_190] : memref<2x1x32xf32, #tpu.memory_space<vmem>>, vector<1x1x32xf32>
    %429 = vector.shape_cast %428 : vector<1x1x32xf32> to vector<1x32xf32>
    %430 = vector.broadcast %429 : vector<1x32xf32> to vector<16x32xf32>
    %431 = arith.addf %427, %430 : vector<16x32xf32>
    %432 = vector.extract_strided_slice %10 {offsets = [0, 32], sizes = [16, 32], strides = [1, 1]} : vector<16x64xf32> to vector<16x32xf32>
    %433 = arith.addf %431, %432 : vector<16x32xf32>
    %434 = vector.extract_strided_slice %15 {offsets = [0, 32], sizes = [32, 32], strides = [1, 1]} : vector<32x64xf32> to vector<32x32xf32>
    %435 = vector.extract_strided_slice %20 {offsets = [0, 32], sizes = [32, 32], strides = [1, 1]} : vector<32x64xf32> to vector<32x32xf32>
    %c1_191 = arith.constant 1 : index
    %c0_192 = arith.constant 0 : index
    %c0_193 = arith.constant 0 : index
    %436 = vector.load %arg18[%c1_191, %c0_192, %c0_193] : memref<2x32x32xf32, #tpu.memory_space<vmem>>, vector<1x32x32xf32>
    %437 = vector.shape_cast %436 : vector<1x32x32xf32> to vector<32x32xf32>
    %c1_194 = arith.constant 1 : index
    %c0_195 = arith.constant 0 : index
    %c0_196 = arith.constant 0 : index
    %438 = vector.load %arg19[%c1_194, %c0_195, %c0_196] : memref<2x1x32xf32, #tpu.memory_space<vmem>>, vector<1x1x32xf32>
    %439 = vector.shape_cast %438 : vector<1x1x32xf32> to vector<1x32xf32>
    %cst_197 = arith.constant 0.353553385 : f32
    %440 = vector.broadcast %cst_197 : f32 to vector<16x32xf32>
    %441 = arith.mulf %433, %440 : vector<16x32xf32>
    %442 = vector.extract_strided_slice %441 {offsets = [0, 0], sizes = [16, 8], strides = [1, 1]} : vector<16x32xf32> to vector<16x8xf32>
    %443 = vector.extract_strided_slice %434 {offsets = [0, 0], sizes = [32, 8], strides = [1, 1]} : vector<32x32xf32> to vector<32x8xf32>
    %cst_198 = arith.constant dense<0.000000e+00> : vector<16x32xf32>
    %444 = tpu.matmul %442, %443, %cst_198 {dimension_numbers = #tpu.dot_dimension_numbers<[1], [1], [0], [0], [0, 0, 1, 0], [], []>} : vector<16x8xf32>, vector<32x8xf32>, vector<16x32xf32> -> vector<16x32xf32>
    %445 = arith.addf %444, %6 : vector<16x32xf32>
    %cst_199 = arith.constant dense<0xFF800000> : vector<16xf32>
    %446 = vector.multi_reduction <maximumf>, %445, %cst_199 [1] : vector<16x32xf32> to vector<16xf32>
    %447 = vector.shape_cast %446 : vector<16xf32> to vector<16x1xf32>
    %448 = vector.broadcast %447 : vector<16x1xf32> to vector<16x32xf32>
    %449 = arith.subf %445, %448 : vector<16x32xf32>
    %450 = math.exp %449 : vector<16x32xf32>
    %cst_200 = arith.constant dense<0.000000e+00> : vector<16xf32>
    %451 = vector.multi_reduction <add>, %450, %cst_200 [1] : vector<16x32xf32> to vector<16xf32>
    %452 = vector.shape_cast %451 : vector<16xf32> to vector<16x1xf32>
    %453 = tpu.reciprocal %452 {approx = true} : vector<16x1xf32> -> vector<16x1xf32>
    %454 = vector.broadcast %453 : vector<16x1xf32> to vector<16x32xf32>
    %455 = arith.mulf %450, %454 : vector<16x32xf32>
    %456 = vector.extract_strided_slice %435 {offsets = [0, 0], sizes = [32, 8], strides = [1, 1]} : vector<32x32xf32> to vector<32x8xf32>
    %cst_201 = arith.constant dense<0.000000e+00> : vector<16x8xf32>
    %457 = tpu.matmul %455, %456, %cst_201 {dimension_numbers = #tpu.dot_dimension_numbers<[1], [0], [0], [1], [0, 0, 1, 1], [], []>} : vector<16x32xf32>, vector<32x8xf32>, vector<16x8xf32> -> vector<16x8xf32>
    %458 = vector.extract_strided_slice %437 {offsets = [0, 0], sizes = [8, 32], strides = [1, 1]} : vector<32x32xf32> to vector<8x32xf32>
    %cst_202 = arith.constant dense<0.000000e+00> : vector<16x32xf32>
    %459 = tpu.matmul %457, %458, %cst_202 {dimension_numbers = #tpu.dot_dimension_numbers<[1], [0], [0], [1], [0, 0, 1, 1], [], []>} : vector<16x8xf32>, vector<8x32xf32>, vector<16x32xf32> -> vector<16x32xf32>
    %460 = vector.extract_strided_slice %441 {offsets = [0, 8], sizes = [16, 8], strides = [1, 1]} : vector<16x32xf32> to vector<16x8xf32>
    %461 = vector.extract_strided_slice %434 {offsets = [0, 8], sizes = [32, 8], strides = [1, 1]} : vector<32x32xf32> to vector<32x8xf32>
    %cst_203 = arith.constant dense<0.000000e+00> : vector<16x32xf32>
    %462 = tpu.matmul %460, %461, %cst_203 {dimension_numbers = #tpu.dot_dimension_numbers<[1], [1], [0], [0], [0, 0, 1, 0], [], []>} : vector<16x8xf32>, vector<32x8xf32>, vector<16x32xf32> -> vector<16x32xf32>
    %463 = arith.addf %462, %6 : vector<16x32xf32>
    %cst_204 = arith.constant dense<0xFF800000> : vector<16xf32>
    %464 = vector.multi_reduction <maximumf>, %463, %cst_204 [1] : vector<16x32xf32> to vector<16xf32>
    %465 = vector.shape_cast %464 : vector<16xf32> to vector<16x1xf32>
    %466 = vector.broadcast %465 : vector<16x1xf32> to vector<16x32xf32>
    %467 = arith.subf %463, %466 : vector<16x32xf32>
    %468 = math.exp %467 : vector<16x32xf32>
    %cst_205 = arith.constant dense<0.000000e+00> : vector<16xf32>
    %469 = vector.multi_reduction <add>, %468, %cst_205 [1] : vector<16x32xf32> to vector<16xf32>
    %470 = vector.shape_cast %469 : vector<16xf32> to vector<16x1xf32>
    %471 = tpu.reciprocal %470 {approx = true} : vector<16x1xf32> -> vector<16x1xf32>
    %472 = vector.broadcast %471 : vector<16x1xf32> to vector<16x32xf32>
    %473 = arith.mulf %468, %472 : vector<16x32xf32>
    %474 = vector.extract_strided_slice %435 {offsets = [0, 8], sizes = [32, 8], strides = [1, 1]} : vector<32x32xf32> to vector<32x8xf32>
    %cst_206 = arith.constant dense<0.000000e+00> : vector<16x8xf32>
    %475 = tpu.matmul %473, %474, %cst_206 {dimension_numbers = #tpu.dot_dimension_numbers<[1], [0], [0], [1], [0, 0, 1, 1], [], []>} : vector<16x32xf32>, vector<32x8xf32>, vector<16x8xf32> -> vector<16x8xf32>
    %476 = vector.extract_strided_slice %437 {offsets = [8, 0], sizes = [8, 32], strides = [1, 1]} : vector<32x32xf32> to vector<8x32xf32>
    %cst_207 = arith.constant dense<0.000000e+00> : vector<16x32xf32>
    %477 = tpu.matmul %475, %476, %cst_207 {dimension_numbers = #tpu.dot_dimension_numbers<[1], [0], [0], [1], [0, 0, 1, 1], [], []>} : vector<16x8xf32>, vector<8x32xf32>, vector<16x32xf32> -> vector<16x32xf32>
    %478 = arith.addf %459, %477 : vector<16x32xf32>
    %479 = vector.extract_strided_slice %441 {offsets = [0, 16], sizes = [16, 8], strides = [1, 1]} : vector<16x32xf32> to vector<16x8xf32>
    %480 = vector.extract_strided_slice %434 {offsets = [0, 16], sizes = [32, 8], strides = [1, 1]} : vector<32x32xf32> to vector<32x8xf32>
    %cst_208 = arith.constant dense<0.000000e+00> : vector<16x32xf32>
    %481 = tpu.matmul %479, %480, %cst_208 {dimension_numbers = #tpu.dot_dimension_numbers<[1], [1], [0], [0], [0, 0, 1, 0], [], []>} : vector<16x8xf32>, vector<32x8xf32>, vector<16x32xf32> -> vector<16x32xf32>
    %482 = arith.addf %481, %6 : vector<16x32xf32>
    %cst_209 = arith.constant dense<0xFF800000> : vector<16xf32>
    %483 = vector.multi_reduction <maximumf>, %482, %cst_209 [1] : vector<16x32xf32> to vector<16xf32>
    %484 = vector.shape_cast %483 : vector<16xf32> to vector<16x1xf32>
    %485 = vector.broadcast %484 : vector<16x1xf32> to vector<16x32xf32>
    %486 = arith.subf %482, %485 : vector<16x32xf32>
    %487 = math.exp %486 : vector<16x32xf32>
    %cst_210 = arith.constant dense<0.000000e+00> : vector<16xf32>
    %488 = vector.multi_reduction <add>, %487, %cst_210 [1] : vector<16x32xf32> to vector<16xf32>
    %489 = vector.shape_cast %488 : vector<16xf32> to vector<16x1xf32>
    %490 = tpu.reciprocal %489 {approx = true} : vector<16x1xf32> -> vector<16x1xf32>
    %491 = vector.broadcast %490 : vector<16x1xf32> to vector<16x32xf32>
    %492 = arith.mulf %487, %491 : vector<16x32xf32>
    %493 = vector.extract_strided_slice %435 {offsets = [0, 16], sizes = [32, 8], strides = [1, 1]} : vector<32x32xf32> to vector<32x8xf32>
    %cst_211 = arith.constant dense<0.000000e+00> : vector<16x8xf32>
    %494 = tpu.matmul %492, %493, %cst_211 {dimension_numbers = #tpu.dot_dimension_numbers<[1], [0], [0], [1], [0, 0, 1, 1], [], []>} : vector<16x32xf32>, vector<32x8xf32>, vector<16x8xf32> -> vector<16x8xf32>
    %495 = vector.extract_strided_slice %437 {offsets = [16, 0], sizes = [8, 32], strides = [1, 1]} : vector<32x32xf32> to vector<8x32xf32>
    %cst_212 = arith.constant dense<0.000000e+00> : vector<16x32xf32>
    %496 = tpu.matmul %494, %495, %cst_212 {dimension_numbers = #tpu.dot_dimension_numbers<[1], [0], [0], [1], [0, 0, 1, 1], [], []>} : vector<16x8xf32>, vector<8x32xf32>, vector<16x32xf32> -> vector<16x32xf32>
    %497 = arith.addf %478, %496 : vector<16x32xf32>
    %498 = vector.extract_strided_slice %441 {offsets = [0, 24], sizes = [16, 8], strides = [1, 1]} : vector<16x32xf32> to vector<16x8xf32>
    %499 = vector.extract_strided_slice %434 {offsets = [0, 24], sizes = [32, 8], strides = [1, 1]} : vector<32x32xf32> to vector<32x8xf32>
    %cst_213 = arith.constant dense<0.000000e+00> : vector<16x32xf32>
    %500 = tpu.matmul %498, %499, %cst_213 {dimension_numbers = #tpu.dot_dimension_numbers<[1], [1], [0], [0], [0, 0, 1, 0], [], []>} : vector<16x8xf32>, vector<32x8xf32>, vector<16x32xf32> -> vector<16x32xf32>
    %501 = arith.addf %500, %6 : vector<16x32xf32>
    %cst_214 = arith.constant dense<0xFF800000> : vector<16xf32>
    %502 = vector.multi_reduction <maximumf>, %501, %cst_214 [1] : vector<16x32xf32> to vector<16xf32>
    %503 = vector.shape_cast %502 : vector<16xf32> to vector<16x1xf32>
    %504 = vector.broadcast %503 : vector<16x1xf32> to vector<16x32xf32>
    %505 = arith.subf %501, %504 : vector<16x32xf32>
    %506 = math.exp %505 : vector<16x32xf32>
    %cst_215 = arith.constant dense<0.000000e+00> : vector<16xf32>
    %507 = vector.multi_reduction <add>, %506, %cst_215 [1] : vector<16x32xf32> to vector<16xf32>
    %508 = vector.shape_cast %507 : vector<16xf32> to vector<16x1xf32>
    %509 = tpu.reciprocal %508 {approx = true} : vector<16x1xf32> -> vector<16x1xf32>
    %510 = vector.broadcast %509 : vector<16x1xf32> to vector<16x32xf32>
    %511 = arith.mulf %506, %510 : vector<16x32xf32>
    %512 = vector.extract_strided_slice %435 {offsets = [0, 24], sizes = [32, 8], strides = [1, 1]} : vector<32x32xf32> to vector<32x8xf32>
    %cst_216 = arith.constant dense<0.000000e+00> : vector<16x8xf32>
    %513 = tpu.matmul %511, %512, %cst_216 {dimension_numbers = #tpu.dot_dimension_numbers<[1], [0], [0], [1], [0, 0, 1, 1], [], []>} : vector<16x32xf32>, vector<32x8xf32>, vector<16x8xf32> -> vector<16x8xf32>
    %514 = vector.extract_strided_slice %437 {offsets = [24, 0], sizes = [8, 32], strides = [1, 1]} : vector<32x32xf32> to vector<8x32xf32>
    %cst_217 = arith.constant dense<0.000000e+00> : vector<16x32xf32>
    %515 = tpu.matmul %513, %514, %cst_217 {dimension_numbers = #tpu.dot_dimension_numbers<[1], [0], [0], [1], [0, 0, 1, 1], [], []>} : vector<16x8xf32>, vector<8x32xf32>, vector<16x32xf32> -> vector<16x32xf32>
    %516 = arith.addf %497, %515 : vector<16x32xf32>
    %517 = vector.broadcast %439 : vector<1x32xf32> to vector<16x32xf32>
    %518 = arith.addf %516, %517 : vector<16x32xf32>
    %519 = arith.addf %424, %518 : vector<16x32xf32>
    %c4 = arith.constant 4 : index
    %c0_218 = arith.constant 0 : index
    %c0_219 = arith.constant 0 : index
    %520 = vector.load %arg24[%c4, %c0_218, %c0_219] : memref<6x1x32xf32, #tpu.memory_space<vmem>>, vector<1x1x32xf32>
    %521 = vector.shape_cast %520 : vector<1x1x32xf32> to vector<1x32xf32>
    %c4_220 = arith.constant 4 : index
    %c0_221 = arith.constant 0 : index
    %c0_222 = arith.constant 0 : index
    %522 = vector.load %arg25[%c4_220, %c0_221, %c0_222] : memref<6x1x32xf32, #tpu.memory_space<vmem>>, vector<1x1x32xf32>
    %523 = vector.shape_cast %522 : vector<1x1x32xf32> to vector<1x32xf32>
    %cst_223 = arith.constant dense<0.000000e+00> : vector<16xf32>
    %524 = vector.multi_reduction <add>, %519, %cst_223 [1] : vector<16x32xf32> to vector<16xf32>
    %525 = vector.shape_cast %524 : vector<16xf32> to vector<16x1xf32>
    %cst_224 = arith.constant 3.200000e+01 : f32
    %526 = vector.broadcast %cst_224 : f32 to vector<16x1xf32>
    %527 = arith.divf %525, %526 : vector<16x1xf32>
    %528 = vector.broadcast %527 : vector<16x1xf32> to vector<16x32xf32>
    %529 = arith.subf %519, %528 : vector<16x32xf32>
    %530 = arith.mulf %529, %529 : vector<16x32xf32>
    %cst_225 = arith.constant dense<0.000000e+00> : vector<16xf32>
    %531 = vector.multi_reduction <add>, %530, %cst_225 [1] : vector<16x32xf32> to vector<16xf32>
    %532 = vector.shape_cast %531 : vector<16xf32> to vector<16x1xf32>
    %cst_226 = arith.constant 3.200000e+01 : f32
    %533 = vector.broadcast %cst_226 : f32 to vector<16x1xf32>
    %534 = arith.divf %532, %533 : vector<16x1xf32>
    %cst_227 = arith.constant 9.99999974E-6 : f32
    %535 = vector.broadcast %cst_227 : f32 to vector<16x1xf32>
    %536 = arith.addf %534, %535 : vector<16x1xf32>
    %537 = math.rsqrt %536 : vector<16x1xf32>
    %538 = vector.broadcast %537 : vector<16x1xf32> to vector<16x32xf32>
    %539 = arith.mulf %529, %538 : vector<16x32xf32>
    %540 = vector.broadcast %521 : vector<1x32xf32> to vector<16x32xf32>
    %541 = arith.mulf %539, %540 : vector<16x32xf32>
    %542 = vector.broadcast %523 : vector<1x32xf32> to vector<16x32xf32>
    %543 = arith.addf %541, %542 : vector<16x32xf32>
    %c1_228 = arith.constant 1 : index
    %c0_229 = arith.constant 0 : index
    %c0_230 = arith.constant 0 : index
    %544 = vector.load %arg20[%c1_228, %c0_229, %c0_230] : memref<2x32x64xf32, #tpu.memory_space<vmem>>, vector<1x32x64xf32>
    %545 = vector.shape_cast %544 : vector<1x32x64xf32> to vector<32x64xf32>
    %cst_231 = arith.constant dense<0.000000e+00> : vector<16x64xf32>
    %546 = tpu.matmul %543, %545, %cst_231 {dimension_numbers = #tpu.dot_dimension_numbers<[1], [0], [0], [1], [0, 0, 1, 1], [], []>} : vector<16x32xf32>, vector<32x64xf32>, vector<16x64xf32> -> vector<16x64xf32>
    %c1_232 = arith.constant 1 : index
    %c0_233 = arith.constant 0 : index
    %c0_234 = arith.constant 0 : index
    %547 = vector.load %arg21[%c1_232, %c0_233, %c0_234] : memref<2x1x64xf32, #tpu.memory_space<vmem>>, vector<1x1x64xf32>
    %548 = vector.shape_cast %547 : vector<1x1x64xf32> to vector<1x64xf32>
    %549 = vector.broadcast %548 : vector<1x64xf32> to vector<16x64xf32>
    %550 = arith.addf %546, %549 : vector<16x64xf32>
    %cst_235 = arith.constant 0.000000e+00 : f32
    %551 = vector.broadcast %cst_235 : f32 to vector<16x64xf32>
    %552 = arith.maximumf %550, %551 : vector<16x64xf32>
    %c1_236 = arith.constant 1 : index
    %c0_237 = arith.constant 0 : index
    %c0_238 = arith.constant 0 : index
    %553 = vector.load %arg22[%c1_236, %c0_237, %c0_238] : memref<2x64x32xf32, #tpu.memory_space<vmem>>, vector<1x64x32xf32>
    %554 = vector.shape_cast %553 : vector<1x64x32xf32> to vector<64x32xf32>
    %cst_239 = arith.constant dense<0.000000e+00> : vector<16x32xf32>
    %555 = tpu.matmul %552, %554, %cst_239 {dimension_numbers = #tpu.dot_dimension_numbers<[1], [0], [0], [1], [0, 0, 1, 1], [], []>} : vector<16x64xf32>, vector<64x32xf32>, vector<16x32xf32> -> vector<16x32xf32>
    %c1_240 = arith.constant 1 : index
    %c0_241 = arith.constant 0 : index
    %c0_242 = arith.constant 0 : index
    %556 = vector.load %arg23[%c1_240, %c0_241, %c0_242] : memref<2x1x32xf32, #tpu.memory_space<vmem>>, vector<1x1x32xf32>
    %557 = vector.shape_cast %556 : vector<1x1x32xf32> to vector<1x32xf32>
    %558 = vector.broadcast %557 : vector<1x32xf32> to vector<16x32xf32>
    %559 = arith.addf %555, %558 : vector<16x32xf32>
    %560 = arith.addf %543, %559 : vector<16x32xf32>
    %c5 = arith.constant 5 : index
    %c0_243 = arith.constant 0 : index
    %c0_244 = arith.constant 0 : index
    %561 = vector.load %arg24[%c5, %c0_243, %c0_244] : memref<6x1x32xf32, #tpu.memory_space<vmem>>, vector<1x1x32xf32>
    %562 = vector.shape_cast %561 : vector<1x1x32xf32> to vector<1x32xf32>
    %c5_245 = arith.constant 5 : index
    %c0_246 = arith.constant 0 : index
    %c0_247 = arith.constant 0 : index
    %563 = vector.load %arg25[%c5_245, %c0_246, %c0_247] : memref<6x1x32xf32, #tpu.memory_space<vmem>>, vector<1x1x32xf32>
    %564 = vector.shape_cast %563 : vector<1x1x32xf32> to vector<1x32xf32>
    %cst_248 = arith.constant dense<0.000000e+00> : vector<16xf32>
    %565 = vector.multi_reduction <add>, %560, %cst_248 [1] : vector<16x32xf32> to vector<16xf32>
    %566 = vector.shape_cast %565 : vector<16xf32> to vector<16x1xf32>
    %cst_249 = arith.constant 3.200000e+01 : f32
    %567 = vector.broadcast %cst_249 : f32 to vector<16x1xf32>
    %568 = arith.divf %566, %567 : vector<16x1xf32>
    %569 = vector.broadcast %568 : vector<16x1xf32> to vector<16x32xf32>
    %570 = arith.subf %560, %569 : vector<16x32xf32>
    %571 = arith.mulf %570, %570 : vector<16x32xf32>
    %cst_250 = arith.constant dense<0.000000e+00> : vector<16xf32>
    %572 = vector.multi_reduction <add>, %571, %cst_250 [1] : vector<16x32xf32> to vector<16xf32>
    %573 = vector.shape_cast %572 : vector<16xf32> to vector<16x1xf32>
    %cst_251 = arith.constant 3.200000e+01 : f32
    %574 = vector.broadcast %cst_251 : f32 to vector<16x1xf32>
    %575 = arith.divf %573, %574 : vector<16x1xf32>
    %cst_252 = arith.constant 9.99999974E-6 : f32
    %576 = vector.broadcast %cst_252 : f32 to vector<16x1xf32>
    %577 = arith.addf %575, %576 : vector<16x1xf32>
    %578 = math.rsqrt %577 : vector<16x1xf32>
    %579 = vector.broadcast %578 : vector<16x1xf32> to vector<16x32xf32>
    %580 = arith.mulf %570, %579 : vector<16x32xf32>
    %581 = vector.broadcast %562 : vector<1x32xf32> to vector<16x32xf32>
    %582 = arith.mulf %580, %581 : vector<16x32xf32>
    %583 = vector.broadcast %564 : vector<1x32xf32> to vector<16x32xf32>
    %584 = arith.addf %582, %583 : vector<16x32xf32>
    %c0_253 = arith.constant 0 : index
    %c0_254 = arith.constant 0 : index
    %585 = vector.load %arg26[%c0_253, %c0_254] : memref<1x32xf32, #tpu.memory_space<vmem>>, vector<1x32xf32>
    %c0_255 = arith.constant 0 : index
    %c0_256 = arith.constant 0 : index
    %586 = vector.load %arg27[%c0_255, %c0_256] : memref<1x32xf32, #tpu.memory_space<vmem>>, vector<1x32xf32>
    %cst_257 = arith.constant dense<0.000000e+00> : vector<16xf32>
    %587 = vector.multi_reduction <add>, %584, %cst_257 [1] : vector<16x32xf32> to vector<16xf32>
    %588 = vector.shape_cast %587 : vector<16xf32> to vector<16x1xf32>
    %cst_258 = arith.constant 3.200000e+01 : f32
    %589 = vector.broadcast %cst_258 : f32 to vector<16x1xf32>
    %590 = arith.divf %588, %589 : vector<16x1xf32>
    %591 = vector.broadcast %590 : vector<16x1xf32> to vector<16x32xf32>
    %592 = arith.subf %584, %591 : vector<16x32xf32>
    %593 = arith.mulf %592, %592 : vector<16x32xf32>
    %cst_259 = arith.constant dense<0.000000e+00> : vector<16xf32>
    %594 = vector.multi_reduction <add>, %593, %cst_259 [1] : vector<16x32xf32> to vector<16xf32>
    %595 = vector.shape_cast %594 : vector<16xf32> to vector<16x1xf32>
    %cst_260 = arith.constant 3.200000e+01 : f32
    %596 = vector.broadcast %cst_260 : f32 to vector<16x1xf32>
    %597 = arith.divf %595, %596 : vector<16x1xf32>
    %cst_261 = arith.constant 9.99999974E-6 : f32
    %598 = vector.broadcast %cst_261 : f32 to vector<16x1xf32>
    %599 = arith.addf %597, %598 : vector<16x1xf32>
    %600 = math.rsqrt %599 : vector<16x1xf32>
    %601 = vector.broadcast %600 : vector<16x1xf32> to vector<16x32xf32>
    %602 = arith.mulf %592, %601 : vector<16x32xf32>
    %603 = vector.broadcast %585 : vector<1x32xf32> to vector<16x32xf32>
    %604 = arith.mulf %602, %603 : vector<16x32xf32>
    %605 = vector.broadcast %586 : vector<1x32xf32> to vector<16x32xf32>
    %606 = arith.addf %604, %605 : vector<16x32xf32>
    %c0_262 = arith.constant 0 : index
    %c0_263 = arith.constant 0 : index
    %607 = vector.load %arg28[%c0_262, %c0_263] : memref<16x32xf32, #tpu.memory_space<vmem>>, vector<16x32xf32>
    tpu.vector_store %arg28[%c0_262, %c0_263], %606 {strides = array<i32>} : memref<16x32xf32, #tpu.memory_space<vmem>>, vector<16x32xf32>,
    return
  }
}

</mosaic_0001>

<bundles_post_ra>
// kernel: transformer_decoder_forward.1
= control target key start
LH: loop header
LB: loop body
LE: loop exit
PB: predicated region body
PF: predicated region fallthrough
CT: control target
= control target key end

     0   :  { %s10077_s0 = inlined_call_operand.vmem [shape: f32[16,32], index: 0, kind: input, shape index: {}]   ;;  %s10078_s1 = inlined_call_operand.vmem [shape: f32[32,32], index: 1, kind: input, shape index: {}]   ;;  %s10079_s2 = inlined_call_operand.vmem [shape: f32[16,32], index: 2, kind: input, shape index: {}]   ;;  %s10080_s3 = inlined_call_operand.vmem [shape: f32[32,32], index: 3, kind: input, shape index: {}]   ;;  %s10081_s4 = inlined_call_operand.hbm [shape: f32[16,16], index: 4, kind: input, shape index: {}]   ;;  %s10082_s5 = inlined_call_operand.vmem [shape: f32[16,32], index: 5, kind: input, shape index: {}]   ;;  %s10083_s6 = inlined_call_operand.vmem [shape: f32[2,32,128], index: 6, kind: input, shape index: {}]   ;;  %s10084_s7 = inlined_call_operand.hbm [shape: f32[2,1,128], index: 7, kind: input, shape index: {}]   ;;  %s10085_s8 = inlined_call_operand.vmem [shape: f32[2,32,32], index: 8, kind: input, shape index: {}]   ;;  %s10086_s9 = inlined_call_operand.hbm [shape: f32[2,1,32], index: 9, kind: input, shape index: {}]   ;;  %s10087_s10 = inlined_call_operand.hbm [shape: f32[32,128], index: 10, kind: input, shape index: {}]   ;;  %s10088_s11 = inlined_call_operand.vmem [shape: f32[2,32,32], index: 11, kind: input, shape index: {}]   ;;  %s10089_s12 = inlined_call_operand.hbm [shape: f32[2,1,32], index: 12, kind: input, shape index: {}]   ;;  %s10090_s13 = inlined_call_operand.hbm [shape: f32[32,64], index: 13, kind: input, shape index: {}]   ;;  %s10091_s14 = inlined_call_operand.hbm [shape: f32[32,64], index: 14, kind: input, shape index: {}]   ;;  %s10092_s15 = inlined_call_operand.hbm [shape: f32[1,64], index: 15, kind: input, shape index: {}]   ;;  %s10093_s16 = inlined_call_operand.hbm [shape: f32[32,64], index: 16, kind: input, shape index: {}]   ;;  %s10094_s17 = inlined_call_operand.hbm [shape: f32[1,64], index: 17, kind: input, shape index: {}]   ;;  %s10095_s18 = inlined_call_operand.hbm [shape: f32[2,32,32], index: 18, kind: input, shape index: {}]   ;;  %s10096_s19 = inlined_call_operand.hbm [shape: f32[2,1,32], index: 19, kind: input, shape index: {}]   ;;  %s10097_s20 = inlined_call_operand.hbm [shape: f32[2,32,64], index: 20, kind: input, shape index: {}]   ;;  %s10098_s21 = inlined_call_operand.hbm [shape: f32[2,1,64], index: 21, kind: input, shape index: {}]   ;;  %s10099_s22 = inlined_call_operand.vmem [shape: f32[2,64,32], index: 22, kind: input, shape index: {}]   ;;  %s10100_s23 = inlined_call_operand.hbm [shape: f32[2,1,32], index: 23, kind: input, shape index: {}]   ;;  %s10101_s24 = inlined_call_operand.hbm [shape: f32[6,1,32], index: 24, kind: input, shape index: {}]   ;;  %s10102_s25 = inlined_call_operand.hbm [shape: f32[6,1,32], index: 25, kind: input, shape index: {}]   ;;  %s10103_s26 = inlined_call_operand.vmem [shape: f32[1,32], index: 26, kind: input, shape index: {}]   ;;  %s10104_s27 = inlined_call_operand.hbm [shape: f32[1,32], index: 27, kind: input, shape index: {}]   ;;  %s10105_s28 = inlined_call_operand.hbm [shape: f32[16,32], index: 28, kind: output, shape index: {}]  }
   0x1   :  { %10121 = sst [smem:[#allocation43_spill]] %s10077_s0 }
   0x2   :  { %10122 = sst [smem:[#allocation44_spill]] %s10078_s1 }
   0x3   :  { %10123 = sst [smem:[#allocation45_spill]] %s10079_s2 }
   0x4   :  { %10124 = sst [smem:[#allocation46_spill]] %s10080_s3 }
   0x5   :  { %10125 = sst [smem:[#allocation47_spill]] %s10081_s4 }
   0x6   :  { %10126 = sst [smem:[#allocation48_spill]] %s10082_s5 }
   0x7   :  { %10127 = sst [smem:[#allocation49_spill]] %s10083_s6 }
   0x8   :  { %10128 = sst [smem:[#allocation50_spill]] %s10084_s7 }
   0x9   :  { %10129 = sst [smem:[#allocation51_spill]] %s10085_s8 }
   0xa   :  { %10130 = sst [smem:[#allocation52_spill]] %s10086_s9 }
   0xb   :  { %10131 = sst [smem:[#allocation53_spill]] %s10087_s10 }
   0xc   :  { %10132 = sst [smem:[#allocation54_spill]] %s10088_s11 }
   0xd   :  { %10133 = sst [smem:[#allocation55_spill]] %s10089_s12 }
   0xe   :  { %10134 = sst [smem:[#allocation56_spill]] %s10099_s22 }
   0xf   :  { %10135 = sst [smem:[#allocation57_spill]] %s10103_s26 }
  0x10   :  { %10136 = sst [smem:[#allocation58_spill]] %s10105_s28 }
  0x11   :  { %33 = vsyncpa [#allocation3], 0 }
  0x12   :  { %34 = vsyncpa [#allocation6], 0 }
  0x13   :  { %35 = vsyncpa [#allocation9], 0 }
  0x14   :  { %36 = vsyncpa [#allocation12], 0 }
  0x15   :  { %37 = vsyncpa [#allocation15], 0 }
  0x16   :  { %38 = vsyncpa [#allocation18], 0 }
  0x17   :  { %39 = vsyncpa [#allocation21], 0 }
  0x18   :  { %40 = vsyncpa [#allocation24], 0 }
  0x19   :  { %41 = vsyncpa [#allocation27], 0 }
  0x1a   :  { %42 = vsyncpa [#allocation30], 0 }
  0x1b   :  { %43 = vsyncpa [#allocation4], 0  ;;  %s8811_s8 = smov [#allocation5]   ;;  %s10137_s3 = sld [smem:[#allocation50_spill]] }
  0x1c   :  { %s73_s5 = sshll.u32 %s8811_s8, 4  ;;  %s74_s5 = int_to_ptr.vmem [resolvable:$true] %s73_s5 }
  0x21   :  { %s8371_s6 = scalar_lea.hbm %s10137_s3, 32 }
  0x22   :  { %p8372_p0 = scmp.ne.s32.totalorder %s10137_s3, %s8371_s6  ;;  %p8375_p1 = scmp.lt.u32.totalorder %s8371_s6, %s10137_s3 }
  0x24   :  { %p8377_p2 = pnand %p8375_p1, %p8372_p0 }
  0x26   :  { %8380 = shalt.err (!%p8377_p2)
}
  0x27   :  { %s8381_s2 = scalar_lea.vmem %s74_s5, 32  ;;  %p8386_p4 = scmp.lt.s32.totalorder %s74_s5, %s74_s5 }
  0x28   :  { %p8382_p3 = scmp.ne.s32.totalorder %s74_s5, %s8381_s2  ;;  %p8387_p5 = scmp.lt.s32.totalorder %s8381_s2, %s8381_s2 }
  0x2a   :  { %p8388_p6 = por %p8387_p5, %p8386_p4 }
  0x2c   :  { %p8389_p7 = pnand %p8388_p6, %p8382_p3 }
  0x2e   :  { %8392 = shalt.err (!%p8389_p7)
}
  0x2f   :  { %s8812_s7 = smov 16   ;;  %s8813_s12 = smov 1  }
  0x30   :  { %79 = dma.hbm_to_vmem [thread:$0]  %s10137_s3, 32, %s74_s5, [#allocation6], %s8812_s7, %s8812_s7, %s8813_s12  }
  0x31   :  { %s8814_s8 = smov [#allocation8]   ;;  %s8815_s30 = smov [#allocation11]  }
  0x32   :  { %s99_s9 = sshll.u32 %s8814_s8, 4  ;;  %s125_s6 = sshll.u32 %s8815_s30, 4  ;;  %s100_s9 = int_to_ptr.vmem [resolvable:$true] %s99_s9  ;;  %s126_s6 = int_to_ptr.vmem [resolvable:$true] %s125_s6 }
  0x33   :  { %s10138_s11 = sld [smem:[#allocation53_spill]] }
  0x39   :  { %s8393_s29 = scalar_lea.hbm %s10138_s11, 512 }
  0x3a   :  { %p8394_p8 = scmp.ne.s32.totalorder %s10138_s11, %s8393_s29  ;;  %p8397_p9 = scmp.lt.u32.totalorder %s8393_s29, %s10138_s11 }
  0x3c   :  { %p8399_p10 = pnand %p8397_p9, %p8394_p8 }
  0x3e   :  { %8402 = shalt.err (!%p8399_p10)
}
  0x3f   :  { %s8403_s5 = scalar_lea.vmem %s100_s9, 512  ;;  %p8408_p12 = scmp.lt.s32.totalorder %s100_s9, %s100_s9 }
  0x40   :  { %p8404_p11 = scmp.ne.s32.totalorder %s100_s9, %s8403_s5  ;;  %p8409_p13 = scmp.lt.s32.totalorder %s8403_s5, %s8403_s5 }
  0x42   :  { %p8410_p0 = por %p8409_p13, %p8408_p12 }
  0x44   :  { %p8411_p1 = pnand %p8410_p0, %p8404_p11 }
  0x46   :  { %8414 = shalt.err (!%p8411_p1)
}
  0x47   :  { %s8816_s3 = smov 128   ;;  %s8817_s1 = smov 8  }
  0x48   :  { %105 = dma.hbm_to_vmem [thread:$0]  %s10138_s11, 512, %s100_s9, [#allocation9], %s8816_s3, %s8816_s3, %s8817_s1  }
  0x49   :  { %s8415_s8 = scalar_lea.hbm %s10090_s13, 512 }
  0x4a   :  { %p8416_p2 = scmp.ne.s32.totalorder %s10090_s13, %s8415_s8  ;;  %p8419_p3 = scmp.lt.u32.totalorder %s8415_s8, %s10090_s13 }
  0x4c   :  { %p8421_p4 = pnand %p8419_p3, %p8416_p2 }
  0x4e   :  { %8424 = shalt.err (!%p8421_p4)
}
  0x4f   :  { %s8425_s2 = scalar_lea.vmem %s126_s6, 512  ;;  %p8430_p6 = scmp.lt.s32.totalorder %s126_s6, %s126_s6 }
  0x50   :  { %p8426_p5 = scmp.ne.s32.totalorder %s126_s6, %s8425_s2  ;;  %p8431_p7 = scmp.lt.s32.totalorder %s8425_s2, %s8425_s2 }
  0x52   :  { %p8432_p8 = por %p8431_p7, %p8430_p6 }
  0x54   :  { %p8433_p9 = pnand %p8432_p8, %p8426_p5 }
  0x56   :  { %8436 = shalt.err (!%p8433_p9)
}
  0x57   :  { %131 = dma.hbm_to_vmem [thread:$0]  %s10090_s13, 512, %s126_s6, [#allocation12], %s8816_s3, %s8816_s3, %s8817_s1  }
  0x58   :  { %s8818_s5 = smov [#allocation14]   ;;  %s8819_s4 = smov [#allocation17]  }
  0x59   :  { %s150_s28 = sshll.u32 %s8818_s5, 4  ;;  %s172_s22 = sshll.u32 %s8819_s4, 4  ;;  %s151_s28 = int_to_ptr.vmem [resolvable:$true] %s150_s28  ;;  %s173_s22 = int_to_ptr.vmem [resolvable:$true] %s172_s22 }
  0x5a   :  { %s8437_s30 = scalar_lea.hbm %s10092_s15, 16 }
  0x5b   :  { %p8438_p10 = scmp.ne.s32.totalorder %s10092_s15, %s8437_s30  ;;  %p8441_p11 = scmp.lt.u32.totalorder %s8437_s30, %s10092_s15 }
  0x5d   :  { %p8443_p12 = pnand %p8441_p11, %p8438_p10 }
  0x5f   :  { %8446 = shalt.err (!%p8443_p12)
}
  0x60   :  { %s8447_s13 = scalar_lea.vmem %s151_s28, 16  ;;  %s8451_s6 = scalar_lea.vmem %s151_s28, 32 }
  0x61   :  { %p8448_p13 = scmp.ne.s32.totalorder %s151_s28, %s8447_s13  ;;  %p8452_p0 = scmp.lt.s32.totalorder %s151_s28, %s151_s28 }
  0x62   :  { %p8453_p1 = scmp.lt.s32.totalorder %s8451_s6, %s8447_s13 }
  0x64   :  { %p8454_p2 = por %p8453_p1, %p8452_p0 }
  0x66   :  { %p8455_p3 = pnand %p8454_p2, %p8448_p13 }
  0x68   :  { %8458 = shalt.err (!%p8455_p3)
}
  0x69   :  { %153 = dma.hbm_to_vmem [thread:$0]  %s10092_s15, 16, %s151_s28, [#allocation15]  }
  0x6a   :  { %s8459_s26 = scalar_lea.hbm %s10094_s17, 16 }
  0x6b   :  { %p8460_p4 = scmp.ne.s32.totalorder %s10094_s17, %s8459_s26  ;;  %p8463_p5 = scmp.lt.u32.totalorder %s8459_s26, %s10094_s17 }
  0x6d   :  { %p8465_p6 = pnand %p8463_p5, %p8460_p4 }
  0x6f   :  { %8468 = shalt.err (!%p8465_p6)
}
  0x70   :  { %s8469_s29 = scalar_lea.vmem %s173_s22, 16  ;;  %s8473_s2 = scalar_lea.vmem %s173_s22, 32 }
  0x71   :  { %p8470_p7 = scmp.ne.s32.totalorder %s173_s22, %s8469_s29  ;;  %p8474_p8 = scmp.lt.s32.totalorder %s173_s22, %s173_s22 }
  0x72   :  { %p8475_p9 = scmp.lt.s32.totalorder %s8473_s2, %s8469_s29 }
  0x74   :  { %p8476_p10 = por %p8475_p9, %p8474_p8 }
  0x76   :  { %p8477_p11 = pnand %p8476_p10, %p8470_p7 }
  0x78   :  { %8480 = shalt.err (!%p8477_p11)
}
  0x79   :  { %175 = dma.hbm_to_vmem [thread:$0]  %s10094_s17, 16, %s173_s22, [#allocation18]  }
  0x7a   :  { %s8820_s13 = smov [#allocation20]   ;;  %s8821_s9 = smov [#allocation23]  }
  0x7b   :  { %s193_s6 = sshll.u32 %s8820_s13, 4  ;;  %s217_s11 = sshll.u32 %s8821_s9, 4  ;;  %s194_s6 = int_to_ptr.vmem [resolvable:$true] %s193_s6  ;;  %s218_s11 = int_to_ptr.vmem [resolvable:$true] %s217_s11 }
  0x7c   :  { %s8481_s26 = scalar_lea.hbm %s10096_s19, 32 }
  0x7d   :  { %p8482_p12 = scmp.ne.s32.totalorder %s10096_s19, %s8481_s26  ;;  %p8485_p13 = scmp.lt.u32.totalorder %s8481_s26, %s10096_s19 }
  0x7f   :  { %p8487_p0 = pnand %p8485_p13, %p8482_p12 }
  0x81   :  { %8490 = shalt.err (!%p8487_p0)
}
  0x82   :  { %s8491_s17 = scalar_lea.vmem %s194_s6, 32  ;;  %p8496_p2 = scmp.lt.s32.totalorder %s194_s6, %s194_s6 }
  0x83   :  { %p8492_p1 = scmp.ne.s32.totalorder %s194_s6, %s8491_s17  ;;  %p8497_p3 = scmp.lt.s32.totalorder %s8491_s17, %s8491_s17 }
  0x85   :  { %p8498_p4 = por %p8497_p3, %p8496_p2 }
  0x87   :  { %p8499_p5 = pnand %p8498_p4, %p8492_p1 }
  0x89   :  { %8502 = shalt.err (!%p8499_p5)
}
  0x8a   :  { %199 = dma.hbm_to_vmem [thread:$0]  %s10096_s19, 32, %s194_s6, [#allocation21], %s8812_s7, %s8812_s7, %s8813_s12  }
  0x8b   :  { %s8503_s28 = scalar_lea.hbm %s10098_s21, 32 }
  0x8c   :  { %p8504_p6 = scmp.ne.s32.totalorder %s10098_s21, %s8503_s28  ;;  %p8507_p7 = scmp.lt.u32.totalorder %s8503_s28, %s10098_s21 }
  0x8e   :  { %p8509_p8 = pnand %p8507_p7, %p8504_p6 }
  0x90   :  { %8512 = shalt.err (!%p8509_p8)
}
  0x91   :  { %s8513_s26 = scalar_lea.vmem %s218_s11, 32  ;;  %p8518_p10 = scmp.lt.s32.totalorder %s218_s11, %s218_s11 }
  0x92   :  { %p8514_p9 = scmp.ne.s32.totalorder %s218_s11, %s8513_s26  ;;  %p8519_p11 = scmp.lt.s32.totalorder %s8513_s26, %s8513_s26 }
  0x94   :  { %p8520_p12 = por %p8519_p11, %p8518_p10 }
  0x96   :  { %p8521_p13 = pnand %p8520_p12, %p8514_p9 }
  0x98   :  { %8524 = shalt.err (!%p8521_p13)
}
  0x99   :  { %223 = dma.hbm_to_vmem [thread:$0]  %s10098_s21, 32, %s218_s11, [#allocation24], %s8812_s7, %s8812_s7, %s8813_s12  }
  0x9a   :  { %s8822_s8 = smov [#allocation26]   ;;  %s8823_s10 = smov [#allocation2]  }
  0x9b   :  { %s243_s30 = sshll.u32 %s8822_s8, 4  ;;  %s57_s0 = sshll.u32 %s8823_s10, 4  ;;  %s244_s30 = int_to_ptr.vmem [resolvable:$true] %s243_s30  ;;  %s58_s0 = int_to_ptr.vmem [resolvable:$true] %s57_s0 }
  0x9c   :  { %s8525_s29 = scalar_lea.hbm %s10101_s24, 96 }
  0x9d   :  { %p8526_p0 = scmp.ne.s32.totalorder %s10101_s24, %s8525_s29  ;;  %p8529_p1 = scmp.lt.u32.totalorder %s8525_s29, %s10101_s24 }
  0x9f   :  { %p8531_p2 = pnand %p8529_p1, %p8526_p0 }
  0xa1   :  { %8534 = shalt.err (!%p8531_p2)
}
  0xa2   :  { %s8535_s21 = scalar_lea.vmem %s244_s30, 96  ;;  %p8540_p4 = scmp.lt.s32.totalorder %s244_s30, %s244_s30 }
  0xa3   :  { %p8536_p3 = scmp.ne.s32.totalorder %s244_s30, %s8535_s21  ;;  %p8541_p5 = scmp.lt.s32.totalorder %s8535_s21, %s8535_s21 }
  0xa5   :  { %p8542_p6 = por %p8541_p5, %p8540_p4 }
  0xa7   :  { %p8543_p7 = pnand %p8542_p6, %p8536_p3 }
  0xa9   :  { %8546 = shalt.err (!%p8543_p7)
}
  0xaa   :  { %249 = dma.hbm_to_vmem [thread:$0]  %s10101_s24, 96, %s244_s30, [#allocation27], %s8812_s7, %s8812_s7, %s8813_s12  }
  0xab   :  { %s10139_s26 = sld [smem:[#allocation47_spill]] }
  0xb1   :  { %s8547_s19 = scalar_lea.hbm %s10139_s26, 256 }
  0xb2   :  { %p8548_p8 = scmp.ne.s32.totalorder %s10139_s26, %s8547_s19  ;;  %p8551_p9 = scmp.lt.u32.totalorder %s8547_s19, %s10139_s26 }
  0xb4   :  { %p8553_p10 = pnand %p8551_p9, %p8548_p8 }
  0xb6   :  { %8556 = shalt.err (!%p8553_p10)
}
  0xb7   :  { %s8557_s22 = scalar_lea.vmem %s58_s0, 256  ;;  %p8562_p12 = scmp.lt.s32.totalorder %s58_s0, %s58_s0 }
  0xb8   :  { %p8558_p11 = scmp.ne.s32.totalorder %s58_s0, %s8557_s22  ;;  %p8563_p13 = scmp.lt.s32.totalorder %s8557_s22, %s8557_s22 }
  0xba   :  { %p8564_p0 = por %p8563_p13, %p8562_p12 }
  0xbc   :  { %p8565_p1 = pnand %p8564_p0, %p8558_p11 }
  0xbe   :  { %8568 = shalt.err (!%p8565_p1)
}
  0xbf   :  { %63 = dma.hbm_to_vmem [thread:$0]  %s10139_s26, 256, %s58_s0, [#allocation3], %s8816_s3, %s8816_s3, %s8817_s1  }
  0xc0   :  { %s8824_s29 = smov [#allocation7]   ;;  %s8825_s15 = smov [#allocation10]  }
  0xc1   :  { %s87_s2 = sshll.u32 %s8824_s29, 4  ;;  %s113_s28 = sshll.u32 %s8825_s15, 4  ;;  %s88_s2 = int_to_ptr.vmem [resolvable:$true] %s87_s2  ;;  %s114_s28 = int_to_ptr.vmem [resolvable:$true] %s113_s28 }
  0xc2   :  { %s10140_s11 = sld [smem:[#allocation52_spill]] }
  0xc8   :  { %s8569_s9 = scalar_lea.hbm %s10140_s11, 32 }
  0xc9   :  { %p8570_p2 = scmp.ne.s32.totalorder %s10140_s11, %s8569_s9  ;;  %p8573_p3 = scmp.lt.u32.totalorder %s8569_s9, %s10140_s11 }
  0xcb   :  { %p8575_p4 = pnand %p8573_p3, %p8570_p2 }
  0xcd   :  { %8578 = shalt.err (!%p8575_p4)
}
  0xce   :  { %s8579_s0 = scalar_lea.vmem %s88_s2, 32  ;;  %p8584_p6 = scmp.lt.s32.totalorder %s88_s2, %s88_s2 }
  0xcf   :  { %p8580_p5 = scmp.ne.s32.totalorder %s88_s2, %s8579_s0  ;;  %p8585_p7 = scmp.lt.s32.totalorder %s8579_s0, %s8579_s0 }
  0xd1   :  { %p8586_p8 = por %p8585_p7, %p8584_p6 }
  0xd3   :  { %p8587_p9 = pnand %p8586_p8, %p8580_p5 }
  0xd5   :  { %8590 = shalt.err (!%p8587_p9)
}
  0xd6   :  { %93 = dma.hbm_to_vmem [thread:$0]  %s10140_s11, 32, %s88_s2, [#allocation6], %s8812_s7, %s8812_s7, %s8813_s12  }
  0xd7   :  { %s10141_s22 = sld [smem:[#allocation55_spill]] }
  0xdd   :  { %s8591_s24 = scalar_lea.hbm %s10141_s22, 32 }
  0xde   :  { %p8592_p10 = scmp.ne.s32.totalorder %s10141_s22, %s8591_s24  ;;  %p8595_p11 = scmp.lt.u32.totalorder %s8591_s24, %s10141_s22 }
  0xe0   :  { %p8597_p12 = pnand %p8595_p11, %p8592_p10 }
  0xe2   :  { %8600 = shalt.err (!%p8597_p12)
}
  0xe3   :  { %s8601_s21 = scalar_lea.vmem %s114_s28, 32  ;;  %p8606_p0 = scmp.lt.s32.totalorder %s114_s28, %s114_s28 }
  0xe4   :  { %p8602_p13 = scmp.ne.s32.totalorder %s114_s28, %s8601_s21  ;;  %p8607_p1 = scmp.lt.s32.totalorder %s8601_s21, %s8601_s21 }
  0xe6   :  { %p8608_p2 = por %p8607_p1, %p8606_p0 }
  0xe8   :  { %p8609_p3 = pnand %p8608_p2, %p8602_p13 }
  0xea   :  { %8612 = shalt.err (!%p8609_p3)
}
  0xeb   :  { %119 = dma.hbm_to_vmem [thread:$0]  %s10141_s22, 32, %s114_s28, [#allocation9], %s8812_s7, %s8812_s7, %s8813_s12  }
  0xec   :  { %s8826_s9 = smov [#allocation13]   ;;  %s8827_s4 = smov [#allocation16]  }
  0xed   :  { %s137_s5 = sshll.u32 %s8826_s9, 4  ;;  %s159_s19 = sshll.u32 %s8827_s4, 4  ;;  %s138_s5 = int_to_ptr.vmem [resolvable:$true] %s137_s5  ;;  %s160_s19 = int_to_ptr.vmem [resolvable:$true] %s159_s19 }
  0xee   :  { %s8613_s26 = scalar_lea.hbm %s10091_s14, 512 }
  0xef   :  { %p8614_p4 = scmp.ne.s32.totalorder %s10091_s14, %s8613_s26  ;;  %p8617_p5 = scmp.lt.u32.totalorder %s8613_s26, %s10091_s14 }
  0xf1   :  { %p8619_p6 = pnand %p8617_p5, %p8614_p4 }
  0xf3   :  { %8622 = shalt.err (!%p8619_p6)
}
  0xf4   :  { %s8623_s28 = scalar_lea.vmem %s138_s5, 512  ;;  %p8628_p8 = scmp.lt.s32.totalorder %s138_s5, %s138_s5 }
  0xf5   :  { %p8624_p7 = scmp.ne.s32.totalorder %s138_s5, %s8623_s28  ;;  %p8629_p9 = scmp.lt.s32.totalorder %s8623_s28, %s8623_s28 }
  0xf7   :  { %p8630_p10 = por %p8629_p9, %p8628_p8 }
  0xf9   :  { %p8631_p11 = pnand %p8630_p10, %p8624_p7 }
  0xfb   :  { %8634 = shalt.err (!%p8631_p11)
}
  0xfc   :  { %143 = dma.hbm_to_vmem [thread:$0]  %s10091_s14, 512, %s138_s5, [#allocation12], %s8816_s3, %s8816_s3, %s8817_s1  }
  0xfd   :  { %s8635_s13 = scalar_lea.hbm %s10093_s16, 512 }
  0xfe   :  { %p8636_p12 = scmp.ne.s32.totalorder %s10093_s16, %s8635_s13  ;;  %p8639_p13 = scmp.lt.u32.totalorder %s8635_s13, %s10093_s16 }
 0x100   :  { %p8641_p0 = pnand %p8639_p13, %p8636_p12 }
 0x102   :  { %8644 = shalt.err (!%p8641_p0)
}
 0x103   :  { %s8645_s4 = scalar_lea.vmem %s160_s19, 512  ;;  %p8650_p2 = scmp.lt.s32.totalorder %s160_s19, %s160_s19 }
 0x104   :  { %p8646_p1 = scmp.ne.s32.totalorder %s160_s19, %s8645_s4  ;;  %p8651_p3 = scmp.lt.s32.totalorder %s8645_s4, %s8645_s4 }
 0x106   :  { %p8652_p4 = por %p8651_p3, %p8650_p2 }
 0x108   :  { %p8653_p5 = pnand %p8652_p4, %p8646_p1 }
 0x10a   :  { %8656 = shalt.err (!%p8653_p5)
}
 0x10b   :  { %165 = dma.hbm_to_vmem [thread:$0]  %s10093_s16, 512, %s160_s19, [#allocation15], %s8816_s3, %s8816_s3, %s8817_s1  }
 0x10c   :  { %s8828_s6 = smov [#allocation19]   ;;  %s8829_s26 = smov [#allocation22]  }
 0x10d   :  { %s181_s0 = sshll.u32 %s8828_s6, 4  ;;  %s205_s8 = sshll.u32 %s8829_s26, 4  ;;  %s182_s0 = int_to_ptr.vmem [resolvable:$true] %s181_s0  ;;  %s206_s8 = int_to_ptr.vmem [resolvable:$true] %s205_s8 }
 0x10e   :  { %s8657_s24 = scalar_lea.hbm %s10095_s18, 1024 }
 0x10f   :  { %p8658_p6 = scmp.ne.s32.totalorder %s10095_s18, %s8657_s24  ;;  %p8661_p7 = scmp.lt.u32.totalorder %s8657_s24, %s10095_s18 }
 0x111   :  { %p8663_p8 = pnand %p8661_p7, %p8658_p6 }
 0x113   :  { %8666 = shalt.err (!%p8663_p8)
}
 0x114   :  { %s8667_s16 = scalar_lea.vmem %s182_s0, 1024  ;;  %p8672_p10 = scmp.lt.s32.totalorder %s182_s0, %s182_s0 }
 0x115   :  { %p8668_p9 = scmp.ne.s32.totalorder %s182_s0, %s8667_s16  ;;  %p8673_p11 = scmp.lt.s32.totalorder %s8667_s16, %s8667_s16 }
 0x117   :  { %p8674_p12 = por %p8673_p11, %p8672_p10 }
 0x119   :  { %p8675_p13 = pnand %p8674_p12, %p8668_p9 }
 0x11b   :  { %8678 = shalt.err (!%p8675_p13)
}
 0x11c   :  { %187 = dma.hbm_to_vmem [thread:$0]  %s10095_s18, 1024, %s182_s0, [#allocation18], %s8816_s3, %s8816_s3, %s8817_s1  }
 0x11d   :  { %s8679_s2 = scalar_lea.hbm %s10097_s20, 1024 }
 0x11e   :  { %p8680_p0 = scmp.ne.s32.totalorder %s10097_s20, %s8679_s2  ;;  %p8683_p1 = scmp.lt.u32.totalorder %s8679_s2, %s10097_s20 }
 0x120   :  { %p8685_p2 = pnand %p8683_p1, %p8680_p0 }
 0x122   :  { %8688 = shalt.err (!%p8685_p2)
}
 0x123   :  { %s8689_s5 = scalar_lea.vmem %s206_s8, 1024  ;;  %p8694_p4 = scmp.lt.s32.totalorder %s206_s8, %s206_s8 }
 0x124   :  { %p8690_p3 = scmp.ne.s32.totalorder %s206_s8, %s8689_s5  ;;  %p8695_p5 = scmp.lt.s32.totalorder %s8689_s5, %s8689_s5 }
 0x126   :  { %p8696_p6 = por %p8695_p5, %p8694_p4 }
 0x128   :  { %p8697_p7 = pnand %p8696_p6, %p8690_p3 }
 0x12a   :  { %8700 = shalt.err (!%p8697_p7)
}
 0x12b   :  { %211 = dma.hbm_to_vmem [thread:$0]  %s10097_s20, 1024, %s206_s8, [#allocation21], %s8816_s3, %s8816_s3, %s8817_s1  }
 0x12c   :  { %s8830_s0 = smov [#allocation25]   ;;  %s8831_s10 = smov [#allocation28]  }
 0x12d   :  { %s231_s26 = sshll.u32 %s8830_s0, 4  ;;  %s255_s17 = sshll.u32 %s8831_s10, 4  ;;  %s232_s26 = int_to_ptr.vmem [resolvable:$true] %s231_s26  ;;  %s256_s17 = int_to_ptr.vmem [resolvable:$true] %s255_s17 }
 0x12e   :  { %s8701_s22 = scalar_lea.hbm %s10100_s23, 32 }
 0x12f   :  { %p8702_p8 = scmp.ne.s32.totalorder %s10100_s23, %s8701_s22  ;;  %p8705_p9 = scmp.lt.u32.totalorder %s8701_s22, %s10100_s23 }
 0x131   :  { %p8707_p10 = pnand %p8705_p9, %p8702_p8 }
 0x133   :  { %8710 = shalt.err (!%p8707_p10)
}
 0x134   :  { %s8711_s20 = scalar_lea.vmem %s232_s26, 32  ;;  %p8716_p12 = scmp.lt.s32.totalorder %s232_s26, %s232_s26 }
 0x135   :  { %p8712_p11 = scmp.ne.s32.totalorder %s232_s26, %s8711_s20  ;;  %p8717_p13 = scmp.lt.s32.totalorder %s8711_s20, %s8711_s20 }
 0x137   :  { %p8718_p0 = por %p8717_p13, %p8716_p12 }
 0x139   :  { %p8719_p1 = pnand %p8718_p0, %p8712_p11 }
 0x13b   :  { %8722 = shalt.err (!%p8719_p1)
}
 0x13c   :  { %237 = dma.hbm_to_vmem [thread:$0]  %s10100_s23, 32, %s232_s26, [#allocation24], %s8812_s7, %s8812_s7, %s8813_s12  }
 0x13d   :  { %s8723_s2 = scalar_lea.hbm %s10102_s25, 96 }
 0x13e   :  { %p8724_p2 = scmp.ne.s32.totalorder %s10102_s25, %s8723_s2  ;;  %p8727_p3 = scmp.lt.u32.totalorder %s8723_s2, %s10102_s25 }
 0x140   :  { %p8729_p4 = pnand %p8727_p3, %p8724_p2 }
 0x142   :  { %8732 = shalt.err (!%p8729_p4)
}
 0x143   :  { %s8733_s5 = scalar_lea.vmem %s256_s17, 96  ;;  %p8738_p6 = scmp.lt.s32.totalorder %s256_s17, %s256_s17 }
 0x144   :  { %p8734_p5 = scmp.ne.s32.totalorder %s256_s17, %s8733_s5  ;;  %p8739_p7 = scmp.lt.s32.totalorder %s8733_s5, %s8733_s5 }
 0x146   :  { %p8740_p8 = por %p8739_p7, %p8738_p6 }
 0x148   :  { %p8741_p9 = pnand %p8740_p8, %p8734_p5 }
 0x14a   :  { %8744 = shalt.err (!%p8741_p9)
}
 0x14b   :  { %261 = dma.hbm_to_vmem [thread:$0]  %s10102_s25, 96, %s256_s17, [#allocation27], %s8812_s7, %s8812_s7, %s8813_s12  }
 0x14c   :  { %s8832_s6 = smov [#allocation29]   ;;  %s8745_s24 = scalar_lea.hbm %s10104_s27, 16 }
 0x14d   :  { %s270_s0 = sshll.u32 %s8832_s6, 4  ;;  %p8746_p10 = scmp.ne.s32.totalorder %s10104_s27, %s8745_s24  ;;  %s271_s0 = int_to_ptr.vmem [resolvable:$true] %s270_s0 }
 0x14e   :  { %p8749_p11 = scmp.lt.u32.totalorder %s8745_s24, %s10104_s27 }
 0x150   :  { %p8751_p12 = pnand %p8749_p11, %p8746_p10 }
 0x152   :  { %8754 = shalt.err (!%p8751_p12)
}
 0x153   :  { %s8755_s16 = scalar_lea.vmem %s271_s0, 16  ;;  %s8759_s25 = scalar_lea.vmem %s271_s0, 32 }
 0x154   :  { %p8756_p13 = scmp.ne.s32.totalorder %s271_s0, %s8755_s16  ;;  %p8760_p0 = scmp.lt.s32.totalorder %s271_s0, %s271_s0 }
 0x155   :  { %p8761_p1 = scmp.lt.s32.totalorder %s8759_s25, %s8755_s16 }
 0x157   :  { %p8762_p2 = por %p8761_p1, %p8760_p0 }
 0x159   :  { %p8763_p3 = pnand %p8762_p2, %p8756_p13 }
 0x15b   :  { %8766 = shalt.err (!%p8763_p3)
}
 0x15c   :  { %273 = dma.hbm_to_vmem [thread:$0]  %s10104_s27, 16, %s271_s0, [#allocation30]  }
 0x15d   :  { %8789 = dma.done.wait [#allocation3], 256  }
 0x15e   :  { %8790 = vsyncadd [#allocation3], 4294967040 }
 0x15f   :  { %8791 = dma.done.wait [#allocation6], 64  }
 0x160   :  { %8792 = vsyncadd [#allocation6], 4294967232 }
 0x161   :  { %8793 = dma.done.wait [#allocation9], 544  }
 0x162   :  { %8794 = vsyncadd [#allocation9], 4294966752 }
 0x163   :  { %8795 = dma.done.wait [#allocation12], 1024  }
 0x164   :  { %8796 = vsyncadd [#allocation12], 4294966272 }
 0x165   :  { %8797 = dma.done.wait [#allocation15], 528  }
 0x166   :  { %8798 = vsyncadd [#allocation15], 4294966768 }
 0x167   :  { %8799 = dma.done.wait [#allocation18], 1040  }
 0x168   :  { %8800 = vsyncadd [#allocation18], 4294966256 }
 0x169   :  { %8801 = dma.done.wait [#allocation21], 1056  }
 0x16a   :  { %8802 = vsyncadd [#allocation21], 4294966240 }
 0x16b   :  { %8803 = dma.done.wait [#allocation24], 64  }
 0x16c   :  { %8804 = vsyncadd [#allocation24], 4294967232 }
 0x16d   :  { %8805 = dma.done.wait [#allocation27], 192  }
 0x16e   :  { %8806 = vsyncadd [#allocation27], 4294967104 }
 0x16f   :  { %8807 = dma.done.wait [#allocation30], 16  }
 0x170   :  { %8808 = vsyncadd [#allocation30], 4294967280  ;;  %vm352_vm0 = vcmask 261120   ;;  %v348_v0 = vld [vmem:[#allocation8] sm:$0xff]  ;;  %v349_v1 = vld [vmem:[#allocation8 + $0x8] sm:$0xff]  ;;  %s10142_s19 = sld [smem:[#allocation45_spill]] }
 0x171   :  { %v350_v2 = vld [vmem:[#allocation8 + $0x10] sm:$0xff]  ;;  %v7581_v3 = vpack.c.bf16 %v349_v1, %v348_v0  ;;  %v351_v4 = vld [vmem:[#allocation8 + $0x18] sm:$0xff]  ;;  %v513_v7 = vld [vmem:[#allocation13] sm:$0xff]  ;;  %s10143_s15 = sld [smem:[#allocation44_spill]]  ;;  %s10144_s2 = sld [smem:[#allocation46_spill]]  ;;  %vm836_vm1 = vcmask 64512  }
 0x172   :  { %v7585_v6 = vpack.c.bf16 %v351_v4, %v350_v2  ;;  %v514_v8 = vld [vmem:[#allocation13 + $0x8] sm:$0xff]  ;;  %v515_v12 = vld [vmem:[#allocation13 + $0x10] sm:$0xff]  ;;  %v516_v13 = vld [vmem:[#allocation13 + $0x18] sm:$0xff]  ;;  %s10145_s5 = sld [smem:[#allocation49_spill]]  ;;  %s10146_s13 = sld [smem:[#allocation43_spill]]  ;;  %vm922_vm3 = vcmask 130048  }
 0x173   :  { %7582 = vmatprep.subr.bf16.mxu0 %v7581_v3  ;;  %v7597_v9 = vpack.c.bf16 %v514_v8, %v513_v7  ;;  %v7601_v16 = vpack.c.bf16 %v516_v13, %v515_v12  ;;  %v434_v34 = vld [vmem:[#allocation11] sm:$0xff]  ;;  %v435_v35 = vld [vmem:[#allocation11 + $0x8] sm:$0xff]  ;;  %v436_v37 = vld [vmem:[#allocation11 + $0x10] sm:$0xff]  ;;  %s8834_s11 = smov 120   ;;  %s8835_s9 = smov 88   ;;  %vm3453_vm4 = vcmask 523264  }
 0x174   :  { %7584 = vmatpush3.bf16.msra.mxu0 %v7581_v3  ;;  %v7589_v36 = vpack.c.bf16 %v435_v35, %v434_v34  ;;  %v437_v38 = vld [vmem:[#allocation11 + $0x18] sm:$0xff]  ;;  %v621_v40 = vld [vmem:[#allocation16] sm:$0xff]  ;;  %v622_v41 = vld [vmem:[#allocation16 + $0x8] sm:$0xff]  ;;  %s8836_s4 = smov 80   ;;  %s8837_s14 = smov 112  }
 0x175   :  { %7586 = vmatprep.subr.bf16.mxu0 %v7585_v6  ;;  %v7593_v39 = vpack.c.bf16 %v437_v38, %v436_v37  ;;  %v7605_v42 = vpack.c.bf16 %v622_v41, %v621_v40  ;;  %v623_v43 = vld [vmem:[#allocation16 + $0x10] sm:$0xff]  ;;  %v624_v44 = vld [vmem:[#allocation16 + $0x18] sm:$0xff]  ;;  %v6556_v12 = vld [vmem:[#allocation17] ss:$0 sm:$0xff]  ;;  %s8838_s23 = smov 56   ;;  %s8839_s18 = smov 72  }
 0x176   :  { %v334_v5 = vld [vmem:[%s10142_s19] sm:$0xff]  ;;  %v335_v14 = vld [vmem:[%s10142_s19 + $0x8] sm:$0xff]  ;;  %7590 = vmatprep.subr.bf16.mxu1 %v7589_v36  ;;  %v7609_v45 = vpack.c.bf16 %v624_v44, %v623_v43  ;;  %v6551_v48 = vld [vmem:[#allocation14] ss:$0 sm:$0xff]  ;;  %s8840_s6 = smov 64   ;;  %s8841_s0 = smov 104  }
 0x177   :  { %7067 = vmatprep.mubr.msk.f32.mxu0 %vm352_vm0, %v334_v5  ;;  %7078 = vmatprep.mubr.msk.f32.mxu1 %vm352_vm0, %v334_v5  ;;  %v330_v10 = vld [vmem:[%s10143_s15] sm:$0xff]  ;;  %v331_v19 = vld [vmem:[%s10143_s15 + $0x8] sm:$0xff]  ;;  %v332_v22 = vld [vmem:[%s10143_s15 + $0x10] sm:$0xff]  ;;  %s8842_s26 = smov 48   ;;  %s8843_s10 = smov 40  }
 0x178   :  { %v336_v11 = vld [vmem:[%s10144_s2] sm:$0xff]  ;;  %7588 = vmatpush3.bf16.msra.mxu0 %v7585_v6  ;;  %v730_v18 = vld [vmem:[%s10145_s5 + $0x8] sm:$0xff]  ;;  %v338_v23 = vld [vmem:[%s10144_s2 + $0x10] sm:$0xff]  ;;  %7592 = vmatpush3.bf16.msra.mxu1 %v7589_v36  ;;  %s10149_s22 = sld [smem:[#allocation54_spill]]  ;;  %s10150_s19 = sld [smem:[#allocation51_spill]] }
 0x179   :  { %v340_v15 = vadd.f32 %v336_v11, %v330_v10  ;;  %7598 = vmatprep.subr.bf16.mxu0 %v7597_v9  ;;  %v729_v17 = vld [vmem:[%s10145_s5] sm:$0xff]  ;;  %v337_v20 = vld [vmem:[%s10144_s2 + $0x8] sm:$0xff]  ;;  %v731_v24 = vld [vmem:[%s10145_s5 + $0x10] sm:$0xff]  ;;  %v342_v27 = vadd.f32 %v338_v23, %v332_v22  ;;  %7594 = vmatprep.subr.bf16.mxu1 %v7593_v39  ;;  %s10151_s29 = sld [smem:[#allocation48_spill]]  ;;  %s8844_s17 = smov [#allocation31]  }
 0x17a   :  { %v7613_v21 = vpack.c.bf16 %v730_v18, %v729_v17  ;;  %v732_v25 = vld [vmem:[%s10145_s5 + $0x18] sm:$0xff]  ;;  %v341_v26 = vadd.f32 %v337_v20, %v331_v19  ;;  %v9302_v32 = vld [vmem:[%s10146_s13] sm:$0xff]  ;;  %v9310_v33 = vld [vmem:[%s10146_s13 + $0x8] sm:$0xff]  ;;  %s10152_s27 = sld [smem:[#allocation56_spill]]  ;;  %s6526_s20 = sshll.u32 %s8844_s17, 4  ;;  %s6527_s20 = int_to_ptr.vmem [resolvable:$true] %s6526_s20 }
 0x17b   :  { %7068 = vmatmul.mubr.msk.f32.vlgmr.msra.gmra.mrb[0].mxu0 %vm352_vm0, %v335_v14  ;;  %v333_v28 = vld [vmem:[%s10143_s15 + $0x18] sm:$0xff]  ;;  %v7617_v30 = vpack.c.bf16 %v732_v25, %v731_v24  ;;  %v6561_v59 = vld [vmem:[#allocation5] ss:$0 sm:$0xff]  ;;  %vm9363_vm2 = vmpackc.low %vm836_vm1, %vm836_vm1  ;;  %s8767_s8 = scalar_lea.vmem %s6527_s20, 256  ;;  %p8772_p5 = scmp.lt.s32.totalorder %s6527_s20, %s6527_s20 }
 0x17c   :  { %7600 = vmatpush3.bf16.msra.mxu0 %v7597_v9  ;;  %7089 = vmatprep.mubr.msk.f32.mxu0 %vm352_vm0, %v340_v15  ;;  %v339_v29 = vld [vmem:[%s10144_s2 + $0x18] sm:$0xff]  ;;  %s8833_s2 = smov 96   ;;  %v9395_v43 = vld [vmem:[#allocation2] sm:$0xff]  ;;  %p8768_p4 = scmp.ne.s32.totalorder %s6527_s20, %s8767_s8 }
 0x17d   :  { %7602 = vmatprep.subr.bf16.mxu0 %v7601_v16  ;;  %v343_v31 = vadd.f32 %v339_v29, %v333_v28  ;;  %7596 = vmatpush3.bf16.msra.mxu1 %v7593_v39  ;;  %v4988_v20 = vld [vmem:[#allocation19 + $0x28] sm:$0xff]  ;;  %p8773_p6 = scmp.lt.s32.totalorder %s8767_s8, %s8767_s8 }
 0x17e   :  { %7606 = vmatprep.subr.bf16.mxu1 %v7605_v42 }
 0x17f   :  { %p8774_p7 = por %p8773_p6, %p8772_p5 }
 0x180   :  { %7604 = vmatpush3.bf16.msra.mxu0 %v7601_v16  ;;  %7079 = vmatmul.mubr.msk.f32.vlgmr.msra.gmra.mrb[0].mxu1 %vm352_vm0, %v335_v14 }
 0x181   :  { %7614 = vmatprep.subr.bf16.mxu0 %v7613_v21  ;;  %7608 = vmatpush3.bf16.msra.mxu1 %v7605_v42  ;;  %v9393_v42 = vld [vmem:[#allocation2 + $0x8] sm:$0xff]  ;;  %p8775_p8 = pnand %p8774_p7, %p8768_p4 }
 0x182   :  { %7103 = vmatprep.mubr.msk.f32.mxu1 %vm352_vm0, %v330_v10  ;;  %7610 = vmatprep.subr.bf16.mxu1 %v7609_v45 }
 0x183   :  { %7090 = vmatmul.mubr.msk.f32.vlgmr.msra.gmra.mrb[2].mxu0 %vm352_vm0, %v341_v26 }
 0x184   :  { %7616 = vmatpush3.bf16.msra.mxu0 %v7613_v21  ;;  %7092 = vmatprep.mubr.msk.f32.mxu0 %vm352_vm0, %v342_v27 }
 0x185   :  { %7618 = vmatprep.subr.bf16.mxu0 %v7617_v30  ;;  %7612 = vmatpush3.bf16.msra.mxu1 %v7609_v45 }
 0x187   :  { %7093 = vmatmul.mubr.msk.f32.gmra.mrb[4].mxu0 %vm352_vm0, %v343_v31 }
 0x188   :  { %7620 = vmatpush3.bf16.msra.mxu0 %v7617_v30  ;;  %7117 = vmatprep.mubr.msk.f32.mxu0 %vm352_vm0, %v9302_v32 }
 0x189   :  { %7104 = vmatmul.mubr.msk.f32.vlgmr.msra.gmra.mrb[2].mxu1 %vm352_vm0, %v331_v19 }
 0x18a   :  { %7106 = vmatprep.mubr.msk.f32.mxu1 %vm352_vm0, %v332_v22 }
 0x18b   :  { %7118 = vmatmul.mubr.msk.f32.vlgmr.msra.gmra.mrb[6].mxu0 %vm352_vm0, %v9310_v33 }
 0x18d   :  { %7107 = vmatmul.mubr.msk.f32.gmra.mrb[4].mxu1 %vm352_vm0, %v333_v28 }
 0x24e   :  { %v9319_v46 = vpop.f32.mrb[0].mxu0 }
 0x24f   :  { %v9321_v47 = vpop.f32.mrb[1].mxu0 }
 0x253   :  { %v9357_v8 = vpop.f32.mrb[0].mxu1 }
 0x254   :  { %v9359_v9 = vpop.f32.mrb[1].mxu1 }
 0x256   :  { %v7091_v49 = vpop.f32.mrb[2].mxu0 }
 0x257   :  { %v608_v50 = vadd.f32 %v7091_v49, %v6551_v48  ;;  %v602_v51 = vpop.f32.mrb[3].mxu0 }
 0x258   :  { %v603_v52 = vadd.f32 %v6551_v48, %v602_v51 }
 0x25a   :  { %v7094_v53 = vpop.f32.mrb[4].mxu0  ;;  %v9323_v54 = vpack.c.bf16 %v608_v50, %v603_v52  ;;  %v9325_v55 = vpack.i.bf16 %v608_v50, %v603_v52 }
 0x25b   :  { %v618_v56 = vadd.f32 %v7094_v53, %v6551_v48  ;;  %v612_v57 = vpop.f32.mrb[5].mxu0 }
 0x25c   :  { %v613_v58 = vadd.f32 %v6551_v48, %v612_v57  ;;  %v7105_v10 = vpop.f32.mrb[2].mxu1 }
 0x25d   :  { %v710_v11 = vpop.f32.mrb[3].mxu1  ;;  %v716_v36 = vadd.f32 %v7105_v10, %v6556_v12 }
 0x25e   :  { %v7119_v60 = vpop.f32.mrb[6].mxu0  ;;  %v9327_v61 = vpack.c.bf16 %v618_v56, %v613_v58  ;;  %v9329_v62 = vpack.i.bf16 %v618_v56, %v613_v58  ;;  %v711_v37 = vadd.f32 %v6556_v12, %v710_v11 }
 0x25f   :  { %v818_v63 = vadd.f32 %v7119_v60, %v6561_v59  ;;  %v812_v0 = vpop.f32.mrb[7].mxu0 }
 0x260   :  { %v813_v1 = vadd.f32 %v6561_v59, %v812_v0  ;;  %v7108_v13 = vpop.f32.mrb[4].mxu1  ;;  %v9385_v38 = vpack.c.bf16 %v716_v36, %v711_v37  ;;  %v9387_v39 = vpack.i.bf16 %v716_v36, %v711_v37 }
 0x261   :  { %v822_v2 = vadd.f32 %v9319_v46, %v818_v63  ;;  %v726_v14 = vadd.f32 %v7108_v13, %v6556_v12  ;;  %v720_v15 = vpop.f32.mrb[5].mxu1 }
 0x262   :  { %v821_v3 = vadd.f32 %v813_v1, %v9321_v47  ;;  %v9333_v4 = vpack.i.bf16 %v818_v63, %v813_v1  ;;  %v721_v16 = vadd.f32 %v6556_v12, %v720_v15 }
 0x263   :  { %v9345_v7 = vmul.f32 0.35355338, %v822_v2 }
 0x264   :  { %v9335_v5 = vpack.i.bf16 %v822_v2, %v821_v3  ;;  %v9337_v6 = vmul.f32 0.35355338, %v821_v3  ;;  %v9389_v40 = vpack.c.bf16 %v726_v14, %v721_v16  ;;  %v9391_v41 = vpack.i.bf16 %v726_v14, %v721_v16 }
 0x266   :  { %7992 = vrot.lane.b32.xlu0 %v9335_v5, %s8833_s2  ;;  %1034 = vrot.lane.b32.xlu1 %v9337_v6, %s8834_s11 }
 0x267   :  { %7124 = vmatprep.mubr.msk.f32.mxu1 %vm836_vm1, %v9337_v6 }
 0x26a   :  { %7997 = vrot.lane.b32.xlu0 %v9335_v5, %s8835_s9  ;;  %1036 = vrot.lane.b32.xlu1 %v9345_v7, %s8834_s11 }
 0x26e   :  { %8002 = vrot.lane.b32.xlu0 %v9335_v5, %s8836_s4  ;;  %1396 = vrot.lane.b32.xlu1 %v9337_v6, %s8837_s14 }
 0x272   :  { %1398 = vrot.lane.b32.xlu0 %v9345_v7, %s8837_s14 }
 0x2d8   :  { %v7993_v17 = vpop.permute.xlu0 %7992  ;;  %v1035_v27 = vpop.permute.xlu1 %1034 }
 0x2d9   :  { %v7995_v18 = vunpack.i.h.bf16 %v7993_v17  ;;  %v7994_v19 = vunpack.i.l.bf16 %v7993_v17 }
 0x2db   :  { %v7621_v21 = vpack.c.bf16 %v7995_v18, %v7994_v19 }
 0x2dc   :  { %v7998_v22 = vpop.permute.xlu0 %7997  ;;  %v1037_v31 = vpop.permute.xlu1 %1036 }
 0x2dd   :  { %v8000_v23 = vunpack.i.h.bf16 %v7998_v22  ;;  %v7999_v24 = vunpack.i.l.bf16 %v7998_v22  ;;  %7623 = vmatprep.subr.msk.bf16.mxu1 %vm9363_vm2, %v7621_v21 }
 0x2de   :  { %7626 = vmatpush3.bf16.xpose.msk.msra.mxu1 %vm9363_vm2, %v7621_v21 }
 0x2df   :  { %v7631_v25 = vpack.c.bf16 %v8000_v23, %v7999_v24 }
 0x2e0   :  { %v8003_v26 = vpop.permute.xlu0 %8002  ;;  %v1397_v34 = vpop.permute.xlu1 %1396 }
 0x2e1   :  { %v8005_v28 = vunpack.i.h.bf16 %v8003_v26  ;;  %v8004_v29 = vunpack.i.l.bf16 %v8003_v26  ;;  %7633 = vmatprep.subr.msk.bf16.mxu1 %vm9363_vm2, %v7631_v25 }
 0x2e3   :  { %v7641_v30 = vpack.c.bf16 %v8005_v28, %v8004_v29 }
 0x2e4   :  { %v1399_v35 = vpop.permute.xlu0 %1398 }
 0x2e5   :  { %7125 = vmatmul.mubr.msk.f32.vlgmr.msra.gmra.mrb[6].mxu1 %vm836_vm1, %v9345_v7 }
 0x2e6   :  { %7636 = vmatpush3.bf16.xpose.msk.msra.mxu1 %vm9363_vm2, %v7631_v25  ;;  %7138 = vmatprep.mubr.msk.f32.mxu1 %vm836_vm1, %v1035_v27 }
 0x2e7   :  { %7643 = vmatprep.subr.msk.bf16.mxu1 %vm9363_vm2, %v7641_v30 }
 0x2ed   :  { %7139 = vmatmul.mubr.msk.f32.vlgmr.msra.gmra.mrb[8].mxu1 %vm836_vm1, %v1037_v31 }
 0x2ee   :  { %7646 = vmatpush3.bf16.xpose.msk.msra.mxu1 %vm9363_vm2, %v7641_v30  ;;  %7162 = vmatprep.mubr.msk.f32.mxu1 %vm836_vm1, %v1397_v34 }
 0x2f5   :  { %7163 = vmatmul.mubr.msk.f32.vlgmr.msra.gmra.mrb[10].mxu1 %vm836_vm1, %v1399_v35 }
 0x3b8   :  { %v7126_v44 = vpop.f32.mrb[6].mxu1 }
 0x3b9   :  { %v919_v45 = vadd.f32 %v7126_v44, %v9393_v42  ;;  %v913_v48 = vpop.f32.mrb[7].mxu1 }
 0x3ba   :  { %v914_v49 = vadd.f32 %v913_v48, %v9395_v43 }
 0x3bb   :  { %v926_v50 = vsel %vm922_vm3, %v919_v45, -inf }
 0x3bc   :  { %927 = vmax.xlane.f32.xlu0 %v926_v50  ;;  %v923_v51 = vsel %vm922_vm3, %v914_v49, -inf }
 0x3bd   :  { %924 = vmax.xlane.f32.xlu1 %v923_v51 }
 0x3c0   :  { %v7140_v52 = vpop.f32.mrb[8].mxu1 }
 0x3c1   :  { %v1122_v53 = vadd.f32 %v7140_v52, %v9393_v42  ;;  %v1116_v56 = vpop.f32.mrb[9].mxu1 }
 0x3c2   :  { %v1117_v57 = vadd.f32 %v1116_v56, %v9395_v43 }
 0x3c3   :  { %v1128_v58 = vsel %vm922_vm3, %v1122_v53, -inf }
 0x3c4   :  { %1129 = vmax.xlane.f32.xlu1 %v1128_v58  ;;  %v1125_v59 = vsel %vm922_vm3, %v1117_v57, -inf  ;;  %v2018_v58 = vld [vmem:[%s10149_s22 + $0x8] sm:$0xff] }
 0x3c5   :  { %1126 = vmax.xlane.f32.xlu0 %v1125_v59 }
 0x3c8   :  { %v7164_v60 = vpop.f32.mrb[10].mxu1 }
 0x3c9   :  { %v1478_v63 = vpop.f32.mrb[11].mxu1  ;;  %v9429_v28 = vadd.f32 %v7164_v60, %v9393_v42 }
 0x3ca   :  { %v9426_v27 = vadd.f32 %v1478_v63, %v9395_v43 }
 0x3cb   :  { %v1490_v29 = vsel %vm922_vm3, %v9429_v28, -inf }
 0x449   :  { %v928_v0 = vpop.xlane.xlu0 %927 }
 0x44a   :  { %v930_v1 = vsub.f32 %v919_v45, %v928_v0  ;;  %v925_v2 = vpop.xlane.xlu1 %924 }
 0x44b   :  { %v929_v3 = vsub.f32 %v914_v49, %v925_v2 }
 0x44c   :  { %v933_v10 = vmul.f32 1.442695, %v930_v1 }
 0x44d   :  { %v931_v11 = vmul.f32 1.442695, %v929_v3 }
 0x44e   :  { %8211 = vpow2.f32 %v933_v10 }
 0x44f   :  { %8213 = vpow2.f32 %v931_v11  ;;  %v2019_v11 = vld [vmem:[%s10149_s22 + $0x10] sm:$0xff] }
 0x451   :  { %v1130_v12 = vpop.xlane.xlu1 %1129 }
 0x452   :  { %v1132_v13 = vsub.f32 %v1122_v53, %v1130_v12  ;;  %v1127_v14 = vpop.xlane.xlu0 %1126  ;;  %v2020_v12 = vld [vmem:[%s10149_s22 + $0x18] sm:$0xff] }
 0x453   :  { %v1131_v15 = vsub.f32 %v1117_v57, %v1127_v14  ;;  %v2017_v57 = vld [vmem:[%s10149_s22] sm:$0xff] }
 0x454   :  { %v1135_v16 = vmul.f32 1.442695, %v1132_v13  ;;  %v7661_v1 = vpack.c.bf16 %v2018_v58, %v2017_v57  ;;  %v7665_v13 = vpack.c.bf16 %v2020_v12, %v2019_v11 }
 0x455   :  { %v1133_v17 = vmul.f32 1.442695, %v1131_v15 }
 0x456   :  { %8215 = vpow2.f32 %v1135_v16 }
 0x457   :  { %8217 = vpow2.f32 %v1133_v17 }
 0x458   :  { %v9405_v18 = vpop.eup %8211 }
 0x459   :  { %v8214_v19 = vpop.eup %8213  ;;  %v938_v21 = vsel %vm922_vm3, %v9405_v18, 0.0 }
 0x45a   :  { %939 = vadd.xlane.f32.xlu1 %v938_v21  ;;  %v935_v22 = vsel %vm922_vm3, %v8214_v19, 0.0 }
 0x45b   :  { %936 = vadd.xlane.f32.xlu0 %v935_v22 }
 0x460   :  { %v9410_v23 = vpop.eup %8215 }
 0x461   :  { %v8218_v24 = vpop.eup %8217  ;;  %v1140_v25 = vsel %vm922_vm3, %v9410_v23, 0.0 }
 0x462   :  { %1141 = vadd.xlane.f32.xlu1 %v1140_v25  ;;  %v1137_v26 = vsel %vm922_vm3, %v8218_v24, 0.0 }
 0x463   :  { %1138 = vadd.xlane.f32.xlu0 %v1137_v26  ;;  %v824_v26 = vld [vmem:[%s10150_s19 + $0x8] sm:$0xff] }
 0x473   :  { %8012 = vrot.lane.b32.xlu1 %v9333_v4, %s8838_s23 }
 0x477   :  { %8017 = vrot.lane.b32.xlu1 %v9335_v5, %s8839_s18  ;;  %v1487_v5 = vsel %vm922_vm3, %v9426_v27, -inf }
 0x479   :  { %8007 = vrot.lane.b32.xlu0 %v9333_v4, %s8840_s6 }
 0x47b   :  { %1681 = vrot.lane.b32.xlu1 %v9345_v7, %s8841_s0 }
 0x47d   :  { %1679 = vrot.lane.b32.xlu0 %v9337_v6, %s8841_s0 }
 0x49c   :  { %1488 = vmax.xlane.f32.xlu0 %v1487_v5 }
 0x49f   :  { %1491 = vmax.xlane.f32.xlu1 %v1490_v29 }
 0x4b0   :  { %8022 = vrot.lane.b32.xlu1 %v9333_v4, %s8842_s26 }
 0x4b4   :  { %8027 = vrot.lane.b32.xlu1 %v9333_v4, %s8843_s10 }
 0x4e7   :  { %v940_v7 = vpop.xlane.xlu1 %939 }
 0x4e8   :  { %v937_v6 = vpop.xlane.xlu0 %936 }
 0x4e9   :  { %8219 = vrcp.f32 %v937_v6 }
 0x4ea   :  { %8221 = vrcp.f32 %v940_v7 }
 0x4ef   :  { %v1142_v30 = vpop.xlane.xlu1 %1141 }
 0x4f0   :  { %v1139_v31 = vpop.xlane.xlu0 %1138 }
 0x4f1   :  { %8223 = vrcp.f32 %v1139_v31 }
 0x4f2   :  { %8225 = vrcp.f32 %v1142_v30 }
 0x4f3   :  { %v8220_v34 = vpop.eup %8219  ;;  %v8013_v35 = vpop.permute.xlu1 %8012 }
 0x4f4   :  { %v8008_v36 = vpop.permute.xlu0 %8007  ;;  %v943_v37 = vmul.f32 %v8220_v34, %v8214_v19  ;;  %v8015_v44 = vunpack.i.h.bf16 %v8013_v35  ;;  %v8014_v45 = vunpack.i.l.bf16 %v8013_v35  ;;  %v8222_v51 = vpop.eup %8221 }
 0x4f5   :  { %v8010_v48 = vunpack.i.h.bf16 %v8008_v36  ;;  %v8009_v49 = vunpack.i.l.bf16 %v8008_v36  ;;  %v944_v0 = vmul.f32 %v8222_v51, %v9405_v18 }
 0x4f6   :  { %7131 = vmatprep.mubr.msk.f32.mxu0 %vm922_vm3, %v943_v37  ;;  %v7637_v59 = vpack.c.bf16 %v8015_v44, %v8014_v45 }
 0x4f7   :  { %v8018_v50 = vpop.permute.xlu1 %8017  ;;  %v7627_v4 = vpack.c.bf16 %v8010_v48, %v8009_v49 }
 0x4f8   :  { %v8020_v52 = vunpack.i.h.bf16 %v8018_v50  ;;  %v8019_v53 = vunpack.i.l.bf16 %v8018_v50  ;;  %v1680_v56 = vpop.permute.xlu0 %1679 }
 0x4f9   :  { %7628 = vmatprep.subr.bf16.mxu0 %v7627_v4  ;;  %7181 = vmatprep.mubr.msk.f32.mxu1 %vm836_vm1, %v1680_v56 }
 0x4fa   :  { %v7651_v60 = vpack.c.bf16 %v8020_v52, %v8019_v53  ;;  %7630 = vmatpush3.bf16.msra.mxu0 %v7627_v4  ;;  %v825_v52 = vld [vmem:[%s10150_s19 + $0x10] sm:$0xff] }
 0x4fb   :  { %v8224_v63 = vpop.eup %8223  ;;  %7638 = vmatprep.subr.bf16.mxu0 %v7637_v59  ;;  %v1682_v14 = vpop.permute.xlu1 %1681 }
 0x4fc   :  { %v8226_v2 = vpop.eup %8225  ;;  %7653 = vmatprep.subr.msk.bf16.mxu1 %vm9363_vm2, %v7651_v60  ;;  %v1145_v3 = vmul.f32 %v8224_v63, %v8218_v24 }
 0x4fd   :  { %7132 = vmatmul.mubr.msk.f32.vlgmr.msra.gmra.mrb[8].mxu0 %vm922_vm3, %v944_v0  ;;  %7656 = vmatpush3.bf16.xpose.msk.msra.mxu1 %vm9363_vm2, %v7651_v60  ;;  %v1146_v10 = vmul.f32 %v8226_v2, %v9410_v23 }
 0x4fe   :  { %7640 = vmatpush3.bf16.msra.mxu0 %v7637_v59  ;;  %7145 = vmatprep.mubr.msk.f32.mxu0 %vm922_vm3, %v1145_v3 }
 0x4ff   :  { %7662 = vmatprep.subr.bf16.mxu1 %v7661_v1  ;;  %7148 = vmatprep.subr.mxu0 %v824_v26 }
 0x501   :  { %7146 = vmatmul.mubr.msk.f32.vlgmr.msra.gmra.mrb[10].mxu0 %vm922_vm3, %v1146_v10 }
 0x502   :  { %7149 = vmatpush3.msra.mxu0 %v824_v26 }
 0x504   :  { %7182 = vmatmul.mubr.msk.f32.vlgmr.msra.gmra.mrb[12].mxu1 %vm836_vm1, %v1682_v14 }
 0x505   :  { %7664 = vmatpush3.bf16.msra.mxu1 %v7661_v1 }
 0x506   :  { %7666 = vmatprep.subr.bf16.mxu1 %v7665_v13 }
 0x509   :  { %7668 = vmatpush3.bf16.msra.mxu1 %v7665_v13 }
 0x50a   :  { %7682 = vmatprep.subr.bf16.mxu1 %v9385_v38 }
 0x529   :  { %v1489_v15 = vpop.xlane.xlu0 %1488 }
 0x52a   :  { %v1493_v16 = vsub.f32 %v9426_v27, %v1489_v15  ;;  %v823_v27 = vld [vmem:[%s10150_s19] sm:$0xff]  ;;  %v826_v15 = vld [vmem:[%s10150_s19 + $0x18] sm:$0xff] }
 0x52b   :  { %7153 = vmatprep.subr.mxu0 %v823_v27 }
 0x52c   :  { %v1495_v17 = vmul.f32 1.442695, %v1493_v16  ;;  %v1492_v18 = vpop.xlane.xlu1 %1491 }
 0x52d   :  { %v1494_v19 = vsub.f32 %v9429_v28, %v1492_v18 }
 0x52e   :  { %8227 = vpow2.f32 %v1495_v17 }
 0x52f   :  { %v1497_v21 = vmul.f32 1.442695, %v1494_v19 }
 0x530   :  { %v8023_v5 = vpop.permute.xlu1 %8022 }
 0x531   :  { %8229 = vpow2.f32 %v1497_v21  ;;  %v8025_v30 = vunpack.i.h.bf16 %v8023_v5  ;;  %v8024_v31 = vunpack.i.l.bf16 %v8023_v5 }
 0x533   :  { %v7647_v37 = vpack.c.bf16 %v8025_v30, %v8024_v31 }
 0x534   :  { %v8028_v4 = vpop.permute.xlu1 %8027 }
 0x535   :  { %v8030_v53 = vunpack.i.h.bf16 %v8028_v4  ;;  %v8029_v56 = vunpack.i.l.bf16 %v8028_v4 }
 0x538   :  { %v8228_v22 = vpop.eup %8227 }
 0x539   :  { %v1499_v23 = vsel %vm922_vm3, %v8228_v22, 0.0 }
 0x53a   :  { %1500 = vadd.xlane.f32.xlu0 %v1499_v23 }
 0x53b   :  { %v8230_v24 = vpop.eup %8229 }
 0x53c   :  { %v1502_v25 = vsel %vm922_vm3, %v8230_v24, 0.0 }
 0x53e   :  { %1503 = vadd.xlane.f32.xlu0 %v1502_v25  ;;  %v6596_v25 = vld [vmem:[#allocation7] ss:$0 sm:$0xff] }
 0x5c7   :  { %v1501_v28 = vpop.xlane.xlu0 %1500 }
 0x5c8   :  { %8231 = vrcp.f32 %v1501_v28 }
 0x5cb   :  { %v1504_v6 = vpop.xlane.xlu0 %1503 }
 0x5cc   :  { %8233 = vrcp.f32 %v1504_v6 }
 0x5d0   :  { %v7133_v29 = vpop.f32.mrb[8].mxu0 }
 0x5d1   :  { %v1025_v7 = vpop.f32.mrb[9].mxu0 }
 0x5d2   :  { %v8232_v50 = vpop.eup %8231 }
 0x5d3   :  { %v1507_v58 = vmul.f32 %v8232_v50, %v8228_v22 }
 0x5d4   :  { %v7147_v34 = vpop.f32.mrb[10].mxu0 }
 0x5d5   :  { %v1225_v35 = vpop.f32.mrb[11].mxu0 }
 0x5d6   :  { %7150 = vmatprep.mubr.msk.f32.mxu0 %vm836_vm1, %v1225_v35  ;;  %v8234_v51 = vpop.eup %8233 }
 0x5d7   :  { %7151 = vmatmul.mubr.msk.f32.vlgmr.msra.gmra.mrb[12].mxu0 %vm836_vm1, %v7147_v34  ;;  %v7183_v36 = vpop.f32.mrb[12].mxu1 }
 0x5d8   :  { %7154 = vmatpush3.msra.mxu0 %v823_v27  ;;  %7155 = vmatprep.mubr.msk.f32.mxu0 %vm836_vm1, %v1025_v7  ;;  %v1761_v44 = vpop.f32.mrb[13].mxu1  ;;  %v1767_v48 = vadd.f32 %v7183_v36, %v9393_v42  ;;  %v1508_v42 = vmul.f32 %v8234_v51, %v8230_v24 }
 0x5d9   :  { %7648 = vmatprep.subr.bf16.mxu0 %v7647_v37  ;;  %v1762_v45 = vadd.f32 %v1761_v44, %v9395_v43  ;;  %v7657_v43 = vpack.c.bf16 %v8030_v53, %v8029_v56  ;;  %v6597_v53 = vld [vmem:[#allocation26] ss:$0 sm:$0xff] }
 0x5da   :  { %v1773_v57 = vsel %vm922_vm3, %v1767_v48, -inf }
 0x5db   :  { %v1770_v49 = vsel %vm922_vm3, %v1762_v45, -inf }
 0x5dc   :  { %1771 = vmax.xlane.f32.xlu0 %v1770_v49 }
 0x5df   :  { %7156 = vmatmul.mubr.msk.f32.vlgmr.msra.gmra.mrb[12].mxu0 %vm836_vm1, %v7133_v29 }
 0x5e0   :  { %7650 = vmatpush3.bf16.msra.mxu0 %v7647_v37  ;;  %1774 = vmax.xlane.f32.xlu0 %v1773_v57  ;;  %v6598_v57 = vld [vmem:[#allocation28] ss:$0 sm:$0xff] }
 0x5e1   :  { %7169 = vmatprep.mubr.msk.f32.mxu0 %vm922_vm3, %v1507_v58  ;;  %7172 = vmatprep.subr.mxu0 %v825_v52 }
 0x5e3   :  { %7170 = vmatmul.mubr.msk.f32.vlgmr.msra.gmra.mrb[14].mxu0 %vm922_vm3, %v1508_v42 }
 0x5e4   :  { %7173 = vmatpush3.msra.mxu0 %v825_v52 }
 0x5e5   :  { %7658 = vmatprep.subr.bf16.mxu0 %v7657_v43 }
 0x669   :  { %v1772_v59 = vpop.xlane.xlu0 %1771 }
 0x66a   :  { %v1776_v60 = vsub.f32 %v1762_v45, %v1772_v59 }
 0x66c   :  { %v1778_v63 = vmul.f32 1.442695, %v1776_v60 }
 0x66d   :  { %v1775_v0 = vpop.xlane.xlu0 %1774 }
 0x66e   :  { %8235 = vpow2.f32 %v1778_v63  ;;  %v1777_v1 = vsub.f32 %v1767_v48, %v1775_v0  ;;  %v6599_v0 = vld [vmem:[#allocation10] ss:$0 sm:$0xff] }
 0x670   :  { %v1780_v2 = vmul.f32 1.442695, %v1777_v1 }
 0x672   :  { %8237 = vpow2.f32 %v1780_v2 }
 0x678   :  { %v8236_v3 = vpop.eup %8235 }
 0x679   :  { %v1782_v10 = vsel %vm922_vm3, %v8236_v3, 0.0 }
 0x67a   :  { %1783 = vadd.xlane.f32.xlu0 %v1782_v10 }
 0x67c   :  { %v8238_v11 = vpop.eup %8237 }
 0x67d   :  { %v1785_v12 = vsel %vm922_vm3, %v8238_v11, 0.0 }
 0x67e   :  { %1786 = vadd.xlane.f32.xlu0 %v1785_v12 }
 0x6b6   :  { %v7171_v13 = vpop.f32.mrb[14].mxu0 }
 0x6b7   :  { %v1587_v14 = vpop.f32.mrb[15].mxu0 }
 0x6b8   :  { %7174 = vmatprep.mubr.msk.f32.mxu0 %vm836_vm1, %v1587_v14 }
 0x6b9   :  { %7175 = vmatmul.mubr.msk.f32.vlgmr.msra.gmra.mrb[12].mxu0 %vm836_vm1, %v7171_v13 }
 0x6ba   :  { %7660 = vmatpush3.bf16.msra.mxu0 %v7657_v43 }
 0x6bb   :  { %7191 = vmatprep.subr.mxu0 %v826_v15 }
 0x707   :  { %v1784_v16 = vpop.xlane.xlu0 %1783 }
 0x708   :  { %8239 = vrcp.f32 %v1784_v16 }
 0x70b   :  { %v1787_v17 = vpop.xlane.xlu0 %1786 }
 0x70c   :  { %8241 = vrcp.f32 %v1787_v17 }
 0x712   :  { %v8240_v18 = vpop.eup %8239 }
 0x713   :  { %v1790_v19 = vmul.f32 %v8240_v18, %v8236_v3 }
 0x715   :  { %7188 = vmatprep.mubr.msk.f32.mxu0 %vm922_vm3, %v1790_v19 }
 0x716   :  { %v8242_v21 = vpop.eup %8241 }
 0x717   :  { %v1791_v22 = vmul.f32 %v8242_v21, %v8238_v11 }
 0x719   :  { %7189 = vmatmul.mubr.msk.f32.vlgmr.msra.gmra.mrb[16].mxu0 %vm922_vm3, %v1791_v22 }
 0x71a   :  { %7192 = vmatpush3.msra.mxu0 %v826_v15  ;;  %v9551_v15 = vld [vmem:[%s10151_s29 + $0x8] sm:$0xff] }
 0x71b   :  { %7671 = vmatprep.subr.msk.bf16.mxu0 %vm9363_vm2, %v9323_v54 }
 0x7ec   :  { %v7190_v23 = vpop.f32.mrb[16].mxu0 }
 0x7ed   :  { %v1870_v24 = vpop.f32.mrb[17].mxu0 }
 0x7ee   :  { %7193 = vmatprep.mubr.msk.f32.mxu0 %vm836_vm1, %v1870_v24 }
 0x7ef   :  { %7194 = vmatmul.mubr.msk.f32.vlgmr.msra.gmra.mrb[12].mxu0 %vm836_vm1, %v7190_v23 }
 0x7f0   :  { %7674 = vmatpush3.bf16.xpose.msk.msra.mxu0 %vm9363_vm2, %v9323_v54 }
 0x7f1   :  { %7677 = vmatprep.subr.msk.bf16.mxu0 %vm9363_vm2, %v9327_v61 }
 0x7f8   :  { %7680 = vmatpush3.bf16.xpose.msk.msra.mxu0 %vm9363_vm2, %v9327_v61 }
 0x8c2   :  { %v7195_v26 = vpop.f32.mrb[12].mxu0 }
 0x8c3   :  { %v1969_v27 = vadd.f32 %v7195_v26, %v6596_v25  ;;  %v1951_v28 = vpop.f32.mrb[13].mxu0 }
 0x8c4   :  { %v1968_v5 = vadd.f32 %v6596_v25, %v1951_v28 }
 0x8c5   :  { %v1971_v29 = vadd.f32 %v1969_v27, %v9310_v33 }
 0x8c6   :  { %v1970_v6 = vadd.f32 %v1968_v5, %v9302_v32 }
 0x8c7   :  { %v1977_v7 = vsel %vm352_vm0, %v1971_v29, 0.0 }
 0x8c8   :  { %1978 = vadd.xlane.f32.xlu1 %v1977_v7  ;;  %v1974_v54 = vsel %vm352_vm0, %v1970_v6, 0.0 }
 0x8c9   :  { %1975 = vadd.xlane.f32.xlu0 %v1974_v54 }
 0x8d9   :  { %8037 = vrot.lane.b32.xlu1 %v9329_v62, %s8834_s11 }
 0x8dd   :  { %8042 = vrot.lane.b32.xlu1 %v9325_v55, %s8837_s14 }
 0x955   :  { %v1979_v61 = vpop.xlane.xlu1 %1978 }
 0x956   :  { %v1982_v30 = vmul.f32 0.03125, %v1979_v61  ;;  %v1976_v31 = vpop.xlane.xlu0 %1975 }
 0x957   :  { %v1981_v34 = vmul.f32 0.03125, %v1976_v31 }
 0x958   :  { %v1984_v35 = vsub.f32 %v1971_v29, %v1982_v30 }
 0x959   :  { %v1983_v33 = vsub.f32 %v1970_v6, %v1981_v34 }
 0x95a   :  { %v1986_v37 = vmul.f32 %v1984_v35, %v1984_v35 }
 0x95b   :  { %v1985_v36 = vmul.f32 %v1983_v33, %v1983_v33 }
 0x95c   :  { %v1990_v44 = vsel %vm352_vm0, %v1986_v37, 0.0 }
 0x95d   :  { %v1987_v32 = vsel %vm352_vm0, %v1985_v36, 0.0 }
 0x95e   :  { %1988 = vadd.xlane.f32.xlu0 %v1987_v32 }
 0x962   :  { %1991 = vadd.xlane.f32.xlu0 %v1990_v44 }
 0x9eb   :  { %v1989_v45 = vpop.xlane.xlu0 %1988 }
 0x9ec   :  { %v1993_v48 = vmul.f32 0.03125, %v1989_v45 }
 0x9ee   :  { %v1995_v49 = vadd.f32 1e-05, %v1993_v48 }
 0x9ef   :  { %v1992_v50 = vpop.xlane.xlu0 %1991 }
 0x9f0   :  { %8243 = vrsqrt.f32 %v1995_v49  ;;  %v1994_v4 = vmul.f32 0.03125, %v1992_v50 }
 0x9f2   :  { %v1996_v51 = vadd.f32 1e-05, %v1994_v4 }
 0x9f4   :  { %8245 = vrsqrt.f32 %v1996_v51 }
 0x9fa   :  { %v8244_v52 = vpop.eup %8243 }
 0x9fb   :  { %v1999_v56 = vmul.f32 %v8244_v52, %v1983_v33 }
 0x9fd   :  { %v2007_v58 = vmul.f32 %v6597_v53, %v1999_v56 }
 0x9fe   :  { %v8246_v42 = vpop.eup %8245 }
 0x9ff   :  { %v2000_v43 = vmul.f32 %v8246_v42, %v1984_v35  ;;  %v9520_v59 = vadd.f32 %v6598_v57, %v2007_v58  ;;  %v8038_v35 = vpop.permute.xlu1 %8037 }
 0xa00   :  { %v8040_v32 = vunpack.i.h.bf16 %v8038_v35  ;;  %v8039_v37 = vunpack.i.l.bf16 %v8038_v35 }
 0xa01   :  { %v2008_v60 = vmul.f32 %v6597_v53, %v2000_v43  ;;  %7204 = vmatprep.mubr.msk.f32.mxu1 %vm352_vm0, %v9520_v59 }
 0xa02   :  { %v7695_v49 = vpack.c.bf16 %v8040_v32, %v8039_v37 }
 0xa03   :  { %v9524_v63 = vadd.f32 %v6598_v57, %v2008_v60  ;;  %v8043_v50 = vpop.permute.xlu1 %8042 }
 0xa04   :  { %v8045_v51 = vunpack.i.h.bf16 %v8043_v50  ;;  %v8044_v52 = vunpack.i.l.bf16 %v8043_v50 }
 0xa05   :  { %7205 = vmatmul.mubr.msk.f32.vlgmr.msra.gmra.mrb[14].mxu1 %vm352_vm0, %v9524_v63 }
 0xa06   :  { %7684 = vmatpush3.bf16.msra.mxu1 %v9385_v38  ;;  %v9546_v38 = vld [vmem:[%s10151_s29] sm:$0xff]  ;;  %v7709_v53 = vpack.c.bf16 %v8045_v51, %v8044_v52 }
 0xa07   :  { %7686 = vmatprep.subr.bf16.mxu1 %v9389_v40 }
 0xa0a   :  { %7688 = vmatpush3.bf16.msra.mxu1 %v9389_v40 }
 0xad8   :  { %v7206_v1 = vpop.f32.mrb[14].mxu1 }
 0xad9   :  { %v2106_v2 = vadd.f32 %v7206_v1, %v6599_v0  ;;  %v2100_v3 = vpop.f32.mrb[15].mxu1 }
 0xada   :  { %v2101_v10 = vadd.f32 %v6599_v0, %v2100_v3 }
 0xadb   :  { %v2110_v11 = vadd.f32 %v9357_v8, %v2106_v2 }
 0xadc   :  { %v2109_v12 = vadd.f32 %v2101_v10, %v9359_v9 }
 0xadd   :  { %v9535_v14 = vmul.f32 0.35355338, %v2110_v11 }
 0xade   :  { %v9533_v13 = vmul.f32 0.35355338, %v2109_v12 }
 0xae0   :  { %2694 = vrot.lane.b32.xlu1 %v9533_v13, %s8837_s14  ;;  %7215 = vmatprep.mubr.msk.f32.mxu0 %vm836_vm1, %v9533_v13 }
 0xae1   :  { %7216 = vmatmul.mubr.msk.f32.vlgmr.msra.gmra.mrb[18].mxu0 %vm836_vm1, %v9535_v14 }
 0xb52   :  { %v2695_v42 = vpop.permute.xlu1 %2694 }
 0xbb4   :  { %v7217_v40 = vpop.f32.mrb[18].mxu0 }
 0xbb5   :  { %v2202_v16 = vpop.f32.mrb[19].mxu0  ;;  %v2208_v18 = vadd.f32 %v7217_v40, %v9551_v15 }
 0xbb6   :  { %v2203_v17 = vadd.f32 %v2202_v16, %v9546_v38 }
 0xbb7   :  { %v2214_v21 = vsel %vm352_vm0, %v2208_v18, -inf }
 0xbb8   :  { %v2211_v19 = vsel %vm352_vm0, %v2203_v17, -inf }
 0xbb9   :  { %2212 = vmax.xlane.f32.xlu0 %v2211_v19 }
 0xbbd   :  { %2215 = vmax.xlane.f32.xlu0 %v2214_v21 }
 0xc46   :  { %v2213_v22 = vpop.xlane.xlu0 %2212 }
 0xc47   :  { %v2217_v23 = vsub.f32 %v2203_v17, %v2213_v22 }
 0xc49   :  { %v2219_v26 = vmul.f32 1.442695, %v2217_v23 }
 0xc4a   :  { %v2216_v24 = vpop.xlane.xlu0 %2215 }
 0xc4b   :  { %v2218_v25 = vsub.f32 %v2208_v18, %v2216_v24 }
 0xc4d   :  { %v2221_v27 = vmul.f32 1.442695, %v2218_v25 }
 0xc4f   :  { %8247 = vpow2.f32 %v2221_v27 }
 0xc50   :  { %8249 = vpow2.f32 %v2219_v26 }
 0xc59   :  { %v8248_v28 = vpop.eup %8247 }
 0xc5a   :  { %v2226_v5 = vsel %vm352_vm0, %v8248_v28, 0.0  ;;  %v8250_v29 = vpop.eup %8249 }
 0xc5b   :  { %2227 = vadd.xlane.f32.xlu0 %v2226_v5  ;;  %v2223_v6 = vsel %vm352_vm0, %v8250_v29, 0.0 }
 0xc5f   :  { %2224 = vadd.xlane.f32.xlu0 %v2223_v6 }
 0xc75   :  { %8032 = vrot.lane.b32.xlu0 %v9325_v55, %s8834_s11 }
 0xc79   :  { %2314 = vrot.lane.b32.xlu0 %v9533_v13, %s8834_s11 }
 0xc7d   :  { %2316 = vrot.lane.b32.xlu0 %v9535_v14, %s8834_s11 }
 0xc81   :  { %8047 = vrot.lane.b32.xlu0 %v9329_v62, %s8837_s14 }
 0xc85   :  { %2696 = vrot.lane.b32.xlu0 %v9535_v14, %s8837_s14 }
 0xce8   :  { %v2228_v7 = vpop.xlane.xlu0 %2227 }
 0xce9   :  { %8251 = vrcp.f32 %v2228_v7 }
 0xcec   :  { %v2225_v54 = vpop.xlane.xlu0 %2224 }
 0xced   :  { %8253 = vrcp.f32 %v2225_v54 }
 0xcf0   :  { %v8033_v61 = vpop.permute.xlu0 %8032 }
 0xcf1   :  { %v8035_v30 = vunpack.i.h.bf16 %v8033_v61  ;;  %v8034_v31 = vunpack.i.l.bf16 %v8033_v61 }
 0xcf3   :  { %v7689_v34 = vpack.c.bf16 %v8035_v30, %v8034_v31  ;;  %v8252_v33 = vpop.eup %8251 }
 0xcf4   :  { %v2315_v44 = vpop.permute.xlu0 %2314  ;;  %v2232_v48 = vmul.f32 %v8252_v33, %v8248_v28 }
 0xcf5   :  { %7691 = vmatprep.subr.msk.bf16.mxu1 %vm9363_vm2, %v7689_v34 }
 0xcf7   :  { %v8254_v36 = vpop.eup %8253 }
 0xcf8   :  { %v2231_v45 = vmul.f32 %v8254_v36, %v8250_v29  ;;  %v2317_v4 = vpop.permute.xlu0 %2316 }
 0xcfa   :  { %7226 = vmatprep.mubr.msk.f32.mxu1 %vm352_vm0, %v2231_v45 }
 0xcfb   :  { %7227 = vmatmul.mubr.msk.f32.vlgmr.msra.gmra.mrb[16].mxu1 %vm352_vm0, %v2232_v48 }
 0xcfc   :  { %7694 = vmatpush3.bf16.xpose.msk.msra.mxu1 %vm9363_vm2, %v7689_v34  ;;  %7237 = vmatprep.mubr.msk.f32.mxu1 %vm836_vm1, %v2315_v44  ;;  %v8048_v56 = vpop.permute.xlu0 %8047 }
 0xcfd   :  { %7697 = vmatprep.subr.msk.bf16.mxu1 %vm9363_vm2, %v7695_v49  ;;  %v8050_v57 = vunpack.i.h.bf16 %v8048_v56  ;;  %v8049_v58 = vunpack.i.l.bf16 %v8048_v56 }
 0xcff   :  { %v7715_v43 = vpack.c.bf16 %v8050_v57, %v8049_v58 }
 0xd00   :  { %v2697_v60 = vpop.permute.xlu0 %2696 }
 0xd04   :  { %7700 = vmatpush3.bf16.xpose.msk.msra.mxu1 %vm9363_vm2, %v7695_v49 }
 0xd05   :  { %7711 = vmatprep.subr.msk.bf16.mxu1 %vm9363_vm2, %v7709_v53 }
 0xd0b   :  { %7238 = vmatmul.mubr.msk.f32.vlgmr.msra.gmra.mrb[18].mxu1 %vm836_vm1, %v2317_v4 }
 0xd0c   :  { %7714 = vmatpush3.bf16.xpose.msk.msra.mxu1 %vm9363_vm2, %v7709_v53  ;;  %7269 = vmatprep.mubr.msk.f32.mxu1 %vm836_vm1, %v2695_v42 }
 0xd0d   :  { %7717 = vmatprep.subr.msk.bf16.mxu1 %vm9363_vm2, %v7715_v43 }
 0xd14   :  { %7720 = vmatpush3.bf16.xpose.msk.msra.mxu1 %vm9363_vm2, %v7715_v43 }
 0xd1b   :  { %7270 = vmatmul.mubr.msk.f32.vlgmr.msra.gmra.mrb[20].mxu1 %vm836_vm1, %v2697_v60 }
 0xdce   :  { %v9591_v0 = vpop.f32.mrb[16].mxu1 }
 0xdcf   :  { %v9593_v1 = vpop.f32.mrb[17].mxu1 }
 0xdde   :  { %v7239_v2 = vpop.f32.mrb[18].mxu1 }
 0xddf   :  { %v2410_v3 = vadd.f32 %v7239_v2, %v9551_v15  ;;  %v2404_v10 = vpop.f32.mrb[19].mxu1 }
 0xde0   :  { %v2405_v11 = vadd.f32 %v2404_v10, %v9546_v38 }
 0xde1   :  { %v2416_v12 = vsel %vm352_vm0, %v2410_v3, -inf }
 0xde2   :  { %2417 = vmax.xlane.f32.xlu0 %v2416_v12  ;;  %v2413_v40 = vsel %vm352_vm0, %v2405_v11, -inf }
 0xde3   :  { %2414 = vmax.xlane.f32.xlu1 %v2413_v40 }
 0xdee   :  { %v7271_v16 = vpop.f32.mrb[20].mxu1 }
 0xdef   :  { %v2784_v17 = vpop.f32.mrb[21].mxu1  ;;  %v2790_v29 = vadd.f32 %v7271_v16, %v9551_v15 }
 0xdf0   :  { %v2785_v5 = vadd.f32 %v2784_v17, %v9546_v38  ;;  %v2112_v17 = vld [vmem:[#allocation19 + $0x8] sm:$0xff] }
 0xdf1   :  { %v2796_v7 = vsel %vm352_vm0, %v2790_v29, -inf }
 0xdf2   :  { %v2793_v6 = vsel %vm352_vm0, %v2785_v5, -inf }
 0xe6f   :  { %v2418_v18 = vpop.xlane.xlu0 %2417 }
 0xe70   :  { %v2420_v19 = vsub.f32 %v2410_v3, %v2418_v18  ;;  %v2415_v21 = vpop.xlane.xlu1 %2414  ;;  %v2111_v18 = vld [vmem:[#allocation19] sm:$0xff] }
 0xe71   :  { %v2419_v22 = vsub.f32 %v2405_v11, %v2415_v21 }
 0xe72   :  { %v2423_v23 = vmul.f32 1.442695, %v2420_v19 }
 0xe73   :  { %v2421_v24 = vmul.f32 1.442695, %v2419_v22 }
 0xe74   :  { %8255 = vpow2.f32 %v2423_v23 }
 0xe75   :  { %8257 = vpow2.f32 %v2421_v24 }
 0xe7e   :  { %v8256_v25 = vpop.eup %8255 }
 0xe7f   :  { %v8258_v26 = vpop.eup %8257  ;;  %v2428_v27 = vsel %vm352_vm0, %v8256_v25, 0.0 }
 0xe80   :  { %2429 = vadd.xlane.f32.xlu1 %v2428_v27  ;;  %v2425_v28 = vsel %vm352_vm0, %v8258_v26, 0.0 }
 0xe81   :  { %2426 = vadd.xlane.f32.xlu0 %v2425_v28 }
 0xe91   :  { %8057 = vrot.lane.b32.xlu1 %v9391_v41, %s8834_s11 }
 0xe95   :  { %8062 = vrot.lane.b32.xlu1 %v9325_v55, %s8841_s0 }
 0xe97   :  { %8052 = vrot.lane.b32.xlu0 %v9387_v39, %s8834_s11 }
 0xe99   :  { %2991 = vrot.lane.b32.xlu1 %v9533_v13, %s8841_s0 }
 0xe9b   :  { %8067 = vrot.lane.b32.xlu0 %v9329_v62, %s8841_s0 }
 0xe9f   :  { %2993 = vrot.lane.b32.xlu0 %v9535_v14, %s8841_s0 }
 0xebd   :  { %2794 = vmax.xlane.f32.xlu1 %v2793_v6 }
 0xebe   :  { %2797 = vmax.xlane.f32.xlu0 %v2796_v7 }
 0xf0d   :  { %v2430_v54 = vpop.xlane.xlu1 %2429 }
 0xf0e   :  { %v2427_v61 = vpop.xlane.xlu0 %2426 }
 0xf0f   :  { %8259 = vrcp.f32 %v2427_v61 }
 0xf10   :  { %8261 = vrcp.f32 %v2430_v54 }
 0xf11   :  { %v8058_v13 = vpop.permute.xlu1 %8057 }
 0xf12   :  { %v8053_v30 = vpop.permute.xlu0 %8052  ;;  %v8060_v31 = vunpack.i.h.bf16 %v8058_v13  ;;  %v8059_v34 = vunpack.i.l.bf16 %v8058_v13 }
 0xf13   :  { %v8055_v35 = vunpack.i.h.bf16 %v8053_v30  ;;  %v8054_v14 = vunpack.i.l.bf16 %v8053_v30 }
 0xf14   :  { %v7705_v49 = vpack.c.bf16 %v8060_v31, %v8059_v34 }
 0xf15   :  { %v8063_v33 = vpop.permute.xlu1 %8062  ;;  %v7701_v36 = vpack.c.bf16 %v8055_v35, %v8054_v14  ;;  %v2113_v14 = vld [vmem:[#allocation19 + $0x10] sm:$0xff] }
 0xf16   :  { %v8065_v32 = vunpack.i.h.bf16 %v8063_v33  ;;  %v8064_v37 = vunpack.i.l.bf16 %v8063_v33  ;;  %v8068_v44 = vpop.permute.xlu0 %8067 }
 0xf17   :  { %v8070_v45 = vunpack.i.h.bf16 %v8068_v44  ;;  %v8069_v48 = vunpack.i.l.bf16 %v8068_v44  ;;  %7702 = vmatprep.subr.bf16.mxu0 %v7701_v36 }
 0xf18   :  { %v7729_v50 = vpack.c.bf16 %v8065_v32, %v8064_v37  ;;  %7704 = vmatpush3.bf16.msra.mxu0 %v7701_v36 }
 0xf19   :  { %v8260_v4 = vpop.eup %8259  ;;  %v7735_v51 = vpack.c.bf16 %v8070_v45, %v8069_v48  ;;  %v2992_v52 = vpop.permute.xlu1 %2991  ;;  %7706 = vmatprep.subr.bf16.mxu0 %v7705_v49 }
 0xf1a   :  { %v8262_v53 = vpop.eup %8261  ;;  %7731 = vmatprep.subr.msk.bf16.mxu1 %vm9363_vm2, %v7729_v50  ;;  %7296 = vmatprep.mubr.msk.f32.mxu1 %vm836_vm1, %v2992_v52  ;;  %v2433_v56 = vmul.f32 %v8260_v4, %v8258_v26  ;;  %v2994_v58 = vpop.permute.xlu0 %2993 }
 0xf1b   :  { %7734 = vmatpush3.bf16.xpose.msk.msra.mxu1 %vm9363_vm2, %v7729_v50  ;;  %v2434_v57 = vmul.f32 %v8262_v53, %v8256_v25 }
 0xf1c   :  { %7708 = vmatpush3.bf16.msra.mxu0 %v7705_v49  ;;  %7248 = vmatprep.mubr.msk.f32.mxu0 %vm352_vm0, %v2433_v56 }
 0xf1d   :  { %7737 = vmatprep.subr.msk.bf16.mxu1 %vm9363_vm2, %v7735_v51  ;;  %7251 = vmatprep.subr.mxu0 %v2112_v17 }
 0xf1f   :  { %7249 = vmatmul.mubr.msk.f32.vlgmr.msra.gmra.mrb[20].mxu0 %vm352_vm0, %v2434_v57 }
 0xf20   :  { %7252 = vmatpush3.msra.mxu0 %v2112_v17 }
 0xf21   :  { %7256 = vmatprep.subr.mxu0 %v2111_v18 }
 0xf23   :  { %7740 = vmatpush3.bf16.xpose.msk.msra.mxu1 %vm9363_vm2, %v7735_v51 }
 0xf2a   :  { %7297 = vmatmul.mubr.msk.f32.vlgmr.msra.gmra.mrb[22].mxu1 %vm836_vm1, %v2994_v58 }
 0xf4a   :  { %v2795_v42 = vpop.xlane.xlu1 %2794 }
 0xf4b   :  { %v2799_v43 = vsub.f32 %v2785_v5, %v2795_v42  ;;  %v2798_v60 = vpop.xlane.xlu0 %2797 }
 0xf4c   :  { %v2800_v2 = vsub.f32 %v2790_v29, %v2798_v60 }
 0xf4d   :  { %v2801_v3 = vmul.f32 1.442695, %v2799_v43 }
 0xf4e   :  { %v2803_v10 = vmul.f32 1.442695, %v2800_v2 }
 0xf4f   :  { %8263 = vpow2.f32 %v2801_v3 }
 0xf50   :  { %8265 = vpow2.f32 %v2803_v10 }
 0xf59   :  { %v8264_v11 = vpop.eup %8263 }
 0xf5a   :  { %v8266_v12 = vpop.eup %8265  ;;  %v2805_v40 = vsel %vm352_vm0, %v8264_v11, 0.0 }
 0xf5b   :  { %2806 = vadd.xlane.f32.xlu0 %v2805_v40  ;;  %v2808_v16 = vsel %vm352_vm0, %v8266_v12, 0.0 }
 0xf5c   :  { %2809 = vadd.xlane.f32.xlu1 %v2808_v16 }
 0xf6d   :  { %8077 = vrot.lane.b32.xlu1 %v9391_v41, %s8837_s14 }
 0xf71   :  { %8072 = vrot.lane.b32.xlu0 %v9387_v39, %s8837_s14 }
 0xfe8   :  { %v2807_v19 = vpop.xlane.xlu0 %2806 }
 0xfe9   :  { %8267 = vrcp.f32 %v2807_v19  ;;  %v2810_v22 = vpop.xlane.xlu1 %2809 }
 0xfea   :  { %8269 = vrcp.f32 %v2810_v22 }
 0xfec   :  { %v8073_v21 = vpop.permute.xlu0 %8072 }
 0xfed   :  { %v8075_v23 = vunpack.i.h.bf16 %v8073_v21  ;;  %v8074_v24 = vunpack.i.l.bf16 %v8073_v21  ;;  %v8078_v28 = vpop.permute.xlu1 %8077 }
 0xfee   :  { %v8080_v29 = vunpack.i.h.bf16 %v8078_v28  ;;  %v8079_v6 = vunpack.i.l.bf16 %v8078_v28 }
 0xfef   :  { %v7721_v27 = vpack.c.bf16 %v8075_v23, %v8074_v24 }
 0xff0   :  { %v7725_v61 = vpack.c.bf16 %v8080_v29, %v8079_v6 }
 0xff2   :  { %v7250_v25 = vpop.f32.mrb[20].mxu0 }
 0xff3   :  { %v2523_v26 = vpop.f32.mrb[21].mxu0  ;;  %v8268_v5 = vpop.eup %8267 }
 0xff4   :  { %7253 = vmatprep.mubr.msk.f32.mxu0 %vm836_vm1, %v2523_v26  ;;  %v2813_v7 = vmul.f32 %v8268_v5, %v8264_v11 }
 0xff5   :  { %7254 = vmatmul.mubr.msk.f32.vlgmr.msra.gmra.mrb[22].mxu0 %vm836_vm1, %v7250_v25 }
 0xff6   :  { %7257 = vmatpush3.msra.mxu0 %v2111_v18  ;;  %7258 = vmatprep.mubr.msk.f32.mxu0 %vm836_vm1, %v9593_v1  ;;  %v8270_v1 = vpop.eup %8269  ;;  %v6642_v18 = vld [vmem:[#allocation20] ss:$0 sm:$0xff] }
 0xff7   :  { %7722 = vmatprep.subr.bf16.mxu0 %v7721_v27 }
 0xffd   :  { %7259 = vmatmul.mubr.msk.f32.vlgmr.msra.gmra.mrb[22].mxu0 %vm836_vm1, %v9591_v0  ;;  %v7298_v54 = vpop.f32.mrb[22].mxu1  ;;  %v2814_v0 = vmul.f32 %v8270_v1, %v8266_v12  ;;  %v2114_v12 = vld [vmem:[#allocation19 + $0x18] sm:$0xff] }
 0xffe   :  { %7724 = vmatpush3.bf16.msra.mxu0 %v7721_v27  ;;  %v3087_v13 = vadd.f32 %v7298_v54, %v9551_v15  ;;  %7280 = vmatprep.mubr.msk.f32.mxu0 %vm352_vm0, %v2813_v7  ;;  %v3081_v30 = vpop.f32.mrb[23].mxu1 }
 0xfff   :  { %7726 = vmatprep.subr.bf16.mxu0 %v7725_v61  ;;  %v3082_v31 = vadd.f32 %v3081_v30, %v9546_v38 }
0x1000   :  { %v3093_v34 = vsel %vm352_vm0, %v3087_v13, -inf }
0x1001   :  { %3094 = vmax.xlane.f32.xlu0 %v3093_v34  ;;  %v3090_v35 = vsel %vm352_vm0, %v3082_v31, -inf  ;;  %v3346_v34 = vld [vmem:[#allocation22 + $0x10] sm:$0xff] }
0x1002   :  { %7728 = vmatpush3.bf16.msra.mxu0 %v7725_v61  ;;  %3091 = vmax.xlane.f32.xlu1 %v3090_v35  ;;  %v3347_v35 = vld [vmem:[#allocation22 + $0x18] sm:$0xff] }
0x1003   :  { %7283 = vmatprep.subr.mxu0 %v2113_v14 }
0x1005   :  { %7281 = vmatmul.mubr.msk.f32.vlgmr.msra.gmra.mrb[24].mxu0 %vm352_vm0, %v2814_v0  ;;  %v7753_v0 = vpack.c.bf16 %v3347_v35, %v3346_v34 }
0x1006   :  { %7284 = vmatpush3.msra.mxu0 %v2113_v14  ;;  %v3438_v14 = vld [vmem:[%s10152_s27] sm:$0xff] }
0x108e   :  { %v3095_v15 = vpop.xlane.xlu0 %3094 }
0x108f   :  { %v3097_v33 = vsub.f32 %v3087_v13, %v3095_v15  ;;  %v3092_v36 = vpop.xlane.xlu1 %3091  ;;  %v3439_v15 = vld [vmem:[%s10152_s27 + $0x8] sm:$0xff] }
0x1090   :  { %v3096_v32 = vsub.f32 %v3082_v31, %v3092_v36  ;;  %v3345_v31 = vld [vmem:[#allocation22 + $0x8] sm:$0xff]  ;;  %v7757_v36 = vpack.c.bf16 %v3439_v15, %v3438_v14 }
0x1091   :  { %v3100_v37 = vmul.f32 1.442695, %v3097_v33  ;;  %v3440_v33 = vld [vmem:[%s10152_s27 + $0x10] sm:$0xff]  ;;  %v6654_v14 = vld [vmem:[%s10145_s5 + $0x28] sm:$0xff] }
0x1092   :  { %v3098_v38 = vmul.f32 1.442695, %v3096_v32  ;;  %v3441_v32 = vld [vmem:[%s10152_s27 + $0x18] sm:$0xff]  ;;  %7758 = vmatprep.subr.bf16.mxu1 %v7757_v36 }
0x1093   :  { %8271 = vpow2.f32 %v3100_v37  ;;  %v7761_v37 = vpack.c.bf16 %v3441_v32, %v3440_v33  ;;  %7760 = vmatpush3.bf16.msra.mxu1 %v7757_v36  ;;  %v6655_v33 = vld [vmem:[%s10145_s5 + $0x30] sm:$0xff] }
0x1094   :  { %8273 = vpow2.f32 %v3098_v38  ;;  %v3442_v38 = vld [vmem:[%s10152_s27 + $0x20] sm:$0xff] }
0x1095   :  { %7762 = vmatprep.subr.bf16.mxu1 %v7761_v37 }
0x1097   :  { %7764 = vmatpush3.bf16.msra.mxu1 %v7761_v37 }
0x109d   :  { %v8272_v44 = vpop.eup %8271 }
0x109e   :  { %v8274_v45 = vpop.eup %8273  ;;  %v3105_v48 = vsel %vm352_vm0, %v8272_v44, 0.0 }
0x109f   :  { %3106 = vadd.xlane.f32.xlu1 %v3105_v48  ;;  %v3102_v49 = vsel %vm352_vm0, %v8274_v45, 0.0 }
0x10a0   :  { %3103 = vadd.xlane.f32.xlu0 %v3102_v49 }
0x10b0   :  { %8087 = vrot.lane.b32.xlu1 %v9391_v41, %s8841_s0 }
0x10b6   :  { %8082 = vrot.lane.b32.xlu0 %v9387_v39, %s8841_s0 }
0x10d8   :  { %v7282_v50 = vpop.f32.mrb[24].mxu0 }
0x10d9   :  { %v2899_v4 = vpop.f32.mrb[25].mxu0 }
0x10da   :  { %7285 = vmatprep.mubr.msk.f32.mxu0 %vm836_vm1, %v2899_v4 }
0x10db   :  { %7286 = vmatmul.mubr.msk.f32.vlgmr.msra.gmra.mrb[22].mxu0 %vm836_vm1, %v7282_v50 }
0x112c   :  { %v3107_v51 = vpop.xlane.xlu1 %3106 }
0x112d   :  { %v3104_v52 = vpop.xlane.xlu0 %3103 }
0x112e   :  { %8275 = vrcp.f32 %v3104_v52 }
0x112f   :  { %8277 = vrcp.f32 %v3107_v51 }
0x1130   :  { %v8088_v53 = vpop.permute.xlu1 %8087 }
0x1131   :  { %v8083_v56 = vpop.permute.xlu0 %8082  ;;  %v8090_v57 = vunpack.i.h.bf16 %v8088_v53  ;;  %v8089_v58 = vunpack.i.l.bf16 %v8088_v53 }
0x1132   :  { %v8085_v42 = vunpack.i.h.bf16 %v8083_v56  ;;  %v8084_v43 = vunpack.i.l.bf16 %v8083_v56  ;;  %v6643_v56 = vld [vmem:[#allocation26 + $0x1] ss:$0 sm:$0xff] }
0x1133   :  { %v7745_v2 = vpack.c.bf16 %v8090_v57, %v8089_v58 }
0x1134   :  { %v7741_v60 = vpack.c.bf16 %v8085_v42, %v8084_v43  ;;  %v6644_v43 = vld [vmem:[#allocation28 + $0x1] ss:$0 sm:$0xff] }
0x1136   :  { %7742 = vmatprep.subr.bf16.mxu0 %v7741_v60 }
0x1137   :  { %7744 = vmatpush3.bf16.msra.mxu0 %v7741_v60 }
0x1138   :  { %v8276_v3 = vpop.eup %8275  ;;  %7746 = vmatprep.subr.bf16.mxu0 %v7745_v2 }
0x1139   :  { %v8278_v10 = vpop.eup %8277  ;;  %v3110_v11 = vmul.f32 %v8276_v3, %v8274_v45 }
0x113a   :  { %v3111_v40 = vmul.f32 %v8278_v10, %v8272_v44  ;;  %v3443_v44 = vld [vmem:[%s10152_s27 + $0x28] sm:$0xff] }
0x113b   :  { %7748 = vmatpush3.bf16.msra.mxu0 %v7745_v2  ;;  %7307 = vmatprep.mubr.msk.f32.mxu0 %vm352_vm0, %v3110_v11  ;;  %v7765_v45 = vpack.c.bf16 %v3443_v44, %v3442_v38  ;;  %v3444_v11 = vld [vmem:[%s10152_s27 + $0x30] sm:$0xff] }
0x113c   :  { %7310 = vmatprep.subr.mxu0 %v2114_v12 }
0x113d   :  { %7766 = vmatprep.subr.bf16.mxu1 %v7765_v45 }
0x113e   :  { %7308 = vmatmul.mubr.msk.f32.vlgmr.msra.gmra.mrb[26].mxu0 %vm352_vm0, %v3111_v40  ;;  %7768 = vmatpush3.bf16.msra.mxu1 %v7765_v45 }
0x113f   :  { %7311 = vmatpush3.msra.mxu0 %v2114_v12  ;;  %v3445_v12 = vld [vmem:[%s10152_s27 + $0x38] sm:$0xff] }
0x1140   :  { %v7769_v40 = vpack.c.bf16 %v3445_v12, %v3444_v11 }
0x1142   :  { %7770 = vmatprep.subr.bf16.mxu1 %v7769_v40 }
0x1143   :  { %7772 = vmatpush3.bf16.msra.mxu1 %v7769_v40 }
0x1211   :  { %v7309_v16 = vpop.f32.mrb[26].mxu0 }
0x1212   :  { %v3196_v17 = vpop.f32.mrb[27].mxu0 }
0x1213   :  { %7312 = vmatprep.mubr.msk.f32.mxu0 %vm836_vm1, %v3196_v17 }
0x1214   :  { %7313 = vmatmul.mubr.msk.f32.vlgmr.msra.gmra.mrb[22].mxu0 %vm836_vm1, %v7309_v16  ;;  %v6645_v16 = vld [vmem:[#allocation23] ss:$0 sm:$0xff] }
0x12e7   :  { %v7314_v19 = vpop.f32.mrb[22].mxu0 }
0x12e8   :  { %v3295_v21 = vadd.f32 %v7314_v19, %v6642_v18  ;;  %v3277_v22 = vpop.f32.mrb[23].mxu0 }
0x12e9   :  { %v3294_v23 = vadd.f32 %v6642_v18, %v3277_v22 }
0x12ea   :  { %v3297_v24 = vadd.f32 %v3295_v21, %v9524_v63 }
0x12eb   :  { %v3296_v25 = vadd.f32 %v3294_v23, %v9520_v59  ;;  %v3344_v59 = vld [vmem:[#allocation22] sm:$0xff] }
0x12ec   :  { %v3305_v26 = vsel %vm352_vm0, %v3297_v24, 0.0  ;;  %v7749_v1 = vpack.c.bf16 %v3345_v31, %v3344_v59 }
0x12ed   :  { %3306 = vadd.xlane.f32.xlu0 %v3305_v26  ;;  %v3302_v27 = vsel %vm352_vm0, %v3296_v25, 0.0 }
0x12ee   :  { %3303 = vadd.xlane.f32.xlu1 %v3302_v27  ;;  %7750 = vmatprep.subr.bf16.mxu0 %v7749_v1 }
0x12ef   :  { %7752 = vmatpush3.bf16.msra.mxu0 %v7749_v1 }
0x12f0   :  { %7754 = vmatprep.subr.bf16.mxu0 %v7753_v0 }
0x12f3   :  { %7756 = vmatpush3.bf16.msra.mxu0 %v7753_v0  ;;  %v6653_v0 = vld [vmem:[%s10145_s5 + $0x20] sm:$0xff] }
0x12f4   :  { %v7773_v15 = vpack.c.bf16 %v6654_v14, %v6653_v0 }
0x12f6   :  { %7774 = vmatprep.subr.bf16.mxu0 %v7773_v15 }
0x137a   :  { %v3307_v28 = vpop.xlane.xlu0 %3306 }
0x137b   :  { %v3309_v5 = vmul.f32 0.03125, %v3307_v28  ;;  %v3304_v29 = vpop.xlane.xlu1 %3303 }
0x137c   :  { %v3308_v6 = vmul.f32 0.03125, %v3304_v29 }
0x137d   :  { %v3311_v7 = vsub.f32 %v3297_v24, %v3309_v5  ;;  %v6648_v24 = vld [vmem:[#allocation25] ss:$0 sm:$0xff] }
0x137e   :  { %v3310_v54 = vsub.f32 %v3296_v25, %v3308_v6 }
0x137f   :  { %v3313_v61 = vmul.f32 %v3311_v7, %v3311_v7 }
0x1380   :  { %v3312_v13 = vmul.f32 %v3310_v54, %v3310_v54 }
0x1381   :  { %v3317_v30 = vsel %vm352_vm0, %v3313_v61, 0.0 }
0x1382   :  { %3318 = vadd.xlane.f32.xlu1 %v3317_v30  ;;  %v3314_v63 = vsel %vm352_vm0, %v3312_v13, 0.0 }
0x1383   :  { %3315 = vadd.xlane.f32.xlu0 %v3314_v63 }
0x140f   :  { %v3319_v48 = vpop.xlane.xlu1 %3318 }
0x1410   :  { %v3321_v49 = vmul.f32 0.03125, %v3319_v48  ;;  %v3316_v50 = vpop.xlane.xlu0 %3315 }
0x1411   :  { %v3320_v4 = vmul.f32 0.03125, %v3316_v50 }
0x1412   :  { %v3323_v51 = vadd.f32 1e-05, %v3321_v49  ;;  %v6651_v49 = vld [vmem:[#allocation26 + $0x2] ss:$0 sm:$0xff] }
0x1413   :  { %v3322_v52 = vadd.f32 1e-05, %v3320_v4 }
0x1414   :  { %8279 = vrsqrt.f32 %v3323_v51 }
0x1415   :  { %8281 = vrsqrt.f32 %v3322_v52  ;;  %v6652_v52 = vld [vmem:[#allocation28 + $0x2] ss:$0 sm:$0xff] }
0x141e   :  { %v8280_v53 = vpop.eup %8279 }
0x141f   :  { %v8282_v57 = vpop.eup %8281  ;;  %v3327_v58 = vmul.f32 %v8280_v53, %v3311_v7 }
0x1420   :  { %v3326_v42 = vmul.f32 %v8282_v57, %v3310_v54 }
0x1421   :  { %v3335_v60 = vmul.f32 %v6643_v56, %v3327_v58 }
0x1422   :  { %v3334_v2 = vmul.f32 %v6643_v56, %v3326_v42  ;;  %v6657_v42 = vld [vmem:[#allocation5 + $0x1] ss:$0 sm:$0xff] }
0x1423   :  { %v3343_v10 = vadd.f32 %v6644_v43, %v3335_v60 }
0x1424   :  { %v3342_v3 = vadd.f32 %v6644_v43, %v3334_v2 }
0x1426   :  { %7323 = vmatprep.mubr.msk.f32.mxu0 %vm352_vm0, %v3342_v3 }
0x1427   :  { %7324 = vmatmul.mubr.msk.f32.vlgmr.msra.gmra.mrb[28].mxu0 %vm352_vm0, %v3343_v10 }
0x1428   :  { %7776 = vmatpush3.bf16.msra.mxu0 %v7773_v15 }
0x14fa   :  { %v7325_v17 = vpop.f32.mrb[28].mxu0 }
0x14fb   :  { %v3433_v18 = vadd.f32 %v7325_v17, %v6645_v16  ;;  %v3427_v19 = vpop.f32.mrb[29].mxu0 }
0x14fc   :  { %v3428_v21 = vadd.f32 %v6645_v16, %v3427_v19 }
0x14fd   :  { %v3437_v23 = vmax.f32 %v3433_v18, 0.0 }
0x14fe   :  { %v3436_v22 = vmax.f32 %v3428_v21, 0.0 }
0x1500   :  { %7342 = vmatprep.mubr.msk.f32.mxu1 %vm3453_vm4, %v3436_v22 }
0x1501   :  { %7343 = vmatmul.mubr.msk.f32.vlgmr.msra.gmra.mrb[24].mxu1 %vm3453_vm4, %v3437_v23 }
0x15d4   :  { %v7344_v25 = vpop.f32.mrb[24].mxu1 }
0x15d5   :  { %v3532_v26 = vadd.f32 %v7344_v25, %v6648_v24  ;;  %v3526_v27 = vpop.f32.mrb[25].mxu1 }
0x15d6   :  { %v3527_v28 = vadd.f32 %v6648_v24, %v3526_v27 }
0x15d7   :  { %v3536_v5 = vadd.f32 %v3532_v26, %v3343_v10 }
0x15d8   :  { %v3535_v29 = vadd.f32 %v3527_v28, %v3342_v3 }
0x15d9   :  { %v3544_v6 = vsel %vm352_vm0, %v3536_v5, 0.0 }
0x15da   :  { %3545 = vadd.xlane.f32.xlu1 %v3544_v6  ;;  %v3541_v7 = vsel %vm352_vm0, %v3535_v29, 0.0 }
0x15db   :  { %3542 = vadd.xlane.f32.xlu0 %v3541_v7 }
0x1667   :  { %v3546_v54 = vpop.xlane.xlu1 %3545 }
0x1668   :  { %v3548_v61 = vmul.f32 0.03125, %v3546_v54  ;;  %v3543_v13 = vpop.xlane.xlu0 %3542 }
0x1669   :  { %v3547_v30 = vmul.f32 0.03125, %v3543_v13 }
0x166a   :  { %v3550_v63 = vsub.f32 %v3536_v5, %v3548_v61 }
0x166b   :  { %v3549_v59 = vsub.f32 %v3535_v29, %v3547_v30 }
0x166c   :  { %v3552_v31 = vmul.f32 %v3550_v63, %v3550_v63 }
0x166d   :  { %v3551_v1 = vmul.f32 %v3549_v59, %v3549_v59 }
0x166e   :  { %v3556_v34 = vsel %vm352_vm0, %v3552_v31, 0.0 }
0x166f   :  { %3557 = vadd.xlane.f32.xlu1 %v3556_v34  ;;  %v3553_v35 = vsel %vm352_vm0, %v3551_v1, 0.0 }
0x1670   :  { %3554 = vadd.xlane.f32.xlu0 %v3553_v35  ;;  %v9766_v35 = vld [vmem:[#allocation2] sm:$0xff] }
0x1680   :  { %3681 = vrot.lane.b32.xlu1 %v9319_v46, %s8840_s6  ;;  %v6656_v46 = vld [vmem:[%s10145_s5 + $0x38] sm:$0xff] }
0x1681   :  { %v7777_v36 = vpack.c.bf16 %v6656_v46, %v6655_v33 }
0x1683   :  { %7778 = vmatprep.subr.bf16.mxu0 %v7777_v36 }
0x1684   :  { %7780 = vmatpush3.bf16.msra.mxu0 %v7777_v36 }
0x1686   :  { %3679 = vrot.lane.b32.xlu0 %v9321_v47, %s8840_s6 }
0x16fc   :  { %v3558_v47 = vpop.xlane.xlu1 %3557 }
0x16fd   :  { %v3560_v32 = vmul.f32 0.03125, %v3558_v47  ;;  %v3555_v37 = vpop.xlane.xlu0 %3554 }
0x16fe   :  { %v3559_v38 = vmul.f32 0.03125, %v3555_v37 }
0x16ff   :  { %v3562_v44 = vadd.f32 1e-05, %v3560_v32 }
0x1700   :  { %v3561_v45 = vadd.f32 1e-05, %v3559_v38  ;;  %v3682_v3 = vpop.permute.xlu1 %3681 }
0x1701   :  { %8283 = vrsqrt.f32 %v3562_v44  ;;  %v3680_v11 = vpop.permute.xlu0 %3679 }
0x1702   :  { %8285 = vrsqrt.f32 %v3561_v45 }
0x170b   :  { %v8284_v48 = vpop.eup %8283 }
0x170c   :  { %v8286_v50 = vpop.eup %8285  ;;  %v3566_v4 = vmul.f32 %v8284_v48, %v3550_v63 }
0x170d   :  { %v3565_v51 = vmul.f32 %v8286_v50, %v3549_v59  ;;  %v9763_v59 = vld [vmem:[#allocation2 + $0x8] sm:$0xff] }
0x170e   :  { %v3574_v53 = vmul.f32 %v6651_v49, %v3566_v4 }
0x170f   :  { %v3573_v56 = vmul.f32 %v6651_v49, %v3565_v51 }
0x1710   :  { %v9715_v58 = vadd.f32 %v6652_v52, %v3574_v53 }
0x1711   :  { %v9713_v57 = vadd.f32 %v6652_v52, %v3573_v56 }
0x1713   :  { %7353 = vmatprep.mubr.msk.f32.mxu0 %vm352_vm0, %v9713_v57 }
0x1714   :  { %7354 = vmatmul.mubr.msk.f32.vlgmr.msra.gmra.mrb[30].mxu0 %vm352_vm0, %v9715_v58 }
0x17e7   :  { %v7355_v43 = vpop.f32.mrb[30].mxu0 }
0x17e8   :  { %v3674_v60 = vadd.f32 %v7355_v43, %v6657_v42  ;;  %v3668_v2 = vpop.f32.mrb[31].mxu0 }
0x17e9   :  { %v3669_v10 = vadd.f32 %v6657_v42, %v3668_v2 }
0x17ea   :  { %v3686_v12 = vadd.f32 %v3682_v3, %v3674_v60 }
0x17eb   :  { %v3685_v40 = vadd.f32 %v3680_v11, %v3669_v10  ;;  %v9721_v16 = vpack.i.bf16 %v3674_v60, %v3669_v10 }
0x17ec   :  { %v9733_v19 = vmul.f32 0.35355338, %v3686_v12 }
0x17ed   :  { %v9723_v17 = vpack.i.bf16 %v3686_v12, %v3685_v40  ;;  %v9725_v18 = vmul.f32 0.35355338, %v3685_v40 }
0x17ef   :  { %8097 = vrot.lane.b32.xlu0 %v9723_v17, %s8835_s9  ;;  %8092 = vrot.lane.b32.xlu1 %v9723_v17, %s8833_s2 }
0x17f0   :  { %7360 = vmatprep.mubr.msk.f32.mxu0 %vm836_vm1, %v9725_v18 }
0x17f3   :  { %3900 = vrot.lane.b32.xlu0 %v9733_v19, %s8834_s11  ;;  %3898 = vrot.lane.b32.xlu1 %v9725_v18, %s8834_s11 }
0x17f7   :  { %4260 = vrot.lane.b32.xlu0 %v9725_v18, %s8837_s14  ;;  %8102 = vrot.lane.b32.xlu1 %v9723_v17, %s8836_s4 }
0x17fb   :  { %4262 = vrot.lane.b32.xlu1 %v9733_v19, %s8837_s14 }
0x1861   :  { %v8098_v21 = vpop.permute.xlu0 %8097  ;;  %v8093_v22 = vpop.permute.xlu1 %8092 }
0x1862   :  { %v8100_v23 = vunpack.i.h.bf16 %v8098_v21  ;;  %v8099_v24 = vunpack.i.l.bf16 %v8098_v21  ;;  %v8095_v25 = vunpack.i.h.bf16 %v8093_v22  ;;  %v8094_v26 = vunpack.i.l.bf16 %v8093_v22 }
0x1864   :  { %v7791_v27 = vpack.c.bf16 %v8100_v23, %v8099_v24  ;;  %v7781_v28 = vpack.c.bf16 %v8095_v25, %v8094_v26 }
0x1865   :  { %v3899_v5 = vpop.permute.xlu1 %3898  ;;  %v3901_v29 = vpop.permute.xlu0 %3900 }
0x1866   :  { %7783 = vmatprep.subr.msk.bf16.mxu0 %vm9363_vm2, %v7781_v28  ;;  %7793 = vmatprep.subr.msk.bf16.mxu1 %vm9363_vm2, %v7791_v27 }
0x1867   :  { %7374 = vmatprep.mubr.msk.f32.mxu1 %vm836_vm1, %v3899_v5  ;;  %7786 = vmatpush3.bf16.xpose.msk.msra.mxu0 %vm9363_vm2, %v7781_v28 }
0x1868   :  { %7796 = vmatpush3.bf16.xpose.msk.msra.mxu1 %vm9363_vm2, %v7791_v27 }
0x1869   :  { %v8103_v6 = vpop.permute.xlu1 %8102  ;;  %v4261_v13 = vpop.permute.xlu0 %4260 }
0x186a   :  { %v8105_v7 = vunpack.i.h.bf16 %v8103_v6  ;;  %v8104_v54 = vunpack.i.l.bf16 %v8103_v6 }
0x186c   :  { %v7801_v61 = vpack.c.bf16 %v8105_v7, %v8104_v54 }
0x186d   :  { %v4263_v30 = vpop.permute.xlu1 %4262 }
0x186e   :  { %7361 = vmatmul.mubr.msk.f32.vlgmr.msra.gmra.mrb[32].mxu0 %vm836_vm1, %v9733_v19  ;;  %7803 = vmatprep.subr.msk.bf16.mxu1 %vm9363_vm2, %v7801_v61 }
0x186f   :  { %7375 = vmatmul.mubr.msk.f32.vlgmr.msra.gmra.mrb[26].mxu1 %vm836_vm1, %v3901_v29 }
0x1870   :  { %7806 = vmatpush3.bf16.xpose.msk.msra.mxu1 %vm9363_vm2, %v7801_v61  ;;  %7398 = vmatprep.mubr.msk.f32.mxu1 %vm836_vm1, %v4261_v13 }
0x1877   :  { %7399 = vmatmul.mubr.msk.f32.vlgmr.msra.gmra.mrb[28].mxu1 %vm836_vm1, %v4263_v30 }
0x1941   :  { %v7362_v63 = vpop.f32.mrb[32].mxu0 }
0x1942   :  { %v3784_v31 = vadd.f32 %v9763_v59, %v7362_v63  ;;  %v7376_v1 = vpop.f32.mrb[26].mxu1  ;;  %v3778_v34 = vpop.f32.mrb[33].mxu0 }
0x1943   :  { %v3779_v0 = vadd.f32 %v9766_v35, %v3778_v34  ;;  %v3980_v14 = vpop.f32.mrb[27].mxu1  ;;  %v3986_v36 = vadd.f32 %v9763_v59, %v7376_v1 }
0x1944   :  { %v3790_v15 = vsel %vm922_vm3, %v3784_v31, -inf  ;;  %v3981_v33 = vadd.f32 %v9766_v35, %v3980_v14 }
0x1945   :  { %3791 = vmax.xlane.f32.xlu1 %v3790_v15  ;;  %v3787_v46 = vsel %vm922_vm3, %v3779_v0, -inf  ;;  %v3992_v38 = vsel %vm922_vm3, %v3986_v36, -inf }
0x1946   :  { %3788 = vmax.xlane.f32.xlu0 %v3787_v46  ;;  %v3989_v47 = vsel %vm922_vm3, %v3981_v33, -inf }
0x194a   :  { %v7400_v32 = vpop.f32.mrb[28].mxu1  ;;  %3990 = vmax.xlane.f32.xlu0 %v3989_v47 }
0x194b   :  { %v4342_v37 = vpop.f32.mrb[29].mxu1  ;;  %v4348_v22 = vadd.f32 %v9763_v59, %v7400_v32 }
0x194c   :  { %v4343_v23 = vadd.f32 %v9766_v35, %v4342_v37 }
0x194d   :  { %v4354_v25 = vsel %vm922_vm3, %v4348_v22, -inf }
0x194e   :  { %3993 = vmax.xlane.f32.xlu0 %v3992_v38  ;;  %v4351_v24 = vsel %vm922_vm3, %v4343_v23, -inf }
0x19d2   :  { %v3792_v44 = vpop.xlane.xlu1 %3791 }
0x19d3   :  { %v3794_v45 = vsub.f32 %v3784_v31, %v3792_v44  ;;  %v3789_v48 = vpop.xlane.xlu0 %3788 }
0x19d4   :  { %v3793_v49 = vsub.f32 %v3779_v0, %v3789_v48 }
0x19d5   :  { %v3797_v50 = vmul.f32 1.442695, %v3794_v45 }
0x19d6   :  { %v3795_v4 = vmul.f32 1.442695, %v3793_v49 }
0x19d7   :  { %8287 = vpow2.f32 %v3797_v50  ;;  %v3991_v51 = vpop.xlane.xlu0 %3990 }
0x19d8   :  { %8289 = vpow2.f32 %v3795_v4  ;;  %v3995_v52 = vsub.f32 %v3981_v33, %v3991_v51 }
0x19da   :  { %v3997_v53 = vmul.f32 1.442695, %v3995_v52 }
0x19db   :  { %v3994_v56 = vpop.xlane.xlu0 %3993 }
0x19dc   :  { %8291 = vpow2.f32 %v3997_v53  ;;  %v3996_v42 = vsub.f32 %v3986_v36, %v3994_v56  ;;  %v6661_v53 = vld [vmem:[%s10150_s19 + $0x28] sm:$0xff]  ;;  %v6660_v56 = vld [vmem:[%s10150_s19 + $0x20] sm:$0xff] }
0x19de   :  { %v3999_v43 = vmul.f32 1.442695, %v3996_v42 }
0x19e0   :  { %8293 = vpow2.f32 %v3999_v43 }
0x19e1   :  { %v8288_v60 = vpop.eup %8287 }
0x19e2   :  { %v8290_v2 = vpop.eup %8289  ;;  %v3802_v3 = vsel %vm922_vm3, %v8288_v60, 0.0 }
0x19e3   :  { %3803 = vadd.xlane.f32.xlu0 %v3802_v3  ;;  %v3799_v10 = vsel %vm922_vm3, %v8290_v2, 0.0 }
0x19e4   :  { %3800 = vadd.xlane.f32.xlu1 %v3799_v10 }
0x19e6   :  { %v8292_v11 = vpop.eup %8291 }
0x19e7   :  { %v4001_v12 = vsel %vm922_vm3, %v8292_v11, 0.0 }
0x19e8   :  { %4002 = vadd.xlane.f32.xlu1 %v4001_v12 }
0x19ea   :  { %v8294_v40 = vpop.eup %8293 }
0x19eb   :  { %v4004_v21 = vsel %vm922_vm3, %v8294_v40, 0.0 }
0x19ec   :  { %4005 = vadd.xlane.f32.xlu0 %v4004_v21 }
0x19f9   :  { %8107 = vrot.lane.b32.xlu1 %v9721_v16, %s8840_s6 }
0x19fd   :  { %8117 = vrot.lane.b32.xlu1 %v9723_v17, %s8839_s18 }
0x1a01   :  { %4543 = vrot.lane.b32.xlu1 %v9725_v18, %s8841_s0 }
0x1a02   :  { %8112 = vrot.lane.b32.xlu0 %v9721_v16, %s8838_s23 }
0x1a06   :  { %4545 = vrot.lane.b32.xlu0 %v9733_v19, %s8841_s0 }
0x1a25   :  { %4352 = vmax.xlane.f32.xlu1 %v4351_v24  ;;  %4355 = vmax.xlane.f32.xlu0 %v4354_v25 }
0x1a70   :  { %v3804_v17 = vpop.xlane.xlu0 %3803 }
0x1a71   :  { %v3801_v26 = vpop.xlane.xlu1 %3800 }
0x1a72   :  { %8295 = vrcp.f32 %v3801_v26 }
0x1a73   :  { %8297 = vrcp.f32 %v3804_v17 }
0x1a75   :  { %v4003_v18 = vpop.xlane.xlu1 %4002 }
0x1a76   :  { %8299 = vrcp.f32 %v4003_v18 }
0x1a79   :  { %v8108_v27 = vpop.permute.xlu1 %8107  ;;  %v4006_v28 = vpop.xlane.xlu0 %4005 }
0x1a7a   :  { %v8110_v5 = vunpack.i.h.bf16 %v8108_v27  ;;  %v8109_v19 = vunpack.i.l.bf16 %v8108_v27  ;;  %8301 = vrcp.f32 %v4006_v28 }
0x1a7c   :  { %v8296_v29 = vpop.eup %8295  ;;  %v7787_v6 = vpack.c.bf16 %v8110_v5, %v8109_v19 }
0x1a7d   :  { %v8298_v7 = vpop.eup %8297  ;;  %v8118_v54 = vpop.permute.xlu1 %8117  ;;  %v3807_v13 = vmul.f32 %v8296_v29, %v8290_v2 }
0x1a7e   :  { %v8113_v61 = vpop.permute.xlu0 %8112  ;;  %v8120_v30 = vunpack.i.h.bf16 %v8118_v54  ;;  %v8119_v63 = vunpack.i.l.bf16 %v8118_v54  ;;  %7788 = vmatprep.subr.bf16.mxu0 %v7787_v6  ;;  %v3808_v0 = vmul.f32 %v8298_v7, %v8288_v60 }
0x1a7f   :  { %v8115_v31 = vunpack.i.h.bf16 %v8113_v61  ;;  %v8114_v1 = vunpack.i.l.bf16 %v8113_v61  ;;  %7790 = vmatpush3.bf16.msra.mxu0 %v7787_v6  ;;  %7367 = vmatprep.mubr.msk.f32.mxu0 %vm922_vm3, %v3807_v13 }
0x1a80   :  { %v8300_v34 = vpop.eup %8299  ;;  %v7811_v14 = vpack.c.bf16 %v8120_v30, %v8119_v63 }
0x1a81   :  { %v7797_v15 = vpack.c.bf16 %v8115_v31, %v8114_v1  ;;  %v4544_v33 = vpop.permute.xlu1 %4543  ;;  %v4009_v46 = vmul.f32 %v8300_v34, %v8292_v11 }
0x1a82   :  { %7368 = vmatmul.mubr.msk.f32.vlgmr.msra.gmra.mrb[34].mxu0 %vm922_vm3, %v3808_v0  ;;  %7813 = vmatprep.subr.msk.bf16.mxu1 %vm9363_vm2, %v7811_v14  ;;  %v4546_v32 = vpop.permute.xlu0 %4545 }
0x1a83   :  { %7798 = vmatprep.subr.bf16.mxu0 %v7797_v15  ;;  %7417 = vmatprep.mubr.msk.f32.mxu1 %vm836_vm1, %v4544_v33 }
0x1a84   :  { %v8302_v36 = vpop.eup %8301  ;;  %7800 = vmatpush3.bf16.msra.mxu0 %v7797_v15  ;;  %7381 = vmatprep.mubr.msk.f32.mxu0 %vm922_vm3, %v4009_v46 }
0x1a85   :  { %v4010_v47 = vmul.f32 %v8302_v36, %v8294_v40  ;;  %7816 = vmatpush3.bf16.xpose.msk.msra.mxu1 %vm9363_vm2, %v7811_v14  ;;  %7384 = vmatprep.subr.mxu0 %v6661_v53  ;;  %v6663_v36 = vld [vmem:[%s10150_s19 + $0x38] sm:$0xff] }
0x1a87   :  { %7382 = vmatmul.mubr.msk.f32.vlgmr.msra.gmra.mrb[36].mxu0 %vm922_vm3, %v4010_v47 }
0x1a88   :  { %7385 = vmatpush3.msra.mxu0 %v6661_v53 }
0x1a89   :  { %7389 = vmatprep.subr.mxu0 %v6660_v56 }
0x1a8c   :  { %7418 = vmatmul.mubr.msk.f32.vlgmr.msra.gmra.mrb[30].mxu1 %vm836_vm1, %v4546_v32 }
0x1ab2   :  { %v4353_v37 = vpop.xlane.xlu1 %4352  ;;  %v4356_v38 = vpop.xlane.xlu0 %4355 }
0x1ab3   :  { %v4357_v44 = vsub.f32 %v4343_v23, %v4353_v37  ;;  %v4358_v45 = vsub.f32 %v4348_v22, %v4356_v38 }
0x1ab5   :  { %v4359_v48 = vmul.f32 1.442695, %v4357_v44  ;;  %v4361_v49 = vmul.f32 1.442695, %v4358_v45  ;;  %v6696_v45 = vld [vmem:[#allocation7 + $0x1] ss:$0 sm:$0xff] }
0x1ab7   :  { %8303 = vpow2.f32 %v4359_v48 }
0x1ab8   :  { %8305 = vpow2.f32 %v4361_v49 }
0x1ac1   :  { %v8304_v50 = vpop.eup %8303 }
0x1ac2   :  { %v8306_v4 = vpop.eup %8305  ;;  %v4363_v51 = vsel %vm922_vm3, %v8304_v50, 0.0 }
0x1ac3   :  { %4364 = vadd.xlane.f32.xlu0 %v4363_v51  ;;  %v4366_v52 = vsel %vm922_vm3, %v8306_v4, 0.0 }
0x1ac4   :  { %4367 = vadd.xlane.f32.xlu1 %v4366_v52 }
0x1ad9   :  { %8122 = vrot.lane.b32.xlu0 %v9721_v16, %s8842_s26 }
0x1b50   :  { %v4365_v42 = vpop.xlane.xlu0 %4364 }
0x1b51   :  { %v4368_v3 = vpop.xlane.xlu1 %4367  ;;  %8307 = vrcp.f32 %v4365_v42 }
0x1b52   :  { %8309 = vrcp.f32 %v4368_v3 }
0x1b54   :  { %v8123_v60 = vpop.permute.xlu0 %8122 }
0x1b55   :  { %v7369_v43 = vpop.f32.mrb[34].mxu0  ;;  %v8125_v10 = vunpack.i.h.bf16 %v8123_v60  ;;  %v8124_v11 = vunpack.i.l.bf16 %v8123_v60 }
0x1b56   :  { %v3889_v2 = vpop.f32.mrb[35].mxu0 }
0x1b57   :  { %v7807_v21 = vpack.c.bf16 %v8125_v10, %v8124_v11 }
0x1b5a   :  { %v7383_v12 = vpop.f32.mrb[36].mxu0 }
0x1b5b   :  { %v4089_v40 = vpop.f32.mrb[37].mxu0  ;;  %v8308_v24 = vpop.eup %8307 }
0x1b5c   :  { %7386 = vmatprep.mubr.msk.f32.mxu0 %vm836_vm1, %v4089_v40  ;;  %v8310_v18 = vpop.eup %8309  ;;  %v4371_v27 = vmul.f32 %v8308_v24, %v8304_v50  ;;  %v6699_v40 = vld [vmem:[%s10149_s22 + $0x20] sm:$0xff]  ;;  %v6702_v24 = vld [vmem:[%s10149_s22 + $0x38] sm:$0xff] }
0x1b5d   :  { %7387 = vmatmul.mubr.msk.f32.vlgmr.msra.gmra.mrb[38].mxu0 %vm836_vm1, %v7383_v12  ;;  %v4372_v28 = vmul.f32 %v8310_v18, %v8306_v4 }
0x1b5e   :  { %7390 = vmatpush3.msra.mxu0 %v6660_v56  ;;  %7391 = vmatprep.mubr.msk.f32.mxu0 %vm836_vm1, %v3889_v2 }
0x1b5f   :  { %v7419_v22 = vpop.f32.mrb[30].mxu1  ;;  %7808 = vmatprep.subr.bf16.mxu0 %v7807_v21 }
0x1b60   :  { %v4625_v23 = vpop.f32.mrb[31].mxu1  ;;  %v4631_v17 = vadd.f32 %v9763_v59, %v7419_v22  ;;  %v6662_v59 = vld [vmem:[%s10150_s19 + $0x30] sm:$0xff]  ;;  %s10153_s19 = sld [smem:[#allocation57_spill]] }
0x1b61   :  { %v4626_v25 = vadd.f32 %v9766_v35, %v4625_v23  ;;  %v6701_v23 = vld [vmem:[%s10149_s22 + $0x30] sm:$0xff] }
0x1b62   :  { %v4637_v5 = vsel %vm922_vm3, %v4631_v17, -inf }
0x1b63   :  { %v4634_v26 = vsel %vm922_vm3, %v4626_v25, -inf }
0x1b64   :  { %4635 = vmax.xlane.f32.xlu1 %v4634_v26 }
0x1b65   :  { %7392 = vmatmul.mubr.msk.f32.vlgmr.msra.gmra.mrb[38].mxu0 %vm836_vm1, %v7369_v43 }
0x1b66   :  { %7810 = vmatpush3.bf16.msra.mxu0 %v7807_v21  ;;  %7405 = vmatprep.mubr.msk.f32.mxu0 %vm922_vm3, %v4371_v27  ;;  %v6700_v21 = vld [vmem:[%s10149_s22 + $0x28] sm:$0xff] }
0x1b67   :  { %7408 = vmatprep.subr.mxu0 %v6662_v59  ;;  %v7821_v22 = vpack.c.bf16 %v6700_v21, %v6699_v40 }
0x1b68   :  { %4638 = vmax.xlane.f32.xlu1 %v4637_v5 }
0x1b69   :  { %7406 = vmatmul.mubr.msk.f32.vlgmr.msra.gmra.mrb[40].mxu0 %vm922_vm3, %v4372_v28  ;;  %7822 = vmatprep.subr.bf16.mxu1 %v7821_v22 }
0x1b6a   :  { %7409 = vmatpush3.msra.mxu0 %v6662_v59  ;;  %7824 = vmatpush3.bf16.msra.mxu1 %v7821_v22 }
0x1bf1   :  { %v4636_v35 = vpop.xlane.xlu1 %4635 }
0x1bf2   :  { %v4640_v19 = vsub.f32 %v4626_v25, %v4636_v35  ;;  %v7825_v25 = vpack.c.bf16 %v6702_v24, %v6701_v23 }
0x1bf4   :  { %v4642_v7 = vmul.f32 1.442695, %v4640_v19  ;;  %7826 = vmatprep.subr.bf16.mxu1 %v7825_v25 }
0x1bf5   :  { %v4639_v29 = vpop.xlane.xlu1 %4638  ;;  %7828 = vmatpush3.bf16.msra.mxu1 %v7825_v25 }
0x1bf6   :  { %v4641_v6 = vsub.f32 %v4631_v17, %v4639_v29 }
0x1bf8   :  { %v4644_v54 = vmul.f32 1.442695, %v4641_v6 }
0x1bfa   :  { %8311 = vpow2.f32 %v4644_v54 }
0x1bfb   :  { %8313 = vpow2.f32 %v4642_v7 }
0x1c04   :  { %v8312_v61 = vpop.eup %8311 }
0x1c05   :  { %v4649_v13 = vsel %vm922_vm3, %v8312_v61, 0.0  ;;  %v8314_v30 = vpop.eup %8313 }
0x1c06   :  { %4650 = vadd.xlane.f32.xlu1 %v4649_v13  ;;  %v4646_v63 = vsel %vm922_vm3, %v8314_v30, 0.0 }
0x1c0a   :  { %4647 = vadd.xlane.f32.xlu1 %v4646_v63 }
0x1c1b   :  { %8127 = vrot.lane.b32.xlu1 %v9721_v16, %s8843_s10 }
0x1c3c   :  { %v7407_v31 = vpop.f32.mrb[40].mxu0 }
0x1c3d   :  { %v4451_v1 = vpop.f32.mrb[41].mxu0 }
0x1c3e   :  { %7410 = vmatprep.mubr.msk.f32.mxu0 %vm836_vm1, %v4451_v1 }
0x1c3f   :  { %7411 = vmatmul.mubr.msk.f32.vlgmr.msra.gmra.mrb[38].mxu0 %vm836_vm1, %v7407_v31 }
0x1c93   :  { %v4651_v34 = vpop.xlane.xlu1 %4650 }
0x1c94   :  { %8315 = vrcp.f32 %v4651_v34 }
0x1c97   :  { %v4648_v0 = vpop.xlane.xlu1 %4647 }
0x1c98   :  { %8317 = vrcp.f32 %v4648_v0 }
0x1c9b   :  { %v8128_v14 = vpop.permute.xlu1 %8127 }
0x1c9c   :  { %v8130_v15 = vunpack.i.h.bf16 %v8128_v14  ;;  %v8129_v33 = vunpack.i.l.bf16 %v8128_v14 }
0x1c9e   :  { %v7817_v46 = vpack.c.bf16 %v8130_v15, %v8129_v33  ;;  %v8316_v16 = vpop.eup %8315  ;;  %v6703_v33 = vld [vmem:[#allocation10 + $0x1] ss:$0 sm:$0xff] }
0x1c9f   :  { %v4655_v37 = vmul.f32 %v8316_v16, %v8312_v61  ;;  %v6697_v61 = vld [vmem:[#allocation26 + $0x3] ss:$0 sm:$0xff] }
0x1ca0   :  { %7818 = vmatprep.subr.bf16.mxu0 %v7817_v46 }
0x1ca1   :  { %7820 = vmatpush3.bf16.msra.mxu0 %v7817_v46 }
0x1ca2   :  { %v8318_v47 = vpop.eup %8317  ;;  %7427 = vmatprep.subr.mxu0 %v6663_v36 }
0x1ca3   :  { %v4654_v32 = vmul.f32 %v8318_v47, %v8314_v30  ;;  %v6698_v30 = vld [vmem:[#allocation28 + $0x3] ss:$0 sm:$0xff] }
0x1ca5   :  { %7424 = vmatprep.mubr.msk.f32.mxu0 %vm922_vm3, %v4654_v32 }
0x1ca6   :  { %7425 = vmatmul.mubr.msk.f32.vlgmr.msra.gmra.mrb[42].mxu0 %vm922_vm3, %v4655_v37 }
0x1ca7   :  { %7428 = vmatpush3.msra.mxu0 %v6663_v36 }
0x1d79   :  { %v7426_v38 = vpop.f32.mrb[42].mxu0 }
0x1d7a   :  { %v4734_v44 = vpop.f32.mrb[43].mxu0 }
0x1d7b   :  { %7429 = vmatprep.mubr.msk.f32.mxu0 %vm836_vm1, %v4734_v44 }
0x1d7c   :  { %7430 = vmatmul.mubr.msk.f32.vlgmr.msra.gmra.mrb[38].mxu0 %vm836_vm1, %v7426_v38 }
0x1e4f   :  { %v7431_v48 = vpop.f32.mrb[38].mxu0 }
0x1e50   :  { %v4833_v49 = vadd.f32 %v7431_v48, %v6696_v45  ;;  %v4815_v50 = vpop.f32.mrb[39].mxu0 }
0x1e51   :  { %v4832_v4 = vadd.f32 %v6696_v45, %v4815_v50 }
0x1e52   :  { %v4835_v51 = vadd.f32 %v4833_v49, %v9715_v58  ;;  %v9892_v49 = vld [vmem:[%s10151_s29 + $0x8] sm:$0xff] }
0x1e53   :  { %v4834_v52 = vadd.f32 %v4832_v4, %v9713_v57 }
0x1e54   :  { %v4843_v53 = vsel %vm352_vm0, %v4835_v51, 0.0 }
0x1e55   :  { %4844 = vadd.xlane.f32.xlu1 %v4843_v53  ;;  %v4840_v56 = vsel %vm352_vm0, %v4834_v52, 0.0 }
0x1e56   :  { %4841 = vadd.xlane.f32.xlu0 %v4840_v56 }
0x1e66   :  { %8137 = vrot.lane.b32.xlu1 %v9329_v62, %s8833_s2 }
0x1ee2   :  { %v4845_v42 = vpop.xlane.xlu1 %4844 }
0x1ee3   :  { %v4847_v43 = vmul.f32 0.03125, %v4845_v42  ;;  %v4842_v60 = vpop.xlane.xlu0 %4841 }
0x1ee4   :  { %v4846_v2 = vmul.f32 0.03125, %v4842_v60 }
0x1ee5   :  { %v4849_v3 = vsub.f32 %v4835_v51, %v4847_v43  ;;  %v9898_v51 = vld [vmem:[%s10151_s29] sm:$0xff] }
0x1ee6   :  { %v4848_v10 = vsub.f32 %v4834_v52, %v4846_v2  ;;  %v8138_v27 = vpop.permute.xlu1 %8137 }
0x1ee7   :  { %v4851_v12 = vmul.f32 %v4849_v3, %v4849_v3  ;;  %v8140_v59 = vunpack.i.h.bf16 %v8138_v27  ;;  %v8139_v19 = vunpack.i.l.bf16 %v8138_v27 }
0x1ee8   :  { %v4850_v11 = vmul.f32 %v4848_v10, %v4848_v10 }
0x1ee9   :  { %v4855_v57 = vsel %vm352_vm0, %v4851_v12, 0.0  ;;  %v7835_v54 = vpack.c.bf16 %v8140_v59, %v8139_v19 }
0x1eea   :  { %v4852_v58 = vsel %vm352_vm0, %v4850_v11, 0.0 }
0x1eeb   :  { %4853 = vadd.xlane.f32.xlu0 %v4852_v58 }
0x1eef   :  { %4856 = vadd.xlane.f32.xlu0 %v4855_v57 }
0x1f05   :  { %8132 = vrot.lane.b32.xlu0 %v9325_v55, %s8833_s2 }
0x1f09   :  { %4978 = vrot.lane.b32.xlu0 %v9359_v9, %s8833_s2 }
0x1f0d   :  { %4980 = vrot.lane.b32.xlu0 %v9357_v8, %s8833_s2 }
0x1f78   :  { %v4854_v17 = vpop.xlane.xlu0 %4853 }
0x1f79   :  { %v4858_v26 = vmul.f32 0.03125, %v4854_v17 }
0x1f7b   :  { %v4860_v18 = vadd.f32 1e-05, %v4858_v26 }
0x1f7c   :  { %v4857_v9 = vpop.xlane.xlu0 %4856 }
0x1f7d   :  { %8319 = vrsqrt.f32 %v4860_v18  ;;  %v4859_v28 = vmul.f32 0.03125, %v4857_v9 }
0x1f7f   :  { %v4861_v5 = vadd.f32 1e-05, %v4859_v28 }
0x1f80   :  { %v8133_v35 = vpop.permute.xlu0 %8132 }
0x1f81   :  { %8321 = vrsqrt.f32 %v4861_v5  ;;  %v8135_v29 = vunpack.i.h.bf16 %v8133_v35  ;;  %v8134_v6 = vunpack.i.l.bf16 %v8133_v35 }
0x1f83   :  { %v7829_v7 = vpack.c.bf16 %v8135_v29, %v8134_v6 }
0x1f84   :  { %v4979_v15 = vpop.permute.xlu0 %4978 }
0x1f85   :  { %7831 = vmatprep.subr.msk.bf16.mxu0 %vm9363_vm2, %v7829_v7 }
0x1f86   :  { %7834 = vmatpush3.bf16.xpose.msk.msra.mxu0 %vm9363_vm2, %v7829_v7 }
0x1f87   :  { %v8320_v8 = vpop.eup %8319  ;;  %7837 = vmatprep.subr.msk.bf16.mxu0 %vm9363_vm2, %v7835_v54 }
0x1f88   :  { %v4864_v13 = vmul.f32 %v8320_v8, %v4848_v10  ;;  %v4981_v47 = vpop.permute.xlu0 %4980 }
0x1f8a   :  { %v4872_v63 = vmul.f32 %v6697_v61, %v4864_v13 }
0x1f8b   :  { %v8322_v31 = vpop.eup %8321 }
0x1f8c   :  { %v4865_v1 = vmul.f32 %v8322_v31, %v4849_v3  ;;  %v9871_v34 = vadd.f32 %v6698_v30, %v4872_v63 }
0x1f8e   :  { %v4873_v0 = vmul.f32 %v6697_v61, %v4865_v1  ;;  %7440 = vmatprep.mubr.msk.f32.mxu1 %vm352_vm0, %v9871_v34  ;;  %7840 = vmatpush3.bf16.xpose.msk.msra.mxu0 %vm9363_vm2, %v7835_v54 }
0x1f90   :  { %v9877_v14 = vadd.f32 %v6698_v30, %v4873_v0 }
0x1f92   :  { %7441 = vmatmul.mubr.msk.f32.vlgmr.msra.gmra.mrb[32].mxu1 %vm352_vm0, %v9877_v14 }
0x2065   :  { %v7442_v46 = vpop.f32.mrb[32].mxu1 }
0x2066   :  { %v4973_v36 = vadd.f32 %v7442_v46, %v6703_v33  ;;  %v4967_v16 = vpop.f32.mrb[33].mxu1 }
0x2067   :  { %v4968_v32 = vadd.f32 %v6703_v33, %v4967_v16 }
0x2068   :  { %v4985_v37 = vadd.f32 %v4981_v47, %v4973_v36 }
0x2069   :  { %v4984_v38 = vadd.f32 %v4979_v15, %v4968_v32 }
0x206a   :  { %v9883_v45 = vmul.f32 0.35355338, %v4985_v37 }
0x206b   :  { %v9881_v44 = vmul.f32 0.35355338, %v4984_v38 }
0x206d   :  { %7451 = vmatprep.mubr.msk.f32.mxu0 %vm836_vm1, %v9881_v44 }
0x206e   :  { %7452 = vmatmul.mubr.msk.f32.vlgmr.msra.gmra.mrb[44].mxu0 %vm836_vm1, %v9883_v45 }
0x2141   :  { %v7453_v48 = vpop.f32.mrb[44].mxu0 }
0x2142   :  { %v5089_v50 = vadd.f32 %v9892_v49, %v7453_v48  ;;  %v5083_v4 = vpop.f32.mrb[45].mxu0 }
0x2143   :  { %v5084_v52 = vadd.f32 %v9898_v51, %v5083_v4 }
0x2144   :  { %v5095_v53 = vsel %vm352_vm0, %v5089_v50, -inf }
0x2145   :  { %5096 = vmax.xlane.f32.xlu0 %v5095_v53  ;;  %v5092_v56 = vsel %vm352_vm0, %v5084_v52, -inf }
0x2146   :  { %5093 = vmax.xlane.f32.xlu1 %v5092_v56 }
0x21d2   :  { %v5097_v42 = vpop.xlane.xlu0 %5096 }
0x21d3   :  { %v5099_v43 = vsub.f32 %v5089_v50, %v5097_v42  ;;  %v5094_v60 = vpop.xlane.xlu1 %5093 }
0x21d4   :  { %v5098_v2 = vsub.f32 %v5084_v52, %v5094_v60 }
0x21d5   :  { %v5102_v3 = vmul.f32 1.442695, %v5099_v43 }
0x21d6   :  { %v5100_v10 = vmul.f32 1.442695, %v5098_v2 }
0x21d7   :  { %8323 = vpow2.f32 %v5102_v3 }
0x21d8   :  { %8325 = vpow2.f32 %v5100_v10 }
0x21e1   :  { %v8324_v11 = vpop.eup %8323 }
0x21e2   :  { %v8326_v58 = vpop.eup %8325  ;;  %v5107_v12 = vsel %vm352_vm0, %v8324_v11, 0.0 }
0x21e3   :  { %5108 = vadd.xlane.f32.xlu1 %v5107_v12  ;;  %v5104_v57 = vsel %vm352_vm0, %v8326_v58, 0.0 }
0x21e4   :  { %5105 = vadd.xlane.f32.xlu0 %v5104_v57 }
0x21f4   :  { %8147 = vrot.lane.b32.xlu1 %v9391_v41, %s8833_s2 }
0x21f8   :  { %8152 = vrot.lane.b32.xlu1 %v9325_v55, %s8835_s9 }
0x21fa   :  { %8142 = vrot.lane.b32.xlu0 %v9387_v39, %s8833_s2 }
0x21fc   :  { %5207 = vrot.lane.b32.xlu1 %v9881_v44, %s8834_s11 }
0x21fe   :  { %8157 = vrot.lane.b32.xlu0 %v9329_v62, %s8835_s9 }
0x2200   :  { %8162 = vrot.lane.b32.xlu1 %v9325_v55, %s8836_s4 }
0x2202   :  { %5209 = vrot.lane.b32.xlu0 %v9883_v45, %s8834_s11 }
0x2204   :  { %5583 = vrot.lane.b32.xlu1 %v9881_v44, %s8837_s14 }
0x2206   :  { %8167 = vrot.lane.b32.xlu0 %v9329_v62, %s8836_s4 }
0x220a   :  { %5585 = vrot.lane.b32.xlu0 %v9883_v45, %s8837_s14 }
0x2270   :  { %v5109_v40 = vpop.xlane.xlu1 %5108 }
0x2271   :  { %v5106_v21 = vpop.xlane.xlu0 %5105 }
0x2272   :  { %8327 = vrcp.f32 %v5106_v21 }
0x2273   :  { %8329 = vrcp.f32 %v5109_v40 }
0x2274   :  { %v8148_v22 = vpop.permute.xlu1 %8147 }
0x2275   :  { %v8143_v23 = vpop.permute.xlu0 %8142  ;;  %v8150_v24 = vunpack.i.h.bf16 %v8148_v22  ;;  %v8149_v25 = vunpack.i.l.bf16 %v8148_v22 }
0x2276   :  { %v8145_v17 = vunpack.i.h.bf16 %v8143_v23  ;;  %v8144_v26 = vunpack.i.l.bf16 %v8143_v23 }
0x2277   :  { %v7845_v27 = vpack.c.bf16 %v8150_v24, %v8149_v25 }
0x2278   :  { %v7841_v18 = vpack.c.bf16 %v8145_v17, %v8144_v26  ;;  %v8153_v9 = vpop.permute.xlu1 %8152 }
0x2279   :  { %v8155_v28 = vunpack.i.h.bf16 %v8153_v9  ;;  %v8154_v5 = vunpack.i.l.bf16 %v8153_v9  ;;  %v8158_v7 = vpop.permute.xlu0 %8157 }
0x227a   :  { %7842 = vmatprep.subr.bf16.mxu1 %v7841_v18  ;;  %v8160_v8 = vunpack.i.h.bf16 %v8158_v7  ;;  %v8159_v61 = vunpack.i.l.bf16 %v8158_v7 }
0x227b   :  { %7844 = vmatpush3.bf16.msra.mxu1 %v7841_v18  ;;  %v7849_v29 = vpack.c.bf16 %v8155_v28, %v8154_v5 }
0x227c   :  { %v8328_v59 = vpop.eup %8327  ;;  %7846 = vmatprep.subr.bf16.mxu1 %v7845_v27  ;;  %v5208_v54 = vpop.permute.xlu1 %5207  ;;  %v7855_v13 = vpack.c.bf16 %v8160_v8, %v8159_v61 }
0x227d   :  { %v8330_v35 = vpop.eup %8329  ;;  %v5112_v19 = vmul.f32 %v8328_v59, %v8326_v58  ;;  %v5210_v63 = vpop.permute.xlu0 %5209 }
0x227e   :  { %v5113_v6 = vmul.f32 %v8330_v35, %v8324_v11 }
0x227f   :  { %7848 = vmatpush3.bf16.msra.mxu1 %v7845_v27  ;;  %7462 = vmatprep.mubr.msk.f32.mxu1 %vm352_vm0, %v5112_v19 }
0x2280   :  { %7851 = vmatprep.subr.msk.bf16.mxu1 %vm9363_vm2, %v7849_v29  ;;  %v8163_v30 = vpop.permute.xlu1 %8162 }
0x2281   :  { %v8165_v31 = vunpack.i.h.bf16 %v8163_v30  ;;  %v8164_v1 = vunpack.i.l.bf16 %v8163_v30  ;;  %v8168_v15 = vpop.permute.xlu0 %8167 }
0x2282   :  { %7463 = vmatmul.mubr.msk.f32.vlgmr.msra.gmra.mrb[34].mxu1 %vm352_vm0, %v5113_v6  ;;  %v8170_v33 = vunpack.i.h.bf16 %v8168_v15  ;;  %v8169_v46 = vunpack.i.l.bf16 %v8168_v15 }
0x2283   :  { %7473 = vmatprep.mubr.msk.f32.mxu1 %vm836_vm1, %v5208_v54  ;;  %v7869_v0 = vpack.c.bf16 %v8165_v31, %v8164_v1 }
0x2284   :  { %v7875_v36 = vpack.c.bf16 %v8170_v33, %v8169_v46  ;;  %v5584_v16 = vpop.permute.xlu1 %5583 }
0x2285   :  { %v5586_v47 = vpop.permute.xlu0 %5585 }
0x2288   :  { %7854 = vmatpush3.bf16.xpose.msk.msra.mxu1 %vm9363_vm2, %v7849_v29 }
0x2289   :  { %7857 = vmatprep.subr.msk.bf16.mxu1 %vm9363_vm2, %v7855_v13 }
0x2290   :  { %7860 = vmatpush3.bf16.xpose.msk.msra.mxu1 %vm9363_vm2, %v7855_v13 }
0x2291   :  { %7871 = vmatprep.subr.msk.bf16.mxu1 %vm9363_vm2, %v7869_v0 }
0x2297   :  { %7474 = vmatmul.mubr.msk.f32.vlgmr.msra.gmra.mrb[36].mxu1 %vm836_vm1, %v5210_v63 }
0x2298   :  { %7874 = vmatpush3.bf16.xpose.msk.msra.mxu1 %vm9363_vm2, %v7869_v0  ;;  %7505 = vmatprep.mubr.msk.f32.mxu1 %vm836_vm1, %v5584_v16 }
0x2299   :  { %7877 = vmatprep.subr.msk.bf16.mxu1 %vm9363_vm2, %v7875_v36 }
0x22a0   :  { %7880 = vmatpush3.bf16.xpose.msk.msra.mxu1 %vm9363_vm2, %v7875_v36 }
0x22a7   :  { %7506 = vmatmul.mubr.msk.f32.vlgmr.msra.gmra.mrb[38].mxu1 %vm836_vm1, %v5586_v47 }
0x2355   :  { %v9947_v32 = vpop.f32.mrb[34].mxu1 }
0x2356   :  { %v9949_v37 = vpop.f32.mrb[35].mxu1 }
0x236a   :  { %v7475_v38 = vpop.f32.mrb[36].mxu1 }
0x236b   :  { %v5303_v48 = vadd.f32 %v9892_v49, %v7475_v38  ;;  %v5297_v50 = vpop.f32.mrb[37].mxu1 }
0x236c   :  { %v5298_v4 = vadd.f32 %v9898_v51, %v5297_v50 }
0x236d   :  { %v5309_v52 = vsel %vm352_vm0, %v5303_v48, -inf }
0x236e   :  { %5310 = vmax.xlane.f32.xlu0 %v5309_v52  ;;  %v5306_v53 = vsel %vm352_vm0, %v5298_v4, -inf }
0x236f   :  { %5307 = vmax.xlane.f32.xlu1 %v5306_v53 }
0x237a   :  { %v7507_v56 = vpop.f32.mrb[38].mxu1 }
0x237b   :  { %v5673_v42 = vpop.f32.mrb[39].mxu1  ;;  %v5679_v22 = vadd.f32 %v9892_v49, %v7507_v56 }
0x237c   :  { %v5674_v21 = vadd.f32 %v9898_v51, %v5673_v42 }
0x237e   :  { %v5682_v23 = vsel %vm352_vm0, %v5674_v21, -inf }
0x23fb   :  { %v5311_v43 = vpop.xlane.xlu0 %5310 }
0x23fc   :  { %v5313_v60 = vsub.f32 %v5303_v48, %v5311_v43  ;;  %v5308_v2 = vpop.xlane.xlu1 %5307  ;;  %v4987_v48 = vld [vmem:[#allocation19 + $0x20] sm:$0xff] }
0x23fd   :  { %v5312_v3 = vsub.f32 %v5298_v4, %v5308_v2 }
0x23fe   :  { %v5316_v10 = vmul.f32 1.442695, %v5313_v60 }
0x23ff   :  { %v5314_v11 = vmul.f32 1.442695, %v5312_v3 }
0x2400   :  { %8331 = vpow2.f32 %v5316_v10 }
0x2401   :  { %8333 = vpow2.f32 %v5314_v11 }
0x240a   :  { %v8332_v58 = vpop.eup %8331 }
0x240b   :  { %v8334_v12 = vpop.eup %8333  ;;  %v5321_v57 = vsel %vm352_vm0, %v8332_v58, 0.0 }
0x240c   :  { %5322 = vadd.xlane.f32.xlu1 %v5321_v57  ;;  %v5318_v40 = vsel %vm352_vm0, %v8334_v12, 0.0 }
0x240d   :  { %5319 = vadd.xlane.f32.xlu0 %v5318_v40 }
0x241d   :  { %8177 = vrot.lane.b32.xlu1 %v9391_v41, %s8835_s9 }
0x2421   :  { %8182 = vrot.lane.b32.xlu1 %v9325_v55, %s8839_s18  ;;  %v5685_v55 = vsel %vm352_vm0, %v5679_v22, -inf }
0x2423   :  { %8172 = vrot.lane.b32.xlu0 %v9387_v39, %s8835_s9 }
0x2425   :  { %5880 = vrot.lane.b32.xlu1 %v9881_v44, %s8841_s0 }
0x2427   :  { %8187 = vrot.lane.b32.xlu0 %v9329_v62, %s8839_s18 }
0x242b   :  { %5882 = vrot.lane.b32.xlu0 %v9883_v45, %s8841_s0 }
0x2449   :  { %5683 = vmax.xlane.f32.xlu1 %v5682_v23 }
0x244a   :  { %5686 = vmax.xlane.f32.xlu0 %v5685_v55 }
0x2499   :  { %v5323_v24 = vpop.xlane.xlu1 %5322 }
0x249a   :  { %v5320_v25 = vpop.xlane.xlu0 %5319 }
0x249b   :  { %8335 = vrcp.f32 %v5320_v25 }
0x249c   :  { %8337 = vrcp.f32 %v5323_v24 }
0x249d   :  { %v8178_v44 = vpop.permute.xlu1 %8177 }
0x249e   :  { %v8173_v17 = vpop.permute.xlu0 %8172  ;;  %v8180_v62 = vunpack.i.h.bf16 %v8178_v44  ;;  %v8179_v26 = vunpack.i.l.bf16 %v8178_v44 }
0x249f   :  { %v8175_v18 = vunpack.i.h.bf16 %v8173_v17  ;;  %v8174_v45 = vunpack.i.l.bf16 %v8173_v17 }
0x24a0   :  { %v7865_v35 = vpack.c.bf16 %v8180_v62, %v8179_v26 }
0x24a1   :  { %v7861_v9 = vpack.c.bf16 %v8175_v18, %v8174_v45  ;;  %v8183_v27 = vpop.permute.xlu1 %8182 }
0x24a2   :  { %v8185_v28 = vunpack.i.h.bf16 %v8183_v27  ;;  %v8184_v5 = vunpack.i.l.bf16 %v8183_v27  ;;  %v8188_v59 = vpop.permute.xlu0 %8187 }
0x24a3   :  { %v8190_v19 = vunpack.i.h.bf16 %v8188_v59  ;;  %v8189_v29 = vunpack.i.l.bf16 %v8188_v59  ;;  %7862 = vmatprep.subr.bf16.mxu0 %v7861_v9 }
0x24a4   :  { %v7889_v6 = vpack.c.bf16 %v8185_v28, %v8184_v5  ;;  %7864 = vmatpush3.bf16.msra.mxu0 %v7861_v9 }
0x24a5   :  { %v8336_v7 = vpop.eup %8335  ;;  %v7895_v54 = vpack.c.bf16 %v8190_v19, %v8189_v29  ;;  %v5881_v8 = vpop.permute.xlu1 %5880  ;;  %7866 = vmatprep.subr.bf16.mxu0 %v7865_v35 }
0x24a6   :  { %v8338_v61 = vpop.eup %8337  ;;  %7891 = vmatprep.subr.msk.bf16.mxu1 %vm9363_vm2, %v7889_v6  ;;  %7532 = vmatprep.mubr.msk.f32.mxu1 %vm836_vm1, %v5881_v8  ;;  %v5326_v13 = vmul.f32 %v8336_v7, %v8334_v12  ;;  %v5883_v63 = vpop.permute.xlu0 %5882 }
0x24a7   :  { %7894 = vmatpush3.bf16.xpose.msk.msra.mxu1 %vm9363_vm2, %v7889_v6  ;;  %v5327_v30 = vmul.f32 %v8338_v61, %v8332_v58 }
0x24a8   :  { %7868 = vmatpush3.bf16.msra.mxu0 %v7865_v35  ;;  %7484 = vmatprep.mubr.msk.f32.mxu0 %vm352_vm0, %v5326_v13 }
0x24a9   :  { %7897 = vmatprep.subr.msk.bf16.mxu1 %vm9363_vm2, %v7895_v54  ;;  %7487 = vmatprep.subr.mxu0 %v4988_v20 }
0x24ab   :  { %7485 = vmatmul.mubr.msk.f32.vlgmr.msra.gmra.mrb[46].mxu0 %vm352_vm0, %v5327_v30  ;;  %v4990_v30 = vld [vmem:[#allocation19 + $0x38] sm:$0xff] }
0x24ac   :  { %7488 = vmatpush3.msra.mxu0 %v4988_v20 }
0x24ad   :  { %7492 = vmatprep.subr.mxu0 %v4987_v48 }
0x24af   :  { %7900 = vmatpush3.bf16.xpose.msk.msra.mxu1 %vm9363_vm2, %v7895_v54 }
0x24b6   :  { %7533 = vmatmul.mubr.msk.f32.vlgmr.msra.gmra.mrb[40].mxu1 %vm836_vm1, %v5883_v63 }
0x24d6   :  { %v5684_v31 = vpop.xlane.xlu1 %5683 }
0x24d7   :  { %v5688_v1 = vsub.f32 %v5674_v21, %v5684_v31  ;;  %v5687_v0 = vpop.xlane.xlu0 %5686 }
0x24d8   :  { %v5689_v15 = vsub.f32 %v5679_v22, %v5687_v0  ;;  %v6746_v0 = vld [vmem:[#allocation20 + $0x1] ss:$0 sm:$0xff] }
0x24d9   :  { %v5690_v33 = vmul.f32 1.442695, %v5688_v1 }
0x24da   :  { %v5692_v46 = vmul.f32 1.442695, %v5689_v15 }
0x24db   :  { %8339 = vpow2.f32 %v5690_v33 }
0x24dc   :  { %8341 = vpow2.f32 %v5692_v46 }
0x24e5   :  { %v8340_v36 = vpop.eup %8339 }
0x24e6   :  { %v8342_v16 = vpop.eup %8341  ;;  %v5694_v47 = vsel %vm352_vm0, %v8340_v36, 0.0 }
0x24e7   :  { %5695 = vadd.xlane.f32.xlu0 %v5694_v47  ;;  %v5697_v38 = vsel %vm352_vm0, %v8342_v16, 0.0 }
0x24e8   :  { %5698 = vadd.xlane.f32.xlu1 %v5697_v38 }
0x24f9   :  { %8197 = vrot.lane.b32.xlu1 %v9391_v41, %s8836_s4 }
0x24fd   :  { %8192 = vrot.lane.b32.xlu0 %v9387_v39, %s8836_s4 }
0x2574   :  { %v5696_v50 = vpop.xlane.xlu0 %5695 }
0x2575   :  { %8343 = vrcp.f32 %v5696_v50  ;;  %v5699_v52 = vpop.xlane.xlu1 %5698 }
0x2576   :  { %8345 = vrcp.f32 %v5699_v52 }
0x2578   :  { %v8193_v4 = vpop.permute.xlu0 %8192 }
0x2579   :  { %v8195_v53 = vunpack.i.h.bf16 %v8193_v4  ;;  %v8194_v56 = vunpack.i.l.bf16 %v8193_v4  ;;  %v8198_v2 = vpop.permute.xlu1 %8197 }
0x257a   :  { %v8200_v10 = vunpack.i.h.bf16 %v8198_v2  ;;  %v8199_v11 = vunpack.i.l.bf16 %v8198_v2  ;;  %v6235_v2 = vld [vmem:[#allocation22 + $0x28] sm:$0xff] }
0x257b   :  { %v7881_v60 = vpack.c.bf16 %v8195_v53, %v8194_v56 }
0x257c   :  { %v7885_v12 = vpack.c.bf16 %v8200_v10, %v8199_v11  ;;  %v6236_v10 = vld [vmem:[#allocation22 + $0x30] sm:$0xff]  ;;  %v6237_v11 = vld [vmem:[#allocation22 + $0x38] sm:$0xff] }
0x257e   :  { %v7486_v42 = vpop.f32.mrb[46].mxu0 }
0x257f   :  { %v5412_v43 = vpop.f32.mrb[47].mxu0  ;;  %v8344_v3 = vpop.eup %8343 }
0x2580   :  { %7489 = vmatprep.mubr.msk.f32.mxu0 %vm836_vm1, %v5412_v43  ;;  %v5702_v58 = vmul.f32 %v8344_v3, %v8340_v36 }
0x2581   :  { %7490 = vmatmul.mubr.msk.f32.vlgmr.msra.gmra.mrb[48].mxu0 %vm836_vm1, %v7486_v42 }
0x2582   :  { %7493 = vmatpush3.msra.mxu0 %v4987_v48  ;;  %7494 = vmatprep.mubr.msk.f32.mxu0 %vm836_vm1, %v9949_v37  ;;  %v8346_v37 = vpop.eup %8345 }
0x2583   :  { %7882 = vmatprep.subr.bf16.mxu0 %v7881_v60  ;;  %v5703_v24 = vmul.f32 %v8346_v37, %v8342_v16 }
0x2589   :  { %7495 = vmatmul.mubr.msk.f32.vlgmr.msra.gmra.mrb[48].mxu0 %vm836_vm1, %v9947_v32  ;;  %v7534_v57 = vpop.f32.mrb[40].mxu1  ;;  %v4989_v32 = vld [vmem:[#allocation19 + $0x30] sm:$0xff] }
0x258a   :  { %7884 = vmatpush3.bf16.msra.mxu0 %v7881_v60  ;;  %v5976_v40 = vadd.f32 %v9892_v49, %v7534_v57  ;;  %7516 = vmatprep.mubr.msk.f32.mxu0 %vm352_vm0, %v5702_v58  ;;  %v5970_v21 = vpop.f32.mrb[41].mxu1  ;;  %v7913_v58 = vpack.c.bf16 %v6237_v11, %v6236_v10  ;;  %v6753_v57 = vld [vmem:[%s10152_s27 + $0x48] sm:$0xff]  ;;  %v6763_v10 = vld [vmem:[#allocation26 + $0x5] ss:$0 sm:$0xff] }
0x258b   :  { %7886 = vmatprep.subr.bf16.mxu0 %v7885_v12  ;;  %v5971_v22 = vadd.f32 %v9898_v51, %v5970_v21 }
0x258c   :  { %v5982_v23 = vsel %vm352_vm0, %v5976_v40, -inf }
0x258d   :  { %5983 = vmax.xlane.f32.xlu0 %v5982_v23  ;;  %v5979_v55 = vsel %vm352_vm0, %v5971_v22, -inf  ;;  %v6756_v23 = vld [vmem:[%s10152_s27 + $0x60] sm:$0xff] }
0x258e   :  { %7888 = vmatpush3.bf16.msra.mxu0 %v7885_v12  ;;  %5980 = vmax.xlane.f32.xlu1 %v5979_v55  ;;  %v6752_v12 = vld [vmem:[%s10152_s27 + $0x40] sm:$0xff]  ;;  %v6757_v55 = vld [vmem:[%s10152_s27 + $0x68] sm:$0xff] }
0x258f   :  { %7519 = vmatprep.subr.mxu0 %v4989_v32  ;;  %v7917_v21 = vpack.c.bf16 %v6753_v57, %v6752_v12  ;;  %v6764_v12 = vld [vmem:[#allocation28 + $0x5] ss:$0 sm:$0xff] }
0x2591   :  { %7517 = vmatmul.mubr.msk.f32.vlgmr.msra.gmra.mrb[50].mxu0 %vm352_vm0, %v5703_v24  ;;  %7918 = vmatprep.subr.bf16.mxu1 %v7917_v21  ;;  %v7925_v24 = vpack.c.bf16 %v6757_v55, %v6756_v23 }
0x2592   :  { %7520 = vmatpush3.msra.mxu0 %v4989_v32  ;;  %7920 = vmatpush3.bf16.msra.mxu1 %v7917_v21 }
0x261a   :  { %v5984_v49 = vpop.xlane.xlu0 %5983 }
0x261b   :  { %v5986_v25 = vsub.f32 %v5976_v40, %v5984_v49  ;;  %v5981_v44 = vpop.xlane.xlu1 %5980  ;;  %v6754_v40 = vld [vmem:[%s10152_s27 + $0x50] sm:$0xff] }
0x261c   :  { %v5985_v17 = vsub.f32 %v5971_v22, %v5981_v44  ;;  %v6755_v22 = vld [vmem:[%s10152_s27 + $0x58] sm:$0xff] }
0x261d   :  { %v5989_v62 = vmul.f32 1.442695, %v5986_v25  ;;  %v7921_v37 = vpack.c.bf16 %v6755_v22, %v6754_v40 }
0x261e   :  { %v5987_v51 = vmul.f32 1.442695, %v5985_v17 }
0x261f   :  { %8347 = vpow2.f32 %v5989_v62  ;;  %7922 = vmatprep.subr.bf16.mxu1 %v7921_v37 }
0x2620   :  { %8349 = vpow2.f32 %v5987_v51  ;;  %7924 = vmatpush3.bf16.msra.mxu1 %v7921_v37 }
0x2621   :  { %7926 = vmatprep.subr.bf16.mxu1 %v7925_v24 }
0x2624   :  { %7928 = vmatpush3.bf16.msra.mxu1 %v7925_v24 }
0x2629   :  { %v8348_v26 = vpop.eup %8347 }
0x262a   :  { %v8350_v18 = vpop.eup %8349  ;;  %v5994_v45 = vsel %vm352_vm0, %v8348_v26, 0.0 }
0x262b   :  { %5995 = vadd.xlane.f32.xlu1 %v5994_v45  ;;  %v5991_v9 = vsel %vm352_vm0, %v8350_v18, 0.0 }
0x262c   :  { %5992 = vadd.xlane.f32.xlu0 %v5991_v9 }
0x263c   :  { %8207 = vrot.lane.b32.xlu1 %v9391_v41, %s8839_s18 }
0x2642   :  { %8202 = vrot.lane.b32.xlu0 %v9387_v39, %s8839_s18 }
0x2664   :  { %v7518_v27 = vpop.f32.mrb[50].mxu0 }
0x2665   :  { %v5788_v28 = vpop.f32.mrb[51].mxu0 }
0x2666   :  { %7521 = vmatprep.mubr.msk.f32.mxu0 %vm836_vm1, %v5788_v28 }
0x2667   :  { %7522 = vmatmul.mubr.msk.f32.vlgmr.msra.gmra.mrb[48].mxu0 %vm836_vm1, %v7518_v27  ;;  %v6748_v27 = vld [vmem:[#allocation28 + $0x4] ss:$0 sm:$0xff] }
0x26b8   :  { %v5996_v5 = vpop.xlane.xlu1 %5995 }
0x26b9   :  { %v5993_v59 = vpop.xlane.xlu0 %5992 }
0x26ba   :  { %8351 = vrcp.f32 %v5993_v59 }
0x26bb   :  { %8353 = vrcp.f32 %v5996_v5 }
0x26bc   :  { %v8208_v35 = vpop.permute.xlu1 %8207 }
0x26bd   :  { %v8203_v19 = vpop.permute.xlu0 %8202  ;;  %v8210_v29 = vunpack.i.h.bf16 %v8208_v35  ;;  %v8209_v6 = vunpack.i.l.bf16 %v8208_v35 }
0x26be   :  { %v8205_v7 = vunpack.i.h.bf16 %v8203_v19  ;;  %v8204_v54 = vunpack.i.l.bf16 %v8203_v19  ;;  %v6758_v19 = vld [vmem:[%s10152_s27 + $0x70] sm:$0xff] }
0x26bf   :  { %v7905_v8 = vpack.c.bf16 %v8210_v29, %v8209_v6  ;;  %v6759_v29 = vld [vmem:[%s10152_s27 + $0x78] sm:$0xff] }
0x26c0   :  { %v7901_v41 = vpack.c.bf16 %v8205_v7, %v8204_v54  ;;  %v7929_v6 = vpack.c.bf16 %v6759_v29, %v6758_v19  ;;  %v6749_v7 = vld [vmem:[#allocation23 + $0x1] ss:$0 sm:$0xff]  ;;  %v6765_v19 = vld [vmem:[%s10153_s19] ss:$0 sm:$0xff] }
0x26c2   :  { %7902 = vmatprep.subr.bf16.mxu0 %v7901_v41  ;;  %7930 = vmatprep.subr.bf16.mxu1 %v7929_v6 }
0x26c3   :  { %7904 = vmatpush3.bf16.msra.mxu0 %v7901_v41  ;;  %7932 = vmatpush3.bf16.msra.mxu1 %v7929_v6 }
0x26c4   :  { %v8352_v39 = vpop.eup %8351  ;;  %7906 = vmatprep.subr.bf16.mxu0 %v7905_v8 }
0x26c5   :  { %v8354_v61 = vpop.eup %8353  ;;  %v5999_v13 = vmul.f32 %v8352_v39, %v8350_v18 }
0x26c6   :  { %v6000_v63 = vmul.f32 %v8354_v61, %v8348_v26  ;;  %v6747_v26 = vld [vmem:[#allocation26 + $0x4] ss:$0 sm:$0xff] }
0x26c7   :  { %7908 = vmatpush3.bf16.msra.mxu0 %v7905_v8  ;;  %7543 = vmatprep.mubr.msk.f32.mxu0 %vm352_vm0, %v5999_v13 }
0x26c8   :  { %7546 = vmatprep.subr.mxu0 %v4990_v30 }
0x26ca   :  { %7544 = vmatmul.mubr.msk.f32.vlgmr.msra.gmra.mrb[52].mxu0 %vm352_vm0, %v6000_v63 }
0x26cb   :  { %7547 = vmatpush3.msra.mxu0 %v4990_v30  ;;  %v6760_v30 = vld [vmem:[#allocation25 + $0x1] ss:$0 sm:$0xff] }
0x279d   :  { %v7545_v31 = vpop.f32.mrb[52].mxu0 }
0x279e   :  { %v6085_v1 = vpop.f32.mrb[53].mxu0 }
0x279f   :  { %7548 = vmatprep.mubr.msk.f32.mxu0 %vm836_vm1, %v6085_v1 }
0x27a0   :  { %7549 = vmatmul.mubr.msk.f32.vlgmr.msra.gmra.mrb[48].mxu0 %vm836_vm1, %v7545_v31 }
0x2873   :  { %v7550_v15 = vpop.f32.mrb[48].mxu0 }
0x2874   :  { %v6184_v33 = vadd.f32 %v7550_v15, %v6746_v0  ;;  %v6166_v46 = vpop.f32.mrb[49].mxu0 }
0x2875   :  { %v6183_v36 = vadd.f32 %v6746_v0, %v6166_v46 }
0x2876   :  { %v6186_v16 = vadd.f32 %v6184_v33, %v9877_v14 }
0x2877   :  { %v6185_v47 = vadd.f32 %v6183_v36, %v9871_v34  ;;  %v6234_v34 = vld [vmem:[#allocation22 + $0x20] sm:$0xff] }
0x2878   :  { %v6194_v38 = vsel %vm352_vm0, %v6186_v16, 0.0  ;;  %v7909_v3 = vpack.c.bf16 %v6235_v2, %v6234_v34 }
0x2879   :  { %6195 = vadd.xlane.f32.xlu0 %v6194_v38  ;;  %v6191_v20 = vsel %vm352_vm0, %v6185_v47, 0.0 }
0x287a   :  { %6192 = vadd.xlane.f32.xlu1 %v6191_v20  ;;  %7910 = vmatprep.subr.bf16.mxu0 %v7909_v3 }
0x287b   :  { %7912 = vmatpush3.bf16.msra.mxu0 %v7909_v3 }
0x287c   :  { %7914 = vmatprep.subr.bf16.mxu0 %v7913_v58 }
0x287f   :  { %7916 = vmatpush3.bf16.msra.mxu0 %v7913_v58 }
0x2906   :  { %v6196_v48 = vpop.xlane.xlu0 %6195 }
0x2907   :  { %v6198_v50 = vmul.f32 0.03125, %v6196_v48  ;;  %v6193_v4 = vpop.xlane.xlu1 %6192 }
0x2908   :  { %v6197_v52 = vmul.f32 0.03125, %v6193_v4 }
0x2909   :  { %v6200_v53 = vsub.f32 %v6186_v16, %v6198_v50 }
0x290a   :  { %v6199_v56 = vsub.f32 %v6185_v47, %v6197_v52 }
0x290b   :  { %v6202_v42 = vmul.f32 %v6200_v53, %v6200_v53 }
0x290c   :  { %v6201_v43 = vmul.f32 %v6199_v56, %v6199_v56 }
0x290d   :  { %v6206_v60 = vsel %vm352_vm0, %v6202_v42, 0.0 }
0x290e   :  { %6207 = vadd.xlane.f32.xlu1 %v6206_v60  ;;  %v6203_v14 = vsel %vm352_vm0, %v6201_v43, 0.0 }
0x290f   :  { %6204 = vadd.xlane.f32.xlu0 %v6203_v14 }
0x299b   :  { %v6208_v32 = vpop.xlane.xlu1 %6207 }
0x299c   :  { %v6210_v49 = vmul.f32 0.03125, %v6208_v32  ;;  %v6205_v25 = vpop.xlane.xlu0 %6204 }
0x299d   :  { %v6209_v44 = vmul.f32 0.03125, %v6205_v25 }
0x299e   :  { %v6212_v17 = vadd.f32 1e-05, %v6210_v49 }
0x299f   :  { %v6211_v62 = vadd.f32 1e-05, %v6209_v44 }
0x29a0   :  { %8355 = vrsqrt.f32 %v6212_v17 }
0x29a1   :  { %8357 = vrsqrt.f32 %v6211_v62 }
0x29aa   :  { %v8356_v51 = vpop.eup %8355 }
0x29ab   :  { %v8358_v18 = vpop.eup %8357  ;;  %v6216_v45 = vmul.f32 %v8356_v51, %v6200_v53 }
0x29ac   :  { %v6215_v9 = vmul.f32 %v8358_v18, %v6199_v56 }
0x29ad   :  { %v6224_v28 = vmul.f32 %v6747_v26, %v6216_v45 }
0x29ae   :  { %v6223_v5 = vmul.f32 %v6747_v26, %v6215_v9 }
0x29af   :  { %v6232_v35 = vadd.f32 %v6748_v27, %v6224_v28 }
0x29b0   :  { %v6231_v59 = vadd.f32 %v6748_v27, %v6223_v5 }
0x29b2   :  { %7559 = vmatprep.mubr.msk.f32.mxu0 %vm352_vm0, %v6231_v59 }
0x29b3   :  { %7560 = vmatmul.mubr.msk.f32.vlgmr.msra.gmra.mrb[54].mxu0 %vm352_vm0, %v6232_v35 }
0x2a86   :  { %v7561_v54 = vpop.f32.mrb[54].mxu0 }
0x2a87   :  { %v6324_v41 = vadd.f32 %v7561_v54, %v6749_v7  ;;  %v6318_v8 = vpop.f32.mrb[55].mxu0  ;;  %v6766_v54 = vld [vmem:[#allocation29] ss:$0 sm:$0xff] }
0x2a88   :  { %v6319_v39 = vadd.f32 %v6749_v7, %v6318_v8 }
0x2a89   :  { %v6328_v13 = vmax.f32 %v6324_v41, 0.0 }
0x2a8a   :  { %v6327_v61 = vmax.f32 %v6319_v39, 0.0 }
0x2a8c   :  { %7578 = vmatprep.mubr.msk.f32.mxu1 %vm3453_vm4, %v6327_v61 }
0x2a8d   :  { %7579 = vmatmul.mubr.msk.f32.vlgmr.msra.gmra.mrb[42].mxu1 %vm3453_vm4, %v6328_v13 }
0x2b60   :  { %v7580_v63 = vpop.f32.mrb[42].mxu1 }
0x2b61   :  { %v6424_v31 = vadd.f32 %v7580_v63, %v6760_v30  ;;  %v6418_v1 = vpop.f32.mrb[43].mxu1 }
0x2b62   :  { %v6419_v0 = vadd.f32 %v6760_v30, %v6418_v1 }
0x2b63   :  { %v6428_v15 = vadd.f32 %v6424_v31, %v6232_v35 }
0x2b64   :  { %v6427_v33 = vadd.f32 %v6419_v0, %v6231_v59 }
0x2b65   :  { %v6436_v46 = vsel %vm352_vm0, %v6428_v15, 0.0 }
0x2b66   :  { %6437 = vadd.xlane.f32.xlu1 %v6436_v46  ;;  %v6433_v36 = vsel %vm352_vm0, %v6427_v33, 0.0 }
0x2b67   :  { %6434 = vadd.xlane.f32.xlu0 %v6433_v36 }
0x2bf3   :  { %v6438_v16 = vpop.xlane.xlu1 %6437 }
0x2bf4   :  { %v6440_v47 = vmul.f32 0.03125, %v6438_v16  ;;  %v6435_v38 = vpop.xlane.xlu0 %6434 }
0x2bf5   :  { %v6439_v20 = vmul.f32 0.03125, %v6435_v38 }
0x2bf6   :  { %v6442_v48 = vsub.f32 %v6428_v15, %v6440_v47 }
0x2bf7   :  { %v6441_v50 = vsub.f32 %v6427_v33, %v6439_v20 }
0x2bf8   :  { %v6444_v4 = vmul.f32 %v6442_v48, %v6442_v48 }
0x2bf9   :  { %v6443_v52 = vmul.f32 %v6441_v50, %v6441_v50 }
0x2bfa   :  { %v6448_v53 = vsel %vm352_vm0, %v6444_v4, 0.0 }
0x2bfb   :  { %6449 = vadd.xlane.f32.xlu1 %v6448_v53  ;;  %v6445_v56 = vsel %vm352_vm0, %v6443_v52, 0.0 }
0x2bfc   :  { %6446 = vadd.xlane.f32.xlu0 %v6445_v56 }
0x2c88   :  { %v6450_v42 = vpop.xlane.xlu1 %6449 }
0x2c89   :  { %v6452_v43 = vmul.f32 0.03125, %v6450_v42  ;;  %v6447_v60 = vpop.xlane.xlu0 %6446 }
0x2c8a   :  { %v6451_v14 = vmul.f32 0.03125, %v6447_v60 }
0x2c8b   :  { %v6454_v34 = vadd.f32 1e-05, %v6452_v43 }
0x2c8c   :  { %v6453_v2 = vadd.f32 1e-05, %v6451_v14 }
0x2c8d   :  { %8359 = vrsqrt.f32 %v6454_v34 }
0x2c8e   :  { %8361 = vrsqrt.f32 %v6453_v2 }
0x2c97   :  { %v8360_v3 = vpop.eup %8359 }
0x2c98   :  { %v8362_v11 = vpop.eup %8361  ;;  %v6458_v58 = vmul.f32 %v8360_v3, %v6442_v48 }
0x2c99   :  { %v6457_v57 = vmul.f32 %v8362_v11, %v6441_v50 }
0x2c9a   :  { %v6466_v40 = vmul.f32 %v6763_v10, %v6458_v58 }
0x2c9b   :  { %v6465_v21 = vmul.f32 %v6763_v10, %v6457_v57 }
0x2c9c   :  { %v6474_v22 = vadd.f32 %v6764_v12, %v6466_v40 }
0x2c9d   :  { %v6473_v37 = vadd.f32 %v6764_v12, %v6465_v21 }
0x2c9e   :  { %v6480_v23 = vsel %vm352_vm0, %v6474_v22, 0.0 }
0x2c9f   :  { %6481 = vadd.xlane.f32.xlu1 %v6480_v23  ;;  %v6477_v55 = vsel %vm352_vm0, %v6473_v37, 0.0 }
0x2ca0   :  { %6478 = vadd.xlane.f32.xlu0 %v6477_v55 }
0x2d2c   :  { %v6482_v24 = vpop.xlane.xlu1 %6481 }
0x2d2d   :  { %v6484_v32 = vmul.f32 0.03125, %v6482_v24  ;;  %v6479_v49 = vpop.xlane.xlu0 %6478 }
0x2d2e   :  { %v6483_v25 = vmul.f32 0.03125, %v6479_v49 }
0x2d2f   :  { %v6486_v44 = vsub.f32 %v6474_v22, %v6484_v32 }
0x2d30   :  { %v6485_v17 = vsub.f32 %v6473_v37, %v6483_v25 }
0x2d31   :  { %v6488_v62 = vmul.f32 %v6486_v44, %v6486_v44 }
0x2d32   :  { %v6487_v51 = vmul.f32 %v6485_v17, %v6485_v17 }
0x2d33   :  { %v6492_v26 = vsel %vm352_vm0, %v6488_v62, 0.0 }
0x2d34   :  { %6493 = vadd.xlane.f32.xlu1 %v6492_v26  ;;  %v6489_v18 = vsel %vm352_vm0, %v6487_v51, 0.0 }
0x2d35   :  { %6490 = vadd.xlane.f32.xlu0 %v6489_v18 }
0x2dc1   :  { %v6494_v45 = vpop.xlane.xlu1 %6493 }
0x2dc2   :  { %v6496_v9 = vmul.f32 0.03125, %v6494_v45  ;;  %v6491_v27 = vpop.xlane.xlu0 %6490 }
0x2dc3   :  { %v6495_v28 = vmul.f32 0.03125, %v6491_v27 }
0x2dc4   :  { %v6498_v5 = vadd.f32 1e-05, %v6496_v9 }
0x2dc5   :  { %v6497_v59 = vadd.f32 1e-05, %v6495_v28 }
0x2dc6   :  { %8363 = vrsqrt.f32 %v6498_v5 }
0x2dc7   :  { %8365 = vrsqrt.f32 %v6497_v59 }
0x2dd0   :  { %v8364_v35 = vpop.eup %8363 }
0x2dd1   :  { %v8366_v29 = vpop.eup %8365  ;;  %v6502_v6 = vmul.f32 %v8364_v35, %v6486_v44 }
0x2dd2   :  { %v6501_v7 = vmul.f32 %v8366_v29, %v6485_v17 }
0x2dd3   :  { %v6510_v41 = vmul.f32 %v6765_v19, %v6502_v6 }
0x2dd4   :  { %v6509_v8 = vmul.f32 %v6765_v19, %v6501_v7 }
0x2dd5   :  { %v6518_v39 = vadd.f32 %v6766_v54, %v6510_v41 }
0x2dd6   :  { %v6517_v61 = vadd.f32 %v6766_v54, %v6509_v8 }
0x2dd7   :  { %6520 = vst.msk [vmem:[#allocation31 + $0x8] sm:$0xff] %vm352_vm0, %v6518_v39 }
0x2dd8   :  { %6519 = vst.msk [vmem:[#allocation31] sm:$0xff] %vm352_vm0, %v6517_v61 }
0x2dd9   :  { %8778 = shalt.err (!%p8775_p8)
}
0x2dda   :  { %s10154_s21 = sld [smem:[#allocation58_spill]] }
0x2de0   :  { %s8779_s22 = scalar_lea.hbm %s10154_s21, 256 }
0x2de1   :  { %p8780_p9 = scmp.ne.s32.totalorder %s10154_s21, %s8779_s22  ;;  %p8783_p10 = scmp.lt.u32.totalorder %s8779_s22, %s10154_s21 }
0x2de3   :  { %p8785_p11 = pnand %p8783_p10, %p8780_p9 }
0x2de5   :  { %8788 = shalt.err (!%p8785_p11)
}
0x2de6   :  { %6532 = dma.vmem_to_hbm [thread:$0]  %s6527_s20, 256, %s10154_s21, [#allocation4], %s8816_s3, %s8816_s3, %s8817_s1  }
0x2de7   :  { %8809 = dma.done.wait [#allocation4], 256  }
0x2de8   :  { %8810 = vsyncadd [#allocation4], 4294967040 }
0x2de9   :  { %6536 = vsyncpa [#allocation3], 1 }
0x2dea   :  { %6537 = vsyncpa [#allocation6], 1 }
0x2deb   :  { %6538 = vsyncpa [#allocation9], 1 }
0x2dec   :  { %6539 = vsyncpa [#allocation12], 1 }
0x2ded   :  { %6540 = vsyncpa [#allocation15], 1 }
0x2dee   :  { %6541 = vsyncpa [#allocation18], 1 }
0x2def   :  { %6542 = vsyncpa [#allocation21], 1 }
0x2df0   :  { %6543 = vsyncpa [#allocation24], 1 }
0x2df1   :  { %6544 = vsyncpa [#allocation27], 1 }
0x2df2   :  { %6545 = vsyncpa [#allocation30], 1 }
0x2df3   :  { %6546 = vsyncpa [#allocation4], 1 }

</bundles_post_ra>
